<compile_context>
chip_gen: v7x
topology: tpu7x:2x2x1
jax: 0.10.0
libtpu: 0.0.40
codegen_flags: <defaults>
</compile_context>

<pallas_src>
import functools

import numpy as np
import jax
import jax.numpy as jnp
from jax.experimental import pallas as pl
from jax.experimental.pallas import tpu as pltpu

BN_EPS = 1e-5

# Geometry implied by the reference module (eo = 10  =>  40x40 input).
H_IN = W_IN = 40
C1, W1 = 16, 20        # conv1: 1 -> 16 channels, 40 -> 20 spatial
C2, W2 = 32, 10        # conv2: 16 -> 32 channels, 20 -> 10 spatial
EO = 10                # conv3 / fc spatial size (== W2)

LANE1 = 384            # conv1 output lanes (w1*c1 = 320) padded to 3*128
LANE2 = 384            # conv2 output lanes (w2*c2 = 320) padded to 3*128
NB = 8                 # images per grid step (M-stacking); multiple of 8.
                       # Tune ~6-8 for v5e (128x128 MXU), ~12-16 for v6e/v7x.


# ------------------------------ Pallas kernel ------------------------------- #

def _convvae_kernel(xp_ref, m1_ref, t1_ref, m2_ref, t2_ref, m3_ref, t3_ref,
                    g_ref, bfc_ref, out_ref, a1_ref, a3_ref):
    """NB images per grid step; all activations stay in VMEM (bf16)."""
    R1 = EO * NB                       # rows per conv1-parity group (= conv2 rows)

    def mm(x, w):
        # bf16 MXU inputs, f32 accumulation.
        return jnp.dot(x, w, preferred_element_type=jnp.float32)

    # ---- conv1 (k4 s2 p1, 1->16) + BN + ReLU --------------------------------
    # Host did the height im2row, so conv1 is one matmul with M = 2*R1 = 20*NB.
    # Row layout: [even conv1 rows (h=2p), h-major/image-minor | odd rows (h=2p+1)].
    a1 = jnp.maximum(mm(xp_ref[...], m1_ref[...]) + t1_ref[...], 0.0)
    a1 = a1.astype(jnp.bfloat16)

    # Stage conv1 output so both conv2 tap-pairs are aligned unit-stride slices:
    #   a1_ref row p*NB+n = [ even_p | odd_{p-1} ]   (p = 0..10, 2*LANE1 lanes)
    # with the p=10 even block and p=0 odd block zero (conv2 height padding).
    zpad = jnp.zeros((NB, LANE1), jnp.bfloat16)
    a1_ref[0:R1, 0:LANE1] = a1[0:R1, :]                        # even conv1 rows 2p
    a1_ref[R1:R1 + NB, 0:LANE1] = zpad                         # even_{10} = 0
    a1_ref[NB:R1 + NB, LANE1:2 * LANE1] = a1[R1:2 * R1, :]     # odd conv1 rows 2p-1
    a1_ref[0:NB, LANE1:2 * LANE1] = zpad                       # odd_{-1} = 0

    # ---- conv2 (k4 s2 p1, 16->32) + BN + ReLU: two K=768 matmuls -------------
    z2 = (mm(a1_ref[0:R1, :], m2_ref[0]) +                     # [kh=1 | kh=0] taps
          mm(a1_ref[NB:R1 + NB, :], m2_ref[1]))                # [kh=3 | kh=2] taps
    a2 = jnp.maximum(z2 + t2_ref[...], 0.0).astype(jnp.bfloat16)

    # ---- conv3 (1x1, 32->2L) + BN + ReLU (block-diagonal lane matmul) --------
    a3_ref[...] = jnp.maximum(mm(a2, m3_ref[...]) + t3_ref[...], 0.0
                              ).astype(jnp.bfloat16)

    # ---- fc21 | fc22: out[n] = bfc + sum_u a3[(u, n), :] @ G[u] --------------
    # 10 independent (NB, lane3) x (lane3, 2L) matmuls + tree sum (no carried
    # accumulator, so the MXU pushes pipeline).
    parts = [mm(a3_ref[u * NB:(u + 1) * NB, :], g_ref[u]) for u in range(EO)]
    while len(parts) > 1:
        nxt = [parts[i] + parts[i + 1] for i in range(0, len(parts) - 1, 2)]
        if len(parts) % 2:
            nxt.append(parts[-1])
        parts = nxt
    out_ref[...] = parts[0] + bfc_ref[...]


def _encode_pallas(xp, prep, l2, b_padded):
    grid_n = b_padded // NB
    rows_in = 2 * EO * NB              # 20*NB im2row rows per grid step
    lane_in = 4 * W_IN                 # 160
    lane3 = EO * l2
    return pl.pallas_call(
        _convvae_kernel,
        out_shape=jax.ShapeDtypeStruct((b_padded, l2), jnp.float32),
        grid=(grid_n,),
        in_specs=[
            pl.BlockSpec((rows_in, lane_in), lambda b: (b, 0)),
            pl.BlockSpec((lane_in, LANE1), lambda b: (0, 0)),
            pl.BlockSpec((1, LANE1), lambda b: (0, 0)),
            pl.BlockSpec((2, 2 * LANE1, LANE2), lambda b: (0, 0, 0)),
            pl.BlockSpec((1, LANE2), lambda b: (0, 0)),
            pl.BlockSpec((LANE2, lane3), lambda b: (0, 0)),
            pl.BlockSpec((1, lane3), lambda b: (0, 0)),
            pl.BlockSpec((EO, lane3, l2), lambda b: (0, 0, 0)),
            pl.BlockSpec((1, l2), lambda b: (0, 0)),
        ],
        out_specs=pl.BlockSpec((NB, l2), lambda b: (b, 0)),
        scratch_shapes=[pltpu.VMEM(((EO + 1) * NB, 2 * LANE1), jnp.bfloat16),
                        pltpu.VMEM((EO * NB, lane3), jnp.bfloat16)],
        compiler_params=pltpu.CompilerParams(
            dimension_semantics=("parallel",)),
    )(xp, prep["m1"], prep["t1"], prep["m2"], prep["t2"],
      prep["m3"], prep["t3"], prep["g"], prep["bfc"])


# ----------------------- one-time host-side weight prep ---------------------- #

def prepare_params(params, code_len):
    """Fold conv bias + eval-mode BN into 128-aligned lane-space matrices.

    Done ONCE, outside the per-forward jit path."""
    L = int(code_len)
    L2 = 2 * L
    lane3 = EO * L2

    def to_np(v):
        return np.asarray(v, np.float32)

    w1, b1 = to_np(params["w1"]), to_np(params["b1"])
    w2, b2 = to_np(params["w2"]), to_np(params["b2"])
    w3, b3 = to_np(params["w3"]), to_np(params["b3"])
    w21, b21 = to_np(params["w21"]), to_np(params["b21"])
    w22, b22 = to_np(params["w22"]), to_np(params["b22"])
    bn1 = {k: to_np(v) for k, v in params["bn1"].items()}
    bn2 = {k: to_np(v) for k, v in params["bn2"].items()}
    bn3 = {k: to_np(v) for k, v in params["bn3"].items()}

    def fold(w, b, bn):
        a = bn["gamma"] / np.sqrt(bn["rv"] + BN_EPS)
        return w * a[:, None, None, None], a * (b - bn["rm"]) + bn["beta"]

    w1e, s1 = fold(w1, b1, bn1)          # (16,1,4,4), (16,)
    w2e, s2 = fold(w2, b2, bn2)          # (32,16,4,4), (32,)
    w3e, s3 = fold(w3, b3, bn3)          # (2L,32,1,1), (2L,)

    # conv1: rows = (kh, input width col); cols = (w_out, c_out) padded to LANE1.
    m1 = np.zeros((4 * W_IN, LANE1), np.float32)
    for kh in range(4):
        for j in range(W1):
            for kw in range(4):
                wi = 2 * j + kw - 1
                if 0 <= wi < W_IN:
                    m1[kh * W_IN + wi, j * C1:(j + 1) * C1] = w1e[:, 0, kh, kw]
    t1 = np.zeros((1, LANE1), np.float32)
    t1[0, :W1 * C1] = np.tile(s1, W1)

    # conv2: per-kh blocks; rows = conv1 lanes (w1, c1) pad LANE1, cols = (w2, c2) pad LANE2.
    m2k = np.zeros((4, LANE1, LANE2), np.float32)
    for kh in range(4):
        for v in range(W2):
            for kw in range(4):
                wi = 2 * v + kw - 1
                if 0 <= wi < W1:
                    m2k[kh, wi * C1:(wi + 1) * C1, v * C2:(v + 1) * C2] = \
                        w2e[:, :, kh, kw].T
    # Pair taps to match scratch rows [even_v | odd_{v-1}] and [even_{v+1} | odd_v].
    m2 = np.stack([np.concatenate([m2k[1], m2k[0]], axis=0),
                   np.concatenate([m2k[3], m2k[2]], axis=0)])     # (2, 768, 384)
    t2 = np.zeros((1, LANE2), np.float32)
    t2[0, :W2 * C2] = np.tile(s2, W2)

    # conv3 (1x1): block-diagonal over width.
    m3 = np.zeros((LANE2, lane3), np.float32)
    for v in range(W2):
        m3[v * C2:(v + 1) * C2, v * L2:(v + 1) * L2] = w3e[:, :, 0, 0].T
    t3 = np.tile(s3, W2)[None, :]                                 # (1, lane3)

    # fc21/fc22: PyTorch flattens (c, h, w); re-index to rows=h(u), lanes=(w(v), c),
    # mu columns first then logvar.
    W21r = w21.reshape(L, L2, EO, EO)                             # [m, c, u, v]
    W22r = w22.reshape(L, L2, EO, EO)
    gmu = np.transpose(W21r, (2, 3, 1, 0)).reshape(EO, lane3, L)  # [u, (v,c), m]
    glv = np.transpose(W22r, (2, 3, 1, 0)).reshape(EO, lane3, L)
    g = np.concatenate([gmu, glv], axis=2)                        # (10, lane3, 2L)
    bfc = np.concatenate([b21, b22])[None, :]                     # (1, 2L)

    return dict(
        m1=jnp.asarray(m1, jnp.bfloat16),
        t1=jnp.asarray(t1, jnp.float32),
        m2=jnp.asarray(m2, jnp.bfloat16),
        t2=jnp.asarray(t2, jnp.float32),
        m3=jnp.asarray(m3, jnp.bfloat16),
        t3=jnp.asarray(t3, jnp.float32),
        g=jnp.asarray(g, jnp.bfloat16),
        bfc=jnp.asarray(bfc, jnp.float32),
    )


# --------------------------------- forward ----------------------------------- #

@functools.partial(jax.jit, static_argnames=("code_len",))
def conv_vae_forward(x, prep, code_len):
    """Eval-mode ConvVAE.forward: returns (c, mu, logvar) with c = mu."""
    B = x.shape[0]
    L = code_len
    grid_n = -(-B // NB)
    Bp = grid_n * NB

    xs = x[:, 0, :, :]                                       # (B, 40, 40)
    if Bp != B:
        xs = jnp.pad(xs, ((0, Bp - B), (0, 0), (0, 0)))

    # Host height-im2row for conv1 (k4 s2 p1): output row i reads input rows
    # 2i-1 .. 2i+2.  Concatenate the 4 taps on lanes; even output rows first,
    # then odd, each ordered (h-major, image-minor) so every slice in the kernel
    # is a contiguous, aligned block.
    xpad = jnp.pad(xs, ((0, 0), (1, 1), (0, 0)))              # rows -1 .. 40
    even = xpad[:, 0:H_IN, :].reshape(Bp, EO, 4 * W_IN)       # conv1 rows 0,2,...,18
    odd = xpad[:, 2:H_IN + 2, :].reshape(Bp, EO, 4 * W_IN)    # conv1 rows 1,3,...,19

    def regroup(t):   # (Bp, 10, 160) -> (grid, 10, NB, 160)
        return t.reshape(grid_n, NB, EO, 4 * W_IN).transpose(0, 2, 1, 3)

    xp = jnp.concatenate([regroup(even), regroup(odd)], axis=1)   # (grid, 20, NB, 160)
    xp = xp.reshape(grid_n * 2 * EO * NB, 4 * W_IN).astype(jnp.bfloat16)

    out = _encode_pallas(xp, prep, 2 * L, Bp)[:B]             # (B, 2L)
    mu, logvar = out[:, :L], out[:, L:]
    # TODO(synk): eval-mode reparameterize only (c = mu); training mode needs randn eps.
    return mu, mu, logvar


# ------------------------------ params & reference ---------------------------- #

def init_params(key, code_len):
    L = code_len
    L2 = 2 * L
    ks = jax.random.split(key, 16)

    def nrm(k, shape, std):
        return std * jax.random.normal(k, shape, jnp.float32)

    p = {
        "w1": nrm(ks[0], (16, 1, 4, 4), 0.25),
        "b1": nrm(ks[1], (16,), 0.1),
        "w2": nrm(ks[2], (32, 16, 4, 4), 1.0 / 16.0),
        "b2": nrm(ks[3], (32,), 0.1),
        "w3": nrm(ks[4], (L2, 32, 1, 1), 0.18),
        "b3": nrm(ks[5], (L2,), 0.1),
        "w21": nrm(ks[6], (L, L2 * EO * EO), 0.025),
        "b21": nrm(ks[7], (L,), 0.05),
        "w22": nrm(ks[8], (L, L2 * EO * EO), 0.025),
        "b22": nrm(ks[9], (L,), 0.05),
    }
    for i, (name, c) in enumerate((("bn1", 16), ("bn2", 32), ("bn3", L2))):
        kg, kb, km, kv = jax.random.split(ks[10 + i], 4)
        p[name] = dict(
            gamma=1.0 + 0.1 * jax.random.normal(kg, (c,), jnp.float32),
            beta=0.1 * jax.random.normal(kb, (c,), jnp.float32),
            rm=0.1 * jax.random.normal(km, (c,), jnp.float32),
            rv=jax.random.uniform(kv, (c,), jnp.float32, 0.5, 1.5),
        )
    return p


def ref_forward(x, params, code_len):
    """Plain-JAX (XLA) eval-mode reference, f32 / HIGHEST precision."""
    hp = jax.lax.Precision.HIGHEST

    def conv(z, w, b, s, p):
        y = jax.lax.conv_general_dilated(
            z, w, (s, s), [(p, p), (p, p)],
            dimension_numbers=("NCHW", "OIHW", "NCHW"), precision=hp)
        return y + b[None, :, None, None]

    def bn_relu(z, bn):
        y = (z - bn["rm"][None, :, None, None]) * (
            bn["gamma"][None, :, None, None]
            / jnp.sqrt(bn["rv"][None, :, None, None] + BN_EPS)
        ) + bn["beta"][None, :, None, None]
        return jnp.maximum(y, 0.0)

    o = bn_relu(conv(x, params["w1"], params["b1"], 2, 1), params["bn1"])
    o = bn_relu(conv(o, params["w2"], params["b2"], 2, 1), params["bn2"])
    o = bn_relu(conv(o, params["w3"], params["b3"], 1, 0), params["bn3"])
    ol = o.reshape(o.shape[0], -1)                         # PyTorch (c,h,w) flatten
    mu = jnp.dot(ol, params["w21"].T, precision=hp) + params["b21"]
    lv = jnp.dot(ol, params["w22"].T, precision=hp) + params["b22"]
    return mu, mu, lv


# ----------------------------------- main ------------------------------------- #

if __name__ == "__main__":
    code_len = 8
    B = 16          # 2 grid steps of NB=8 images -> both v7x TensorCores get work
    key = jax.random.PRNGKey(0)
    kx, kp = jax.random.split(key)
    x = jax.random.normal(kx, (B, 1, H_IN, W_IN), jnp.float32)  # NCHW, eo=10 => 40x40
    params = init_params(kp, code_len)
    prep = prepare_params(params, code_len)   # folded / block-expanded weights, once

    c, mu, logvar = conv_vae_forward(x, prep, code_len)
    jax.block_until_ready((c, mu, logvar))

    assert c.shape == (B, code_len)
    assert mu.shape == (B, code_len)
    assert logvar.shape == (B, code_len)

    # Correctness vs an f32 HIGHEST-precision XLA reference; kernel uses bf16
    # inputs/activations with f32 accumulation, hence the few-% tolerance.
    c_r, mu_r, lv_r = ref_forward(x, params, code_len)
    np.testing.assert_allclose(np.asarray(mu), np.asarray(mu_r), rtol=4e-2, atol=2e-2)
    np.testing.assert_allclose(np.asarray(logvar), np.asarray(lv_r), rtol=4e-2, atol=2e-2)
    np.testing.assert_allclose(np.asarray(c), np.asarray(c_r), rtol=4e-2, atol=2e-2)

    print("KERNEL_OK")
</pallas_src>

<mosaic_0001>
module attributes {stable_mosaic.version = 11 : i64} {
  func.func @_convvae_kernel(%arg0: i32, %arg1: memref<160x160xbf16, #tpu.memory_space<vmem>>, %arg2: memref<160x384xbf16, #tpu.memory_space<vmem>>, %arg3: memref<1x384xf32, #tpu.memory_space<vmem>>, %arg4: memref<2x768x384xbf16, #tpu.memory_space<vmem>>, %arg5: memref<1x384xf32, #tpu.memory_space<vmem>>, %arg6: memref<384x160xbf16, #tpu.memory_space<vmem>>, %arg7: memref<1x160xf32, #tpu.memory_space<vmem>>, %arg8: memref<10x160x16xbf16, #tpu.memory_space<vmem>>, %arg9: memref<1x16xf32, #tpu.memory_space<vmem>>, %arg10: memref<8x16xf32, #tpu.memory_space<vmem>>, %arg11: memref<88x768xbf16, #tpu.memory_space<vmem>>, %arg12: memref<80x160xbf16, #tpu.memory_space<vmem>>) attributes {dimension_semantics = [#tpu.dimension_semantics<parallel>], iteration_bounds = array<i64: 2>, scalar_prefetch = 0 : i64, scratch_operands = 2 : i64, tpu.core_type = #tpu.core_type<tc>, window_params = [{transform_indices = @transform_0, window_bounds = array<i64: 160, 160>}, {pipeline_mode = #tpu.pipeline_mode<synchronous>, transform_indices = @transform_1, window_bounds = array<i64: 160, 384>}, {pipeline_mode = #tpu.pipeline_mode<synchronous>, transform_indices = @transform_2, window_bounds = array<i64: 1, 384>}, {pipeline_mode = #tpu.pipeline_mode<synchronous>, transform_indices = @transform_3, window_bounds = array<i64: 2, 768, 384>}, {pipeline_mode = #tpu.pipeline_mode<synchronous>, transform_indices = @transform_4, window_bounds = array<i64: 1, 384>}, {pipeline_mode = #tpu.pipeline_mode<synchronous>, transform_indices = @transform_5, window_bounds = array<i64: 384, 160>}, {pipeline_mode = #tpu.pipeline_mode<synchronous>, transform_indices = @transform_6, window_bounds = array<i64: 1, 160>}, {pipeline_mode = #tpu.pipeline_mode<synchronous>, transform_indices = @transform_7, window_bounds = array<i64: 10, 160, 16>}, {pipeline_mode = #tpu.pipeline_mode<synchronous>, transform_indices = @transform_8, window_bounds = array<i64: 1, 16>}, {transform_indices = @transform_9, window_bounds = array<i64: 8, 16>}]} {
    %c0 = arith.constant 0 : index
    %c0_0 = arith.constant 0 : index
    %0 = vector.load %arg1[%c0, %c0_0] : memref<160x160xbf16, #tpu.memory_space<vmem>>, vector<160x160xbf16>
    %c0_1 = arith.constant 0 : index
    %c0_2 = arith.constant 0 : index
    %1 = vector.load %arg2[%c0_1, %c0_2] : memref<160x384xbf16, #tpu.memory_space<vmem>>, vector<160x384xbf16>
    %cst = arith.constant dense<0.000000e+00> : vector<160x384xf32>
    %2 = tpu.matmul %0, %1, %cst {dimension_numbers = #tpu.dot_dimension_numbers<[1], [0], [0], [1], [0, 0, 1, 1], [], []>} : vector<160x160xbf16>, vector<160x384xbf16>, vector<160x384xf32> -> vector<160x384xf32>
    %c0_3 = arith.constant 0 : index
    %c0_4 = arith.constant 0 : index
    %3 = vector.load %arg3[%c0_3, %c0_4] : memref<1x384xf32, #tpu.memory_space<vmem>>, vector<1x384xf32>
    %4 = vector.broadcast %3 : vector<1x384xf32> to vector<160x384xf32>
    %5 = arith.addf %2, %4 : vector<160x384xf32>
    %cst_5 = arith.constant 0.000000e+00 : f32
    %6 = vector.broadcast %cst_5 : f32 to vector<160x384xf32>
    %7 = arith.maximumf %5, %6 : vector<160x384xf32>
    %8 = arith.truncf %7 : vector<160x384xf32> to vector<160x384xbf16>
    %cst_6 = arith.constant 0.000000e+00 : bf16
    %9 = vector.broadcast %cst_6 : bf16 to vector<8x384xbf16>
    %10 = vector.extract_strided_slice %8 {offsets = [0, 0], sizes = [80, 384], strides = [1, 1]} : vector<160x384xbf16> to vector<80x384xbf16>
    %c0_7 = arith.constant 0 : index
    %c0_8 = arith.constant 0 : index
    %11 = vector.load %arg11[%c0_7, %c0_8] : memref<88x768xbf16, #tpu.memory_space<vmem>>, vector<80x384xbf16>
    tpu.vector_store %arg11[%c0_7, %c0_8], %10 {strides = array<i32>} : memref<88x768xbf16, #tpu.memory_space<vmem>>, vector<80x384xbf16>,
    %c80 = arith.constant 80 : index
    %c0_9 = arith.constant 0 : index
    %12 = vector.load %arg11[%c80, %c0_9] : memref<88x768xbf16, #tpu.memory_space<vmem>>, vector<8x384xbf16>
    tpu.vector_store %arg11[%c80, %c0_9], %9 {strides = array<i32>} : memref<88x768xbf16, #tpu.memory_space<vmem>>, vector<8x384xbf16>,
    %13 = vector.extract_strided_slice %8 {offsets = [80, 0], sizes = [80, 384], strides = [1, 1]} : vector<160x384xbf16> to vector<80x384xbf16>
    %c8 = arith.constant 8 : index
    %c384 = arith.constant 384 : index
    %14 = vector.load %arg11[%c8, %c384] : memref<88x768xbf16, #tpu.memory_space<vmem>>, vector<80x384xbf16>
    tpu.vector_store %arg11[%c8, %c384], %13 {strides = array<i32>} : memref<88x768xbf16, #tpu.memory_space<vmem>>, vector<80x384xbf16>,
    %c0_10 = arith.constant 0 : index
    %c384_11 = arith.constant 384 : index
    %15 = vector.load %arg11[%c0_10, %c384_11] : memref<88x768xbf16, #tpu.memory_space<vmem>>, vector<8x384xbf16>
    tpu.vector_store %arg11[%c0_10, %c384_11], %9 {strides = array<i32>} : memref<88x768xbf16, #tpu.memory_space<vmem>>, vector<8x384xbf16>,
    %c0_12 = arith.constant 0 : index
    %c0_13 = arith.constant 0 : index
    %16 = vector.load %arg11[%c0_12, %c0_13] : memref<88x768xbf16, #tpu.memory_space<vmem>>, vector<80x768xbf16>
    %c0_14 = arith.constant 0 : index
    %c0_15 = arith.constant 0 : index
    %c0_16 = arith.constant 0 : index
    %17 = vector.load %arg4[%c0_14, %c0_15, %c0_16] : memref<2x768x384xbf16, #tpu.memory_space<vmem>>, vector<1x768x384xbf16>
    %18 = vector.shape_cast %17 : vector<1x768x384xbf16> to vector<768x384xbf16>
    %cst_17 = arith.constant dense<0.000000e+00> : vector<80x384xf32>
    %19 = tpu.matmul %16, %18, %cst_17 {dimension_numbers = #tpu.dot_dimension_numbers<[1], [0], [0], [1], [0, 0, 1, 1], [], []>} : vector<80x768xbf16>, vector<768x384xbf16>, vector<80x384xf32> -> vector<80x384xf32>
    %c8_18 = arith.constant 8 : index
    %c0_19 = arith.constant 0 : index
    %20 = vector.load %arg11[%c8_18, %c0_19] : memref<88x768xbf16, #tpu.memory_space<vmem>>, vector<80x768xbf16>
    %c1 = arith.constant 1 : index
    %c0_20 = arith.constant 0 : index
    %c0_21 = arith.constant 0 : index
    %21 = vector.load %arg4[%c1, %c0_20, %c0_21] : memref<2x768x384xbf16, #tpu.memory_space<vmem>>, vector<1x768x384xbf16>
    %22 = vector.shape_cast %21 : vector<1x768x384xbf16> to vector<768x384xbf16>
    %cst_22 = arith.constant dense<0.000000e+00> : vector<80x384xf32>
    %23 = tpu.matmul %20, %22, %cst_22 {dimension_numbers = #tpu.dot_dimension_numbers<[1], [0], [0], [1], [0, 0, 1, 1], [], []>} : vector<80x768xbf16>, vector<768x384xbf16>, vector<80x384xf32> -> vector<80x384xf32>
    %24 = arith.addf %19, %23 : vector<80x384xf32>
    %c0_23 = arith.constant 0 : index
    %c0_24 = arith.constant 0 : index
    %25 = vector.load %arg5[%c0_23, %c0_24] : memref<1x384xf32, #tpu.memory_space<vmem>>, vector<1x384xf32>
    %26 = vector.broadcast %25 : vector<1x384xf32> to vector<80x384xf32>
    %27 = arith.addf %24, %26 : vector<80x384xf32>
    %cst_25 = arith.constant 0.000000e+00 : f32
    %28 = vector.broadcast %cst_25 : f32 to vector<80x384xf32>
    %29 = arith.maximumf %27, %28 : vector<80x384xf32>
    %30 = arith.truncf %29 : vector<80x384xf32> to vector<80x384xbf16>
    %c0_26 = arith.constant 0 : index
    %c0_27 = arith.constant 0 : index
    %31 = vector.load %arg6[%c0_26, %c0_27] : memref<384x160xbf16, #tpu.memory_space<vmem>>, vector<384x160xbf16>
    %cst_28 = arith.constant dense<0.000000e+00> : vector<80x160xf32>
    %32 = tpu.matmul %30, %31, %cst_28 {dimension_numbers = #tpu.dot_dimension_numbers<[1], [0], [0], [1], [0, 0, 1, 1], [], []>} : vector<80x384xbf16>, vector<384x160xbf16>, vector<80x160xf32> -> vector<80x160xf32>
    %c0_29 = arith.constant 0 : index
    %c0_30 = arith.constant 0 : index
    %33 = vector.load %arg7[%c0_29, %c0_30] : memref<1x160xf32, #tpu.memory_space<vmem>>, vector<1x160xf32>
    %34 = vector.broadcast %33 : vector<1x160xf32> to vector<80x160xf32>
    %35 = arith.addf %32, %34 : vector<80x160xf32>
    %cst_31 = arith.constant 0.000000e+00 : f32
    %36 = vector.broadcast %cst_31 : f32 to vector<80x160xf32>
    %37 = arith.maximumf %35, %36 : vector<80x160xf32>
    %38 = arith.truncf %37 : vector<80x160xf32> to vector<80x160xbf16>
    %c0_32 = arith.constant 0 : index
    %c0_33 = arith.constant 0 : index
    %39 = vector.load %arg12[%c0_32, %c0_33] : memref<80x160xbf16, #tpu.memory_space<vmem>>, vector<80x160xbf16>
    tpu.vector_store %arg12[%c0_32, %c0_33], %38 {strides = array<i32>} : memref<80x160xbf16, #tpu.memory_space<vmem>>, vector<80x160xbf16>,
    %c0_34 = arith.constant 0 : index
    %c0_35 = arith.constant 0 : index
    %40 = vector.load %arg12[%c0_34, %c0_35] : memref<80x160xbf16, #tpu.memory_space<vmem>>, vector<8x160xbf16>
    %c0_36 = arith.constant 0 : index
    %c0_37 = arith.constant 0 : index
    %c0_38 = arith.constant 0 : index
    %41 = vector.load %arg8[%c0_36, %c0_37, %c0_38] : memref<10x160x16xbf16, #tpu.memory_space<vmem>>, vector<1x160x16xbf16>
    %42 = vector.shape_cast %41 : vector<1x160x16xbf16> to vector<160x16xbf16>
    %cst_39 = arith.constant dense<0.000000e+00> : vector<8x16xf32>
    %43 = tpu.matmul %40, %42, %cst_39 {dimension_numbers = #tpu.dot_dimension_numbers<[1], [0], [0], [1], [0, 0, 1, 1], [], []>} : vector<8x160xbf16>, vector<160x16xbf16>, vector<8x16xf32> -> vector<8x16xf32>
    %c8_40 = arith.constant 8 : index
    %c0_41 = arith.constant 0 : index
    %44 = vector.load %arg12[%c8_40, %c0_41] : memref<80x160xbf16, #tpu.memory_space<vmem>>, vector<8x160xbf16>
    %c1_42 = arith.constant 1 : index
    %c0_43 = arith.constant 0 : index
    %c0_44 = arith.constant 0 : index
    %45 = vector.load %arg8[%c1_42, %c0_43, %c0_44] : memref<10x160x16xbf16, #tpu.memory_space<vmem>>, vector<1x160x16xbf16>
    %46 = vector.shape_cast %45 : vector<1x160x16xbf16> to vector<160x16xbf16>
    %cst_45 = arith.constant dense<0.000000e+00> : vector<8x16xf32>
    %47 = tpu.matmul %44, %46, %cst_45 {dimension_numbers = #tpu.dot_dimension_numbers<[1], [0], [0], [1], [0, 0, 1, 1], [], []>} : vector<8x160xbf16>, vector<160x16xbf16>, vector<8x16xf32> -> vector<8x16xf32>
    %c16 = arith.constant 16 : index
    %c0_46 = arith.constant 0 : index
    %48 = vector.load %arg12[%c16, %c0_46] : memref<80x160xbf16, #tpu.memory_space<vmem>>, vector<8x160xbf16>
    %c2 = arith.constant 2 : index
    %c0_47 = arith.constant 0 : index
    %c0_48 = arith.constant 0 : index
    %49 = vector.load %arg8[%c2, %c0_47, %c0_48] : memref<10x160x16xbf16, #tpu.memory_space<vmem>>, vector<1x160x16xbf16>
    %50 = vector.shape_cast %49 : vector<1x160x16xbf16> to vector<160x16xbf16>
    %cst_49 = arith.constant dense<0.000000e+00> : vector<8x16xf32>
    %51 = tpu.matmul %48, %50, %cst_49 {dimension_numbers = #tpu.dot_dimension_numbers<[1], [0], [0], [1], [0, 0, 1, 1], [], []>} : vector<8x160xbf16>, vector<160x16xbf16>, vector<8x16xf32> -> vector<8x16xf32>
    %c24 = arith.constant 24 : index
    %c0_50 = arith.constant 0 : index
    %52 = vector.load %arg12[%c24, %c0_50] : memref<80x160xbf16, #tpu.memory_space<vmem>>, vector<8x160xbf16>
    %c3 = arith.constant 3 : index
    %c0_51 = arith.constant 0 : index
    %c0_52 = arith.constant 0 : index
    %53 = vector.load %arg8[%c3, %c0_51, %c0_52] : memref<10x160x16xbf16, #tpu.memory_space<vmem>>, vector<1x160x16xbf16>
    %54 = vector.shape_cast %53 : vector<1x160x16xbf16> to vector<160x16xbf16>
    %cst_53 = arith.constant dense<0.000000e+00> : vector<8x16xf32>
    %55 = tpu.matmul %52, %54, %cst_53 {dimension_numbers = #tpu.dot_dimension_numbers<[1], [0], [0], [1], [0, 0, 1, 1], [], []>} : vector<8x160xbf16>, vector<160x16xbf16>, vector<8x16xf32> -> vector<8x16xf32>
    %c32 = arith.constant 32 : index
    %c0_54 = arith.constant 0 : index
    %56 = vector.load %arg12[%c32, %c0_54] : memref<80x160xbf16, #tpu.memory_space<vmem>>, vector<8x160xbf16>
    %c4 = arith.constant 4 : index
    %c0_55 = arith.constant 0 : index
    %c0_56 = arith.constant 0 : index
    %57 = vector.load %arg8[%c4, %c0_55, %c0_56] : memref<10x160x16xbf16, #tpu.memory_space<vmem>>, vector<1x160x16xbf16>
    %58 = vector.shape_cast %57 : vector<1x160x16xbf16> to vector<160x16xbf16>
    %cst_57 = arith.constant dense<0.000000e+00> : vector<8x16xf32>
    %59 = tpu.matmul %56, %58, %cst_57 {dimension_numbers = #tpu.dot_dimension_numbers<[1], [0], [0], [1], [0, 0, 1, 1], [], []>} : vector<8x160xbf16>, vector<160x16xbf16>, vector<8x16xf32> -> vector<8x16xf32>
    %c40 = arith.constant 40 : index
    %c0_58 = arith.constant 0 : index
    %60 = vector.load %arg12[%c40, %c0_58] : memref<80x160xbf16, #tpu.memory_space<vmem>>, vector<8x160xbf16>
    %c5 = arith.constant 5 : index
    %c0_59 = arith.constant 0 : index
    %c0_60 = arith.constant 0 : index
    %61 = vector.load %arg8[%c5, %c0_59, %c0_60] : memref<10x160x16xbf16, #tpu.memory_space<vmem>>, vector<1x160x16xbf16>
    %62 = vector.shape_cast %61 : vector<1x160x16xbf16> to vector<160x16xbf16>
    %cst_61 = arith.constant dense<0.000000e+00> : vector<8x16xf32>
    %63 = tpu.matmul %60, %62, %cst_61 {dimension_numbers = #tpu.dot_dimension_numbers<[1], [0], [0], [1], [0, 0, 1, 1], [], []>} : vector<8x160xbf16>, vector<160x16xbf16>, vector<8x16xf32> -> vector<8x16xf32>
    %c48 = arith.constant 48 : index
    %c0_62 = arith.constant 0 : index
    %64 = vector.load %arg12[%c48, %c0_62] : memref<80x160xbf16, #tpu.memory_space<vmem>>, vector<8x160xbf16>
    %c6 = arith.constant 6 : index
    %c0_63 = arith.constant 0 : index
    %c0_64 = arith.constant 0 : index
    %65 = vector.load %arg8[%c6, %c0_63, %c0_64] : memref<10x160x16xbf16, #tpu.memory_space<vmem>>, vector<1x160x16xbf16>
    %66 = vector.shape_cast %65 : vector<1x160x16xbf16> to vector<160x16xbf16>
    %cst_65 = arith.constant dense<0.000000e+00> : vector<8x16xf32>
    %67 = tpu.matmul %64, %66, %cst_65 {dimension_numbers = #tpu.dot_dimension_numbers<[1], [0], [0], [1], [0, 0, 1, 1], [], []>} : vector<8x160xbf16>, vector<160x16xbf16>, vector<8x16xf32> -> vector<8x16xf32>
    %c56 = arith.constant 56 : index
    %c0_66 = arith.constant 0 : index
    %68 = vector.load %arg12[%c56, %c0_66] : memref<80x160xbf16, #tpu.memory_space<vmem>>, vector<8x160xbf16>
    %c7 = arith.constant 7 : index
    %c0_67 = arith.constant 0 : index
    %c0_68 = arith.constant 0 : index
    %69 = vector.load %arg8[%c7, %c0_67, %c0_68] : memref<10x160x16xbf16, #tpu.memory_space<vmem>>, vector<1x160x16xbf16>
    %70 = vector.shape_cast %69 : vector<1x160x16xbf16> to vector<160x16xbf16>
    %cst_69 = arith.constant dense<0.000000e+00> : vector<8x16xf32>
    %71 = tpu.matmul %68, %70, %cst_69 {dimension_numbers = #tpu.dot_dimension_numbers<[1], [0], [0], [1], [0, 0, 1, 1], [], []>} : vector<8x160xbf16>, vector<160x16xbf16>, vector<8x16xf32> -> vector<8x16xf32>
    %c64 = arith.constant 64 : index
    %c0_70 = arith.constant 0 : index
    %72 = vector.load %arg12[%c64, %c0_70] : memref<80x160xbf16, #tpu.memory_space<vmem>>, vector<8x160xbf16>
    %c8_71 = arith.constant 8 : index
    %c0_72 = arith.constant 0 : index
    %c0_73 = arith.constant 0 : index
    %73 = vector.load %arg8[%c8_71, %c0_72, %c0_73] : memref<10x160x16xbf16, #tpu.memory_space<vmem>>, vector<1x160x16xbf16>
    %74 = vector.shape_cast %73 : vector<1x160x16xbf16> to vector<160x16xbf16>
    %cst_74 = arith.constant dense<0.000000e+00> : vector<8x16xf32>
    %75 = tpu.matmul %72, %74, %cst_74 {dimension_numbers = #tpu.dot_dimension_numbers<[1], [0], [0], [1], [0, 0, 1, 1], [], []>} : vector<8x160xbf16>, vector<160x16xbf16>, vector<8x16xf32> -> vector<8x16xf32>
    %c72 = arith.constant 72 : index
    %c0_75 = arith.constant 0 : index
    %76 = vector.load %arg12[%c72, %c0_75] : memref<80x160xbf16, #tpu.memory_space<vmem>>, vector<8x160xbf16>
    %c9 = arith.constant 9 : index
    %c0_76 = arith.constant 0 : index
    %c0_77 = arith.constant 0 : index
    %77 = vector.load %arg8[%c9, %c0_76, %c0_77] : memref<10x160x16xbf16, #tpu.memory_space<vmem>>, vector<1x160x16xbf16>
    %78 = vector.shape_cast %77 : vector<1x160x16xbf16> to vector<160x16xbf16>
    %cst_78 = arith.constant dense<0.000000e+00> : vector<8x16xf32>
    %79 = tpu.matmul %76, %78, %cst_78 {dimension_numbers = #tpu.dot_dimension_numbers<[1], [0], [0], [1], [0, 0, 1, 1], [], []>} : vector<8x160xbf16>, vector<160x16xbf16>, vector<8x16xf32> -> vector<8x16xf32>
    %80 = arith.addf %43, %47 : vector<8x16xf32>
    %81 = arith.addf %51, %55 : vector<8x16xf32>
    %82 = arith.addf %59, %63 : vector<8x16xf32>
    %83 = arith.addf %67, %71 : vector<8x16xf32>
    %84 = arith.addf %75, %79 : vector<8x16xf32>
    %85 = arith.addf %80, %81 : vector<8x16xf32>
    %86 = arith.addf %82, %83 : vector<8x16xf32>
    %87 = arith.addf %85, %86 : vector<8x16xf32>
    %88 = arith.addf %87, %84 : vector<8x16xf32>
    %c0_79 = arith.constant 0 : index
    %c0_80 = arith.constant 0 : index
    %89 = vector.load %arg9[%c0_79, %c0_80] : memref<1x16xf32, #tpu.memory_space<vmem>>, vector<1x16xf32>
    %90 = vector.broadcast %89 : vector<1x16xf32> to vector<8x16xf32>
    %91 = arith.addf %88, %90 : vector<8x16xf32>
    %c0_81 = arith.constant 0 : index
    %c0_82 = arith.constant 0 : index
    %92 = vector.load %arg10[%c0_81, %c0_82] : memref<8x16xf32, #tpu.memory_space<vmem>>, vector<8x16xf32>
    tpu.vector_store %arg10[%c0_81, %c0_82], %91 {strides = array<i32>} : memref<8x16xf32, #tpu.memory_space<vmem>>, vector<8x16xf32>,
    return
  }
  func.func @transform_0(%arg0: i32) -> (i32, i32) {
    %c0_i32 = arith.constant 0 : i32
    %c0_i32_0 = arith.constant 0 : i32
    return %arg0, %c0_i32 : i32, i32
  }
  func.func @transform_1(%arg0: i32) -> (i32, i32) {
    %c0_i32 = arith.constant 0 : i32
    %c0_i32_0 = arith.constant 0 : i32
    %c0_i32_1 = arith.constant 0 : i32
    return %c0_i32, %c0_i32_0 : i32, i32
  }
  func.func @transform_2(%arg0: i32) -> (i32, i32) {
    %c0_i32 = arith.constant 0 : i32
    %c0_i32_0 = arith.constant 0 : i32
    %c0_i32_1 = arith.constant 0 : i32
    return %c0_i32, %c0_i32_0 : i32, i32
  }
  func.func @transform_3(%arg0: i32) -> (i32, i32, i32) {
    %c0_i32 = arith.constant 0 : i32
    %c0_i32_0 = arith.constant 0 : i32
    %c0_i32_1 = arith.constant 0 : i32
    %c0_i32_2 = arith.constant 0 : i32
    return %c0_i32, %c0_i32_0, %c0_i32_1 : i32, i32, i32
  }
  func.func @transform_4(%arg0: i32) -> (i32, i32) {
    %c0_i32 = arith.constant 0 : i32
    %c0_i32_0 = arith.constant 0 : i32
    %c0_i32_1 = arith.constant 0 : i32
    return %c0_i32, %c0_i32_0 : i32, i32
  }
  func.func @transform_5(%arg0: i32) -> (i32, i32) {
    %c0_i32 = arith.constant 0 : i32
    %c0_i32_0 = arith.constant 0 : i32
    %c0_i32_1 = arith.constant 0 : i32
    return %c0_i32, %c0_i32_0 : i32, i32
  }
  func.func @transform_6(%arg0: i32) -> (i32, i32) {
    %c0_i32 = arith.constant 0 : i32
    %c0_i32_0 = arith.constant 0 : i32
    %c0_i32_1 = arith.constant 0 : i32
    return %c0_i32, %c0_i32_0 : i32, i32
  }
  func.func @transform_7(%arg0: i32) -> (i32, i32, i32) {
    %c0_i32 = arith.constant 0 : i32
    %c0_i32_0 = arith.constant 0 : i32
    %c0_i32_1 = arith.constant 0 : i32
    %c0_i32_2 = arith.constant 0 : i32
    return %c0_i32, %c0_i32_0, %c0_i32_1 : i32, i32, i32
  }
  func.func @transform_8(%arg0: i32) -> (i32, i32) {
    %c0_i32 = arith.constant 0 : i32
    %c0_i32_0 = arith.constant 0 : i32
    %c0_i32_1 = arith.constant 0 : i32
    return %c0_i32, %c0_i32_0 : i32, i32
  }
  func.func @transform_9(%arg0: i32) -> (i32, i32) {
    %c0_i32 = arith.constant 0 : i32
    %c0_i32_0 = arith.constant 0 : i32
    return %arg0, %c0_i32 : i32, i32
  }
}

</mosaic_0001>

<bundles_post_ra>
// kernel: conv_vae_forward.1
= control target key start
LH: loop header
LB: loop body
LE: loop exit
PB: predicated region body
PF: predicated region fallthrough
CT: control target
= control target key end

     0   :  { %s8633_s30 = smov 0   ;;  %s10799_s0 = inlined_call_operand.vmem [shape: bf16[320,160], index: 0, kind: input, shape index: {}]   ;;  %s10800_s1 = inlined_call_operand.vmem [shape: bf16[160,384], index: 1, kind: input, shape index: {}]   ;;  %s10801_s2 = inlined_call_operand.vmem [shape: f32[1,384], index: 2, kind: input, shape index: {}]   ;;  %s10802_s3 = inlined_call_operand.vmem [shape: bf16[2,768,384], index: 3, kind: input, shape index: {}]   ;;  %s10803_s4 = inlined_call_operand.vmem [shape: f32[1,384], index: 4, kind: input, shape index: {}]   ;;  %s10804_s5 = inlined_call_operand.vmem [shape: bf16[384,160], index: 5, kind: input, shape index: {}]   ;;  %s10805_s6 = inlined_call_operand.vmem [shape: f32[1,160], index: 6, kind: input, shape index: {}]   ;;  %s10806_s7 = inlined_call_operand.vmem [shape: bf16[10,160,16], index: 7, kind: input, shape index: {}]   ;;  %s10807_s8 = inlined_call_operand.vmem [shape: f32[1,16], index: 8, kind: input, shape index: {}]   ;;  %s10808_s9 = inlined_call_operand.vmem [shape: f32[16,16], index: 9, kind: output, shape index: {}]  }
   0x1 LB: > { %s8639_s10 = sadd.s32 4294967295, %s8580_s30   ;;  %p6415_p0 = scmp.ge.s32.totalorder %s8580_s30, 1  ;;  %s8580_s30 = sphi %s8633_s30, %s19_s30  }
   0x2   : > { %p289_p1 = scmp.lt.s32.totalorder %s8580_s30, 3 }
   0x4   : > { %p290_p2 = pnand %p6415_p0, %p289_p1 }
   0x5   : > { %v7876_v0 = vld [vmem:[%s10800_s1 + $0x4] ss:$12 sps:$4 sm:$0xff] (!%p290_p2)   ;;  %s325_s13 = smul.u32 (!%p290_p2), 20, %s8639_s10  ;;  %v7878_v1 = vld [vmem:[%s10800_s1] ss:$12 sps:$4 sm:$0xff] (!%p290_p2)   ;;  %v8582_v2 = vmov (!%p290_p2), 0  }
   0x6   : > { %293 = sbr.rel (%p290_p2) target bundleno = 1477 (0x5c5), region = 56  ;;  %828 = vmatprep.subr.bf16.mxu1 (!%p290_p2), %v8582_v2  ;;  %1136 = vst [vmem:[#allocation2 + $0xf0] sm:$0xff] (!%p290_p2), %v8582_v2  ;;  %1137 = vst [vmem:[#allocation2 + $0xf8] sm:$0xf] (!%p290_p2), %v8582_v2  ;;  %695 = vmatprep.subr.bf16.mxu0 (!%p290_p2), %v7876_v0  ;;  %v7879_v3 = vld [vmem:[%s10800_s1 + $0x1c] ss:$12 sps:$4 sm:$0xff] (!%p290_p2)  }
   0x7   : > { %1243 = vst [vmem:[#allocation2 + $0xc] sm:$0xff] (!%p290_p2), %v8582_v2  ;;  %1244 = vst [vmem:[#allocation2 + $0x14] sm:$0xf] (!%p290_p2), %v8582_v2  ;;  %696 = vmatpush1.bf16.msra.mxu0 (!%p290_p2), %v7878_v1  ;;  %v7881_v4 = vld [vmem:[%s10800_s1 + $0x18] ss:$12 sps:$4 sm:$0xff] (!%p290_p2)   ;;  %p326_p3 = scmp.lt.s32.totalorder (!%p290_p2), %s325_s13, 39 }
   0x8   : > { %697 = vmatprep.subr.bf16.mxu0 (!%p290_p2), %v7879_v3  ;;  %v7882_v5 = vld [vmem:[%s10800_s1 + $0x34] ss:$12 sps:$4 sm:$0xff] (!%p290_p2)   ;;  %v7884_v6 = vld [vmem:[%s10800_s1 + $0x30] ss:$12 sps:$4 sm:$0xff] (!%p290_p2)   ;;  %v7885_v7 = vld [vmem:[%s10800_s1 + $0x4c] ss:$12 sps:$4 sm:$0xff] (!%p290_p2)  }
   0x9   : > { %v7894_v8 = vld [vmem:[%s10800_s1 + $0x8] ss:$12 sps:$4 sm:$0xff] (!%p290_p2)   ;;  %v7898_v10 = vld [vmem:[%s10800_s1 + $0x20] ss:$12 sps:$4 sm:$0xff] (!%p290_p2)   ;;  %v7888_v11 = vld [vmem:[%s10800_s1 + $0x64] ss:$12 sps:$4 sm:$0xff] (!%p290_p2)  }
   0xa   : > { %v7887_v9 = vld [vmem:[%s10800_s1 + $0x48] ss:$12 sps:$4 sm:$0xff] (!%p290_p2)   ;;  %829 = vmatpush1.bf16.msra.mxu1 (!%p290_p2), %v7894_v8  ;;  %v7902_v12 = vld [vmem:[%s10800_s1 + $0x38] ss:$12 sps:$4 sm:$0xff] (!%p290_p2)   ;;  %v7890_v13 = vld [vmem:[%s10800_s1 + $0x60] ss:$12 sps:$4 sm:$0xff] (!%p290_p2)  }
   0xb   : > { %698 = vmatpush1.bf16.msra.mxu0 (!%p290_p2), %v7881_v4  ;;  %830 = vmatprep.subr.bf16.mxu1 (!%p290_p2), %v8582_v2  ;;  %v7891_v14 = vld [vmem:[%s10800_s1 + $0x7c] ss:$12 sps:$4 sm:$0xff] (!%p290_p2)   ;;  %vm664_vm0 = vcmask (!%p290_p2), 261120   ;;  %v7893_v17 = vld [vmem:[%s10800_s1 + $0x78] ss:$12 sps:$4 sm:$0xff] (!%p290_p2)   ;;  %p332_p4 = scmp.lt.s32.totalorder (!%p290_p2), %s8639_s10, 1 }
   0xc   : > { %699 = vmatprep.subr.bf16.mxu0 (!%p290_p2), %v7882_v5  ;;  %v7906_v15 = vld [vmem:[%s10800_s1 + $0x50] ss:$12 sps:$4 sm:$0xff] (!%p290_p2)   ;;  %v7895_v18 = vld [vmem:[%s10800_s1 + $0x94] ss:$12 sps:$4 sm:$0xff] (!%p290_p2)   ;;  %v7899_v21 = vld [vmem:[%s10800_s1 + $0xac] ss:$12 sps:$4 sm:$0xff] (!%p290_p2)  }
   0xd   : > { %s10810_s13 = smov (!%p326_p3, %s325_s13), 39  ;;  %v7913_v19 = vld [vmem:[%s10800_s1 + $0x68] ss:$12 sps:$4 sm:$0xff]   ;;  %v7897_v20 = vld [vmem:[%s10800_s1 + $0x90] ss:$12 sps:$4 sm:$0xff]   ;;  %s10812_s10 = smov (!%p332_p4, %s8639_s10), 1 }
   0xe   : > { %s7410_s16 = sshll.u32 %s10810_s13, 3  ;;  %831 = vmatpush1.bf16.msra.mxu1 %v7898_v10  ;;  %v7914_v22 = vld [vmem:[%s10800_s1 + $0x80] ss:$12 sps:$4 sm:$0xff]   ;;  %v7901_v23 = vld [vmem:[%s10800_s1 + $0xa8] ss:$12 sps:$4 sm:$0xff]   ;;  %s6418_s27 = sshll.u32 %s10812_s10, 3 }
   0xf   : > { %700 = vmatpush1.bf16.msra.mxu0 %v7884_v6  ;;  %832 = vmatprep.subr.bf16.mxu1 %v8582_v2  ;;  %s8693_s23 = scalar_lea.vmem %s10799_s0, %s7410_s16  ;;  %v7903_v24 = vld [vmem:[%s10800_s1 + $0xc4] ss:$12 sps:$4 sm:$0xff]   ;;  %v7905_v26 = vld [vmem:[%s10800_s1 + $0xc0] ss:$12 sps:$4 sm:$0xff]   ;;  %v7907_v27 = vld [vmem:[%s10800_s1 + $0xdc] ss:$12 sps:$4 sm:$0xff]   ;;  %s335_s14 = scalar_lea.vmem %s10808_s9, %s6418_s27 }
  0x10   : > { %701 = vmatprep.subr.bf16.mxu0 %v7885_v7  ;;  %v7912_v16 = vld [vmem:[%s8693_s23 + $0x4] ss:$8 sps:$4 sm:$0xff]   ;;  %v7919_v28 = vld [vmem:[%s10800_s1 + $0xb0] ss:$12 sps:$4 sm:$0xff]   ;;  %v7910_v30 = vld [vmem:[%s8693_s23] ss:$8 sps:$4 sm:$0xff]  }
  0x11   : > { %6469 = vmatprep.mubr.msk.bf16.mxu0 %vm664_vm0, %v7912_v16  ;;  %6479 = vmatprep.mubr.msk.bf16.mxu1 %vm664_vm0, %v7912_v16  ;;  %v7917_v25 = vld [vmem:[%s10800_s1 + $0x98] ss:$12 sps:$4 sm:$0xff]   ;;  %v7922_v32 = vld [vmem:[%s10800_s1 + $0xc8] ss:$12 sps:$4 sm:$0xff]   ;;  %v7946_v34 = vld [vmem:[%s10802_s3 + $0x480] ss:$12 sps:$4 sm:$0xff]  }
  0x12   : > { %833 = vmatpush1.bf16.msra.mxu1 %v7902_v12  ;;  %v7909_v29 = vld [vmem:[%s10800_s1 + $0xd8] ss:$12 sps:$4 sm:$0xff]   ;;  %v7915_v33 = vld [vmem:[%s8693_s23 + $0x14] ss:$8 sps:$4 sm:$0xff]   ;;  %v7924_v36 = vld [vmem:[%s10800_s1 + $0xe0] ss:$12 sps:$4 sm:$0xff]  }
  0x13   : > { %702 = vmatpush1.bf16.msra.mxu0 %v7887_v9  ;;  %834 = vmatprep.subr.bf16.mxu1 %v8582_v2  ;;  %v7948_v31 = vld [vmem:[%s10802_s3 + $0x484] ss:$12 sps:$4 sm:$0xff]   ;;  %v7951_v35 = vld [vmem:[%s10802_s3 + $0x49c] ss:$12 sps:$4 sm:$0xff]   ;;  %v7954_v38 = vld [vmem:[%s10802_s3 + $0x4b4] ss:$12 sps:$4 sm:$0xff]  }
  0x14   : > { %703 = vmatprep.subr.bf16.mxu0 %v7888_v11  ;;  %v7949_v37 = vld [vmem:[%s10802_s3 + $0x498] ss:$12 sps:$4 sm:$0xff]   ;;  %v7952_v41 = vld [vmem:[%s10802_s3 + $0x4b0] ss:$12 sps:$4 sm:$0xff]   ;;  %v7976_v43 = vld [vmem:[%s10802_s3 + $0x548] ss:$12 sps:$4 sm:$0xff]  }
  0x15   : > { %v7918_v39 = vld [vmem:[%s8693_s23 + $0x10] ss:$8 sps:$4 sm:$0xff]   ;;  %v7920_v40 = vld [vmem:[%s8693_s23 + $0x24] ss:$8 sps:$4 sm:$0xff]   ;;  %v7955_v44 = vld [vmem:[%s10802_s3 + $0x4c8] ss:$12 sps:$4 sm:$0xff]  }
  0x16   : > { %835 = vmatpush1.bf16.msra.mxu1 %v7906_v15  ;;  %v7957_v42 = vld [vmem:[%s10802_s3 + $0x4cc] ss:$12 sps:$4 sm:$0xff]   ;;  %v7923_v45 = vld [vmem:[%s8693_s23 + $0x20] ss:$8 sps:$4 sm:$0xff]   ;;  %v7960_v46 = vld [vmem:[%s10802_s3 + $0x4e4] ss:$12 sps:$4 sm:$0xff]  }
  0x17   : > { %704 = vmatpush1.bf16.msra.mxu0 %v7890_v13  ;;  %836 = vmatprep.subr.bf16.mxu1 %v8582_v2  ;;  %v7925_v47 = vld [vmem:[%s8693_s23 + $0x34] ss:$8 sps:$4 sm:$0xff]   ;;  %v7958_v49 = vld [vmem:[%s10802_s3 + $0x4e0] ss:$12 sps:$4 sm:$0xff]   ;;  %v7961_v52 = vld [vmem:[%s10802_s3 + $0x4f8] ss:$12 sps:$4 sm:$0xff]  }
  0x18   : > { %705 = vmatprep.subr.bf16.mxu0 %v7891_v14  ;;  %v7980_v48 = vld [vmem:[%s10802_s3 + $0x488] ss:$12 sps:$4 sm:$0xff]   ;;  %v7981_v50 = vld [vmem:[%s10802_s3 + $0x560] ss:$12 sps:$4 sm:$0xff]   ;;  %v7927_v54 = vld [vmem:[%s8693_s23 + $0x30] ss:$8 sps:$4 sm:$0xff]  }
  0x19   : > { %v7963_v51 = vld [vmem:[%s10802_s3 + $0x4fc] ss:$12 sps:$4 sm:$0xff]   ;;  %v7966_v53 = vld [vmem:[%s10802_s3 + $0x514] ss:$12 sps:$4 sm:$0xff]   ;;  %v7928_v55 = vld [vmem:[%s8693_s23 + $0x44] ss:$8 sps:$4 sm:$0xff]  }
  0x1a   : > { %837 = vmatpush1.bf16.msra.mxu1 %v7913_v19  ;;  %v7964_v56 = vld [vmem:[%s10802_s3 + $0x510] ss:$12 sps:$4 sm:$0xff]   ;;  %v7969_v57 = vld [vmem:[%s10802_s3 + $0x52c] ss:$12 sps:$4 sm:$0xff]   ;;  %v7967_v58 = vld [vmem:[%s10802_s3 + $0x528] ss:$12 sps:$4 sm:$0xff]  }
  0x1b   : > { %706 = vmatpush1.bf16.msra.mxu0 %v7893_v17  ;;  %838 = vmatprep.subr.bf16.mxu1 %v8582_v2  ;;  %v7972_v59 = vld [vmem:[%s10802_s3 + $0x544] ss:$12 sps:$4 sm:$0xff]   ;;  %v7930_v60 = vld [vmem:[%s8693_s23 + $0x40] ss:$8 sps:$4 sm:$0xff]   ;;  %v7931_v61 = vld [vmem:[%s8693_s23 + $0x54] ss:$8 sps:$4 sm:$0xff]  }
  0x1c   : > { %707 = vmatprep.subr.bf16.mxu0 %v7895_v18  ;;  %v7970_v62 = vld [vmem:[%s10802_s3 + $0x540] ss:$12 sps:$4 sm:$0xff]   ;;  %v7975_v63 = vld [vmem:[%s10802_s3 + $0x55c] ss:$12 sps:$4 sm:$0xff]   ;;  %v7973_v0 = vld [vmem:[%s10802_s3 + $0x558] ss:$12 sps:$4 sm:$0xff]  }
  0x1d   : > { %v7979_v1 = vld [vmem:[%s10802_s3 + $0x574] ss:$12 sps:$4 sm:$0xff]   ;;  %v7934_v3 = vld [vmem:[%s8693_s23 + $0x64] ss:$8 sps:$4 sm:$0xff]   ;;  %v7977_v4 = vld [vmem:[%s10802_s3 + $0x570] ss:$12 sps:$4 sm:$0xff]  }
  0x1e   : > { %839 = vmatpush1.bf16.msra.mxu1 %v7914_v22  ;;  %v7936_v5 = vld [vmem:[%s8693_s23 + $0x60] ss:$8 sps:$4 sm:$0xff]   ;;  %v7937_v6 = vld [vmem:[%s8693_s23 + $0x74] ss:$8 sps:$4 sm:$0xff]   ;;  %v7939_v7 = vld [vmem:[%s8693_s23 + $0x70] ss:$8 sps:$4 sm:$0xff]  }
  0x1f   : > { %708 = vmatpush1.bf16.msra.mxu0 %v7897_v20  ;;  %840 = vmatprep.subr.bf16.mxu1 %v8582_v2  ;;  %v7940_v8 = vld [vmem:[%s8693_s23 + $0x84] ss:$8 sps:$4 sm:$0xff]   ;;  %v7942_v9 = vld [vmem:[%s8693_s23 + $0x80] ss:$8 sps:$4 sm:$0xff]   ;;  %v7943_v10 = vld [vmem:[%s8693_s23 + $0x94] ss:$8 sps:$4 sm:$0xff]  }
  0x20   : > { %709 = vmatprep.subr.bf16.mxu0 %v7899_v21  ;;  %v7945_v11 = vld [vmem:[%s8693_s23 + $0x90] ss:$8 sps:$4 sm:$0xff]   ;;  %v7982_v12 = vld [vmem:[%s10802_s3 + $0x4a0] ss:$12 sps:$4 sm:$0xff]   ;;  %v7983_v16 = vld [vmem:[%s10802_s3 + $0x588] ss:$12 sps:$4 sm:$0xff]  }
  0x21   : > { %v7986_v13 = vld [vmem:[%s10802_s3 + $0x578] ss:$12 sps:$4 sm:$0xff]   ;;  %v7991_v17 = vld [vmem:[%s10802_s3 + $0x590] ss:$12 sps:$4 sm:$0xff]   ;;  %v7988_v20 = vld [vmem:[%s10802_s3 + $0x5a0] ss:$12 sps:$4 sm:$0xff]  }
  0x22   : > { %841 = vmatpush1.bf16.msra.mxu1 %v7917_v25  ;;  %v7987_v14 = vld [vmem:[%s10802_s3 + $0x4b8] ss:$12 sps:$4 sm:$0xff]   ;;  %v7992_v18 = vld [vmem:[%s10802_s3 + $0x4d0] ss:$12 sps:$4 sm:$0xff]   ;;  %v7996_v21 = vld [vmem:[%s10802_s3 + $0x5a8] ss:$12 sps:$4 sm:$0xff]  }
  0x23   : > { %710 = vmatpush1.bf16.msra.mxu0 %v7901_v23  ;;  %842 = vmatprep.subr.bf16.mxu1 %v8582_v2  ;;  %v7985_v15 = vld [vmem:[%s10802_s3 + $0x58c] ss:$12 sps:$4 sm:$0xff]   ;;  %v7990_v19 = vld [vmem:[%s10802_s3 + $0x5a4] ss:$12 sps:$4 sm:$0xff]   ;;  %v7997_v22 = vld [vmem:[%s10802_s3 + $0x4e8] ss:$12 sps:$4 sm:$0xff]  }
  0x24   : > { %711 = vmatprep.subr.bf16.mxu0 %v7903_v24  ;;  %v7995_v23 = vld [vmem:[%s10802_s3 + $0x5bc] ss:$12 sps:$4 sm:$0xff]   ;;  %v7993_v24 = vld [vmem:[%s10802_s3 + $0x5b8] ss:$12 sps:$4 sm:$0xff]   ;;  %v7998_v25 = vld [vmem:[%s10802_s3 + $0x5c0] ss:$12 sps:$4 sm:$0xff]  }
  0x25   : > { %vm6356_vm1 = vcmask 130048  }
  0x26   : > { %843 = vmatpush1.bf16.msra.mxu1 %v7919_v28  ;;  %v7999_v28 = vld [vmem:[%s10802_s3 + $0x5d0] ss:$12 sps:$4 sm:$0xff]  }
  0x27   : > { %712 = vmatpush1.bf16.msra.mxu0 %v7905_v26  ;;  %844 = vmatprep.subr.bf16.mxu1 %v8582_v2  ;;  %v8002_v26 = vld [vmem:[%s10802_s3 + $0x500] ss:$12 sps:$4 sm:$0xff]  }
  0x28   : > { %713 = vmatprep.subr.bf16.mxu0 %v7907_v27  ;;  %v8001_v27 = vld [vmem:[%s10802_s3 + $0x5d4] ss:$12 sps:$4 sm:$0xff]  }
  0x2a   : > { %845 = vmatpush1.bf16.msra.mxu1 %v7922_v32  ;;  %v8005_v32 = vld [vmem:[%s10802_s3 + $0x5e8] ss:$12 sps:$4 sm:$0xff]  }
  0x2b   : > { %714 = vmatpush1.bf16.msra.mxu0 %v7909_v29  ;;  %846 = vmatprep.subr.bf16.mxu1 %v8582_v2  ;;  %v7933_v2 = vld [vmem:[%s8693_s23 + $0x50] ss:$8 sps:$4 sm:$0xff]  }
  0x2c   : > { %2608 = vmatprep.subr.bf16.mxu0 %v7948_v31  ;;  %v8003_v29 = vld [vmem:[%s10802_s3 + $0x5d8] ss:$12 sps:$4 sm:$0xff]  }
  0x2d   : > { %v8007_v31 = vld [vmem:[%s10802_s3 + $0x5ec] ss:$12 sps:$4 sm:$0xff]  }
  0x2e   : > { %728 = vmatmul.mubr.bf16.vlgmr.msra.gmra.mrb[0].mxu0 %v7910_v30  ;;  %847 = vmatpush1.bf16.msra.mxu1 %v7924_v36  ;;  %v8019_v36 = vld [vmem:[%s10802_s3 + $0x6c8] ss:$12 sps:$4 sm:$0xff]  }
  0x2f   : > { %6470 = vmatprep.mubr.msk.bf16.mxu0 %vm664_vm0, %v7915_v33  ;;  %2609 = vmatpush1.bf16.msra.mxu0 %v7946_v34  ;;  %v8009_v34 = vld [vmem:[%s10802_s3 + $0x530] ss:$12 sps:$4 sm:$0xff]  }
  0x30   : > { %2610 = vmatprep.subr.bf16.mxu0 %v7951_v35  ;;  %7451 = vmatprep.subr.bf16.mxu1 %v7976_v43  ;;  %v8012_v35 = vld [vmem:[%s10802_s3 + $0x604] ss:$12 sps:$4 sm:$0xff]  }
  0x31   : > { %861 = vmatmul.mubr.bf16.vlgmr.msra.gmra.mrb[0].mxu1 %v7910_v30  ;;  %v8004_v30 = vld [vmem:[%s10802_s3 + $0x518] ss:$12 sps:$4 sm:$0xff]  }
  0x32   : > { %6480 = vmatprep.mubr.msk.bf16.mxu1 %vm664_vm0, %v7915_v33  ;;  %7452 = vmatpush3.bf16.msra.mxu1 %v7980_v48  ;;  %v8008_v33 = vld [vmem:[%s10802_s3 + $0x5f0] ss:$12 sps:$4 sm:$0xff]  }
  0x33   : > { %2611 = vmatpush1.bf16.msra.mxu0 %v7949_v37  ;;  %7453 = vmatprep.subr.bf16.mxu1 %v7981_v50  ;;  %v399_v37 = vlaneseq }
  0x34   : > { %2612 = vmatprep.subr.bf16.mxu0 %v7954_v38 }
  0x35   : > { %v8943_v38 = vshrl.u32 %v399_v37, 7 }
  0x36   : > { %738 = vmatmul.mubr.bf16.gmra.mrb[4].mxu0 %v7918_v39  ;;  %7454 = vmatpush3.bf16.msra.mxu1 %v7982_v12 }
  0x37   : > { %6471 = vmatprep.mubr.msk.bf16.mxu0 %vm664_vm0, %v7920_v40  ;;  %2613 = vmatpush1.bf16.msra.mxu0 %v7952_v41  ;;  %v8952_v41 = vsub.s32 1, %v8943_v38 }
  0x38   : > { %2614 = vmatprep.subr.bf16.mxu0 %v7957_v42  ;;  %7455 = vmatprep.subr.bf16.mxu1 %v7986_v13 }
  0x39   : > { %869 = vmatmul.mubr.bf16.gmra.mrb[4].mxu1 %v7918_v39  ;;  %v397_v39 = vld [vmem:[%s10801_s2] sm:$0x7] }
  0x3a   : > { %6481 = vmatprep.mubr.msk.bf16.mxu1 %vm664_vm0, %v7920_v40  ;;  %7456 = vmatpush3.bf16.msra.mxu1 %v7987_v14  ;;  %v8949_v40 = vsub.s32 0, %v8943_v38  ;;  %v8958_v43 = vrot.slane %v397_v39, %v8952_v41 }
  0x3b   : > { %2615 = vmatpush1.bf16.msra.mxu0 %v7955_v44  ;;  %7457 = vmatprep.subr.bf16.mxu1 %v7991_v17 }
  0x3c   : > { %2616 = vmatprep.subr.bf16.mxu0 %v7960_v46  ;;  %v8955_v42 = vrot.slane %v397_v39, %v8949_v40 }
  0x3e   : > { %748 = vmatmul.mubr.bf16.gmra.mrb[8].mxu0 %v7923_v45  ;;  %7458 = vmatpush3.bf16.msra.mxu1 %v7992_v18  ;;  %v8010_v18 = vld [vmem:[%s10802_s3 + $0x600] ss:$12 sps:$4 sm:$0xff]  }
  0x3f   : > { %6472 = vmatprep.mubr.msk.bf16.mxu0 %vm664_vm0, %v7925_v47  ;;  %2617 = vmatpush1.bf16.msra.mxu0 %v7958_v49  ;;  %v409_v49 = vsub.s32 2, %v8943_v38 }
  0x40   : > { %2618 = vmatprep.subr.bf16.mxu0 %v7963_v51  ;;  %7459 = vmatprep.subr.bf16.mxu1 %v7996_v21  ;;  %v8015_v21 = vld [vmem:[%s10802_s3 + $0x61c] ss:$12 sps:$4 sm:$0xff]  }
  0x41   : > { %877 = vmatmul.mubr.bf16.gmra.mrb[8].mxu1 %v7923_v45 }
  0x42   : > { %6482 = vmatprep.mubr.msk.bf16.mxu1 %vm664_vm0, %v7925_v47  ;;  %7460 = vmatpush3.bf16.msra.mxu1 %v7997_v22 }
  0x43   : > { %2619 = vmatpush1.bf16.msra.mxu0 %v7961_v52  ;;  %7461 = vmatprep.subr.bf16.mxu1 %v7998_v25 }
  0x44   : > { %2620 = vmatprep.subr.bf16.mxu0 %v7966_v53 }
  0x46   : > { %758 = vmatmul.mubr.bf16.gmra.mrb[12].mxu0 %v7927_v54  ;;  %7462 = vmatpush3.bf16.msra.mxu1 %v8002_v26 }
  0x47   : > { %6473 = vmatprep.mubr.msk.bf16.mxu0 %vm664_vm0, %v7928_v55  ;;  %2621 = vmatpush1.bf16.msra.mxu0 %v7964_v56 }
  0x48   : > { %2622 = vmatprep.subr.bf16.mxu0 %v7969_v57  ;;  %7463 = vmatprep.subr.bf16.mxu1 %v8003_v29 }
  0x49   : > { %885 = vmatmul.mubr.bf16.gmra.mrb[12].mxu1 %v7927_v54 }
  0x4a   : > { %6483 = vmatprep.mubr.msk.bf16.mxu1 %vm664_vm0, %v7928_v55  ;;  %7464 = vmatpush3.bf16.msra.mxu1 %v8004_v30 }
  0x4b   : > { %2623 = vmatpush1.bf16.msra.mxu0 %v7967_v58  ;;  %7465 = vmatprep.subr.bf16.mxu1 %v8008_v33  ;;  %v8967_v58 = vrot.slane %v397_v39, %v409_v49 }
  0x4c   : > { %2624 = vmatprep.subr.bf16.mxu0 %v7972_v59 }
  0x4e   : > { %768 = vmatmul.mubr.bf16.gmra.mrb[16].mxu0 %v7930_v60  ;;  %7466 = vmatpush3.bf16.msra.mxu1 %v8009_v34 }
  0x4f   : > { %6474 = vmatprep.mubr.msk.bf16.mxu0 %vm664_vm0, %v7931_v61  ;;  %2625 = vmatpush1.bf16.msra.mxu0 %v7970_v62 }
  0x50   : > { %2626 = vmatprep.subr.bf16.mxu0 %v7975_v63  ;;  %7497 = vmatprep.subr.bf16.mxu1 %v8019_v36 }
  0x51   : > { %893 = vmatmul.mubr.bf16.gmra.mrb[16].mxu1 %v7930_v60 }
  0x52   : > { %6484 = vmatprep.mubr.msk.bf16.mxu1 %vm664_vm0, %v7931_v61 }
  0x53   : > { %2627 = vmatpush1.bf16.msra.mxu0 %v7973_v0 }
  0x54   : > { %2628 = vmatprep.subr.bf16.mxu0 %v7979_v1 }
  0x56   : > { %778 = vmatmul.mubr.bf16.gmra.mrb[20].mxu0 %v7933_v2 }
  0x57   : > { %6475 = vmatprep.mubr.msk.bf16.mxu0 %vm664_vm0, %v7934_v3  ;;  %2629 = vmatpush1.bf16.msra.mxu0 %v7977_v4 }
  0x58   : > { %2630 = vmatprep.subr.bf16.mxu0 %v7985_v15 }
  0x59   : > { %901 = vmatmul.mubr.bf16.gmra.mrb[20].mxu1 %v7933_v2 }
  0x5a   : > { %6485 = vmatprep.mubr.msk.bf16.mxu1 %vm664_vm0, %v7934_v3 }
  0x5b   : > { %2631 = vmatpush1.bf16.msra.mxu0 %v7983_v16 }
  0x5c   : > { %2632 = vmatprep.subr.bf16.mxu0 %v7990_v19  ;;  %v8020_v19 = vld [vmem:[%s10802_s3 + $0x608] ss:$12 sps:$4 sm:$0xff]  }
  0x5e   : > { %788 = vmatmul.mubr.bf16.gmra.mrb[24].mxu0 %v7936_v5 }
  0x5f   : > { %6476 = vmatprep.mubr.msk.bf16.mxu0 %vm664_vm0, %v7937_v6  ;;  %2633 = vmatpush1.bf16.msra.mxu0 %v7988_v20 }
  0x60   : > { %2634 = vmatprep.subr.bf16.mxu0 %v7995_v23 }
  0x61   : > { %909 = vmatmul.mubr.bf16.gmra.mrb[24].mxu1 %v7936_v5 }
  0x62   : > { %6486 = vmatprep.mubr.msk.bf16.mxu1 %vm664_vm0, %v7937_v6 }
  0x63   : > { %2635 = vmatpush1.bf16.msra.mxu0 %v7993_v24 }
  0x64   : > { %2636 = vmatprep.subr.bf16.mxu0 %v8001_v27 }
  0x66   : > { %798 = vmatmul.mubr.bf16.gmra.mrb[28].mxu0 %v7939_v7 }
  0x67   : > { %6477 = vmatprep.mubr.msk.bf16.mxu0 %vm664_vm0, %v7940_v8  ;;  %2637 = vmatpush1.bf16.msra.mxu0 %v7999_v28 }
  0x68   : > { %2638 = vmatprep.subr.bf16.mxu0 %v8007_v31  ;;  %v8024_v31 = vld [vmem:[%s10802_s3 + $0x6e0] ss:$12 sps:$4 sm:$0xff]  }
  0x69   : > { %917 = vmatmul.mubr.bf16.gmra.mrb[28].mxu1 %v7939_v7 }
  0x6a   : > { %6487 = vmatprep.mubr.msk.bf16.mxu1 %vm664_vm0, %v7940_v8 }
  0x6b   : > { %2639 = vmatpush1.bf16.msra.mxu0 %v8005_v32 }
  0x6c   : > { %2691 = vmatprep.subr.bf16.mxu0 %v8012_v35  ;;  %v8013_v35 = vld [vmem:[%s10802_s3 + $0x618] ss:$12 sps:$4 sm:$0xff]  }
  0x6e   : > { %808 = vmatmul.mubr.bf16.gmra.mrb[32].mxu0 %v7942_v9 }
  0x6f   : > { %6478 = vmatprep.mubr.msk.bf16.mxu0 %vm664_vm0, %v7943_v10 }
  0x71   : > { %925 = vmatmul.mubr.bf16.gmra.mrb[32].mxu1 %v7942_v9 }
  0x72   : > { %6488 = vmatprep.mubr.msk.bf16.mxu1 %vm664_vm0, %v7943_v10 }
  0x76   : > { %818 = vmatmul.mubr.bf16.gmra.mrb[36].mxu0 %v7945_v11 }
  0x79   : > { %933 = vmatmul.mubr.bf16.gmra.mrb[36].mxu1 %v7945_v11 }
 0x101   : > { %v729_v44 = vpop.f32.mrb[0].mxu0 }
 0x102   : > { %v730_v45 = vadd.f32 %v729_v44, %v8955_v42  ;;  %v731_v46 = vpop.f32.mrb[1].mxu0 }
 0x103   : > { %v732_v47 = vadd.f32 %v731_v46, %v8958_v43  ;;  %v733_v48 = vpop.f32.mrb[2].mxu0 }
 0x104   : > { %v941_v50 = vmax.f32 %v730_v45, 0.0  ;;  %v734_v51 = vadd.f32 %v733_v48, %v8955_v42  ;;  %v735_v52 = vpop.f32.mrb[3].mxu0  ;;  %v862_v59 = vpop.f32.mrb[0].mxu1  ;;  %v8025_v48 = vld [vmem:[%s10802_s3 + $0x620] ss:$12 sps:$4 sm:$0xff]  }
 0x105   : > { %v942_v53 = vmax.f32 %v732_v47, 0.0  ;;  %v736_v54 = vadd.f32 %v735_v52, %v8958_v43  ;;  %v863_v62 = vadd.f32 %v862_v59, %v8967_v58  ;;  %v864_v63 = vpop.f32.mrb[1].mxu1  ;;  %v8018_v47 = vld [vmem:[%s10802_s3 + $0x634] ss:$12 sps:$4 sm:$0xff]   ;;  %v8016_v59 = vld [vmem:[%s10802_s3 + $0x630] ss:$12 sps:$4 sm:$0xff]  }
 0x106   : > { %v944_v55 = vmax.f32 %v734_v51, 0.0  ;;  %v865_v2 = vpop.f32.mrb[2].mxu1 }
 0x107   : > { %v7411_v56 = vpack.c.bf16 %v942_v53, %v941_v50  ;;  %v945_v57 = vmax.f32 %v736_v54, 0.0  ;;  %v943_v5 = vmax.f32 %v863_v62, 0.0  ;;  %v866_v6 = vadd.f32 %v865_v2, %v8967_v58  ;;  %v867_v7 = vpop.f32.mrb[3].mxu1  ;;  %v8030_v62 = vld [vmem:[%s10802_s3 + $0x638] ss:$12 sps:$4 sm:$0xff]  }
 0x108   : > { %v8034_v7 = vld [vmem:[%s10802_s3 + $0x710] ss:$12 sps:$4 sm:$0xff]  }
 0x109   : > { %1116 = vst [vmem:[#allocation2] sm:$0xff] %v7411_v56  ;;  %v7413_v60 = vpack.c.bf16 %v945_v57, %v944_v55  ;;  %v739_v61 = vpop.f32.mrb[4].mxu0  ;;  %v7412_v13 = vpack.c.bf16 %v943_v5, %v943_v5  ;;  %v946_v14 = vmax.f32 %v866_v6, 0.0 }
 0x10a   : > { %v740_v0 = vadd.f32 %v739_v61, %v8955_v42  ;;  %v741_v1 = vpop.f32.mrb[5].mxu0  ;;  %v8023_v61 = vld [vmem:[%s10802_s3 + $0x64c] ss:$12 sps:$4 sm:$0xff]  }
 0x10b   : > { %1118 = vst [vmem:[#allocation2 + $0x18] sm:$0xff] %v7413_v60  ;;  %v742_v3 = vadd.f32 %v741_v1, %v8958_v43  ;;  %v743_v4 = vpop.f32.mrb[6].mxu0  ;;  %1117 = vst [vmem:[#allocation2 + $0x8] sm:$0xf] %v7412_v13  ;;  %v7414_v20 = vpack.c.bf16 %v946_v14, %v946_v14 }
 0x10c   : > { %v947_v8 = vmax.f32 %v740_v0, 0.0  ;;  %v8974_v9 = vadd.f32 %v743_v4, %v8955_v42  ;;  %v745_v10 = vpop.f32.mrb[7].mxu0  ;;  %v870_v22 = vpop.f32.mrb[4].mxu1 }
 0x10d   : > { %v948_v11 = vmax.f32 %v742_v3, 0.0  ;;  %v8977_v12 = vadd.f32 %v745_v10, %v8958_v43  ;;  %1119 = vst [vmem:[#allocation2 + $0x20] sm:$0xf] %v7414_v20  ;;  %v871_v27 = vadd.f32 %v870_v22, %v8967_v58  ;;  %v872_v28 = vpop.f32.mrb[5].mxu1  ;;  %v8035_v22 = vld [vmem:[%s10802_s3 + $0x650] ss:$12 sps:$4 sm:$0xff]  }
 0x10e   : > { %v950_v15 = vmax.f32 %v8974_v9, 0.0  ;;  %v8566_v25 = vpack.c.bf16 %v947_v8, %v944_v55  ;;  %v873_v32 = vpop.f32.mrb[6].mxu1  ;;  %v8029_v55 = vld [vmem:[%s10802_s3 + $0x6f8] ss:$12 sps:$4 sm:$0xff]  }
 0x10f   : > { %v7415_v16 = vpack.c.bf16 %v948_v11, %v947_v8  ;;  %v951_v17 = vmax.f32 %v8977_v12, 0.0  ;;  %v8567_v26 = vpack.c.bf16 %v948_v11, %v945_v57  ;;  %v949_v36 = vmax.f32 %v871_v27, 0.0  ;;  %v875_v39 = vpop.f32.mrb[7].mxu1 }
 0x110   : > { %v874_v37 = vadd.f32 %v873_v32, %v8967_v58  ;;  %v8040_v32 = vld [vmem:[%s10802_s3 + $0x668] ss:$12 sps:$4 sm:$0xff]  }
 0x111   : > { %1120 = vst [vmem:[#allocation2 + $0x30] sm:$0xff] %v7415_v16  ;;  %v7417_v23 = vpack.c.bf16 %v951_v17, %v950_v15  ;;  %v749_v24 = vpop.f32.mrb[8].mxu0  ;;  %2640 = vmatprep.mubr.bf16.mxu0 %v8567_v26  ;;  %2889 = vmatprep.mubr.bf16.mxu1 %v8567_v26  ;;  %v7416_v52 = vpack.c.bf16 %v949_v36, %v949_v36 }
 0x112   : > { %v750_v29 = vadd.f32 %v749_v24, %v8955_v42  ;;  %v751_v30 = vpop.f32.mrb[9].mxu0  ;;  %2641 = vmatmul.mubr.bf16.vlgmr.msra.gmra.mrb[40].mxu0 %v8566_v25  ;;  %2890 = vmatmul.mubr.bf16.vlgmr.msra.gmra.mrb[40].mxu1 %v8566_v25  ;;  %v952_v53 = vmax.f32 %v874_v37, 0.0  ;;  %v8039_v25 = vld [vmem:[%s10802_s3 + $0x728] ss:$12 sps:$4 sm:$0xff]  }
 0x113   : > { %1122 = vst [vmem:[#allocation2 + $0x48] sm:$0xff] %v7417_v23  ;;  %v752_v33 = vadd.f32 %v751_v30, %v8958_v43  ;;  %v753_v34 = vpop.f32.mrb[10].mxu0  ;;  %2692 = vmatpush1.bf16.msra.mxu0 %v8010_v18  ;;  %7498 = vmatpush3.bf16.msra.mxu1 %v8020_v19  ;;  %1121 = vst [vmem:[#allocation2 + $0x38] sm:$0xf] %v7416_v52 }
 0x114   : > { %v953_v44 = vmax.f32 %v750_v29, 0.0  ;;  %v9001_v45 = vadd.f32 %v753_v34, %v8955_v42  ;;  %v755_v46 = vpop.f32.mrb[11].mxu0  ;;  %2693 = vmatprep.subr.bf16.mxu0 %v8015_v21  ;;  %7499 = vmatprep.subr.bf16.mxu1 %v8024_v31  ;;  %v7418_v60 = vpack.c.bf16 %v952_v53, %v952_v53  ;;  %v878_v63 = vpop.f32.mrb[8].mxu1  ;;  %v8028_v21 = vld [vmem:[%s10802_s3 + $0x664] ss:$12 sps:$4 sm:$0xff]  }
 0x115   : > { %v954_v50 = vmax.f32 %v752_v33, 0.0  ;;  %v9010_v51 = vadd.f32 %v755_v46, %v8958_v43  ;;  %v880_v4 = vpop.f32.mrb[9].mxu1  ;;  %v879_v8 = vadd.f32 %v878_v63, %v8967_v58  ;;  %v8026_v29 = vld [vmem:[%s10802_s3 + $0x660] ss:$12 sps:$4 sm:$0xff]   ;;  %v8033_v31 = vld [vmem:[%s10802_s3 + $0x67c] ss:$12 sps:$4 sm:$0xff]  }
 0x116   : > { %v956_v54 = vmax.f32 %v9001_v45, 0.0  ;;  %v8569_v3 = vpack.c.bf16 %v953_v44, %v950_v15  ;;  %1123 = vst [vmem:[#allocation2 + $0x50] sm:$0xf] %v7418_v60  ;;  %v881_v9 = vpop.f32.mrb[10].mxu1  ;;  %v8045_v63 = vld [vmem:[%s10802_s3 + $0x680] ss:$12 sps:$4 sm:$0xff]  }
 0x117   : > { %v7419_v56 = vpack.c.bf16 %v954_v50, %v953_v44  ;;  %v957_v57 = vmax.f32 %v9010_v51, 0.0  ;;  %2694 = vmatpush1.bf16.msra.mxu0 %v8013_v35  ;;  %v8568_v2 = vpack.c.bf16 %v954_v50, %v951_v17  ;;  %7500 = vmatpush3.bf16.msra.mxu1 %v8025_v48  ;;  %v882_v12 = vadd.f32 %v881_v9, %v8967_v58  ;;  %v883_v13 = vpop.f32.mrb[11].mxu1  ;;  %v8021_v17 = vld [vmem:[%s10802_s3 + $0x648] ss:$12 sps:$4 sm:$0xff]  }
 0x118   : > { %2695 = vmatprep.subr.bf16.mxu0 %v8018_v47  ;;  %7501 = vmatprep.subr.bf16.mxu1 %v8029_v55  ;;  %v955_v18 = vmax.f32 %v879_v8, 0.0  ;;  %v8044_v47 = vld [vmem:[%s10802_s3 + $0x740] ss:$12 sps:$4 sm:$0xff]  }
 0x119   : > { %1124 = vst [vmem:[#allocation2 + $0x60] sm:$0xff] %v7419_v56  ;;  %v7421_v0 = vpack.c.bf16 %v957_v57, %v956_v54  ;;  %v759_v1 = vpop.f32.mrb[12].mxu0  ;;  %2650 = vmatprep.mubr.bf16.mxu0 %v8568_v2  ;;  %2897 = vmatprep.mubr.bf16.mxu1 %v8568_v2  ;;  %v958_v23 = vmax.f32 %v882_v12, 0.0  ;;  %v8043_v8 = vld [vmem:[%s10802_s3 + $0x6ac] ss:$12 sps:$4 sm:$0xff]  }
 0x11a   : > { %v760_v5 = vadd.f32 %v759_v1, %v8955_v42  ;;  %v761_v6 = vpop.f32.mrb[13].mxu0  ;;  %2651 = vmatmul.mubr.bf16.gmra.mrb[44].mxu0 %v8569_v3  ;;  %2898 = vmatmul.mubr.bf16.gmra.mrb[44].mxu1 %v8569_v3  ;;  %v7420_v26 = vpack.c.bf16 %v955_v18, %v955_v18  ;;  %v8049_v3 = vld [vmem:[%s10802_s3 + $0x758] ss:$12 sps:$4 sm:$0xff]  }
 0x11b   : > { %1126 = vst [vmem:[#allocation2 + $0x78] sm:$0xff] %v7421_v0  ;;  %v762_v10 = vadd.f32 %v761_v6, %v8958_v43  ;;  %v763_v11 = vpop.f32.mrb[14].mxu0  ;;  %2696 = vmatpush1.bf16.msra.mxu0 %v8016_v59  ;;  %7502 = vmatpush3.bf16.msra.mxu1 %v8030_v62  ;;  %v7422_v30 = vpack.c.bf16 %v958_v23, %v958_v23  ;;  %v8038_v62 = vld [vmem:[%s10802_s3 + $0x694] ss:$12 sps:$4 sm:$0xff]   ;;  %v8036_v6 = vld [vmem:[%s10802_s3 + $0x690] ss:$12 sps:$4 sm:$0xff]  }
 0x11c   : > { %v959_v14 = vmax.f32 %v760_v5, 0.0  ;;  %v9036_v15 = vadd.f32 %v763_v11, %v8955_v42  ;;  %v765_v16 = vpop.f32.mrb[15].mxu0  ;;  %2697 = vmatprep.subr.bf16.mxu0 %v8023_v61  ;;  %7503 = vmatprep.subr.bf16.mxu1 %v8034_v7  ;;  %1125 = vst [vmem:[#allocation2 + $0x68] sm:$0xf] %v7420_v26  ;;  %v886_v33 = vpop.f32.mrb[12].mxu1 }
 0x11d   : > { %v960_v19 = vmax.f32 %v762_v10, 0.0  ;;  %v9042_v20 = vadd.f32 %v765_v16, %v8958_v43  ;;  %1127 = vst [vmem:[#allocation2 + $0x80] sm:$0xf] %v7422_v30  ;;  %v888_v39 = vpop.f32.mrb[13].mxu1  ;;  %v887_v48 = vadd.f32 %v886_v33, %v8967_v58  ;;  %v8050_v18 = vld [vmem:[%s10802_s3 + $0x698] ss:$12 sps:$4 sm:$0xff]  }
 0x11e   : > { %v962_v24 = vmax.f32 %v9036_v15, 0.0  ;;  %v8571_v37 = vpack.c.bf16 %v959_v14, %v956_v54  ;;  %v889_v50 = vpop.f32.mrb[14].mxu1  ;;  %v8041_v33 = vld [vmem:[%s10802_s3 + $0x6a8] ss:$12 sps:$4 sm:$0xff]   ;;  %v8055_v39 = vld [vmem:[%s10802_s3 + $0x6b0] ss:$12 sps:$4 sm:$0xff]  }
 0x11f   : > { %v7423_v27 = vpack.c.bf16 %v960_v19, %v959_v14  ;;  %v963_v28 = vmax.f32 %v9042_v20, 0.0  ;;  %2698 = vmatpush1.bf16.msra.mxu0 %v8021_v17  ;;  %v8570_v36 = vpack.c.bf16 %v960_v19, %v957_v57  ;;  %7504 = vmatpush3.bf16.msra.mxu1 %v8035_v22  ;;  %v890_v52 = vadd.f32 %v889_v50, %v8967_v58  ;;  %v891_v53 = vpop.f32.mrb[15].mxu1  ;;  %v8031_v57 = vld [vmem:[%s10802_s3 + $0x678] ss:$12 sps:$4 sm:$0xff]   ;;  %v8563_v22 = vld [vmem:[#allocation2 + $0xf0] sm:$0xff] }
 0x120   : > { %2699 = vmatprep.subr.bf16.mxu0 %v8028_v21  ;;  %7505 = vmatprep.subr.bf16.mxu1 %v8039_v25  ;;  %v961_v59 = vmax.f32 %v887_v48, 0.0  ;;  %v8071_v48 = vld [vmem:[%s10802_s3 + $0x848] ss:$12 sps:$4 sm:$0xff]   ;;  %v8046_v50 = vld [vmem:[%s10802_s3 + $0x6c0] ss:$12 sps:$4 sm:$0xff]  }
 0x121   : > { %1128 = vst [vmem:[#allocation2 + $0x90] sm:$0xff] %v7423_v27  ;;  %v7425_v34 = vpack.c.bf16 %v963_v28, %v962_v24  ;;  %v769_v35 = vpop.f32.mrb[16].mxu0  ;;  %2905 = vmatprep.mubr.bf16.mxu1 %v8570_v36  ;;  %2660 = vmatprep.mubr.bf16.mxu0 %v8570_v36  ;;  %v964_v0 = vmax.f32 %v890_v52, 0.0 }
 0x122   : > { %v770_v44 = vadd.f32 %v769_v35, %v8955_v42  ;;  %v771_v46 = vpop.f32.mrb[17].mxu0  ;;  %2906 = vmatmul.mubr.bf16.gmra.mrb[48].mxu1 %v8571_v37  ;;  %2661 = vmatmul.mubr.bf16.gmra.mrb[48].mxu0 %v8571_v37  ;;  %v7424_v2 = vpack.c.bf16 %v961_v59, %v961_v59  ;;  %v8053_v59 = vld [vmem:[%s10802_s3 + $0x6dc] ss:$12 sps:$4 sm:$0xff]  }
 0x123   : > { %1130 = vst [vmem:[#allocation2 + $0xa8] sm:$0xff] %v7425_v34  ;;  %v772_v51 = vadd.f32 %v771_v46, %v8958_v43  ;;  %v773_v45 = vpop.f32.mrb[18].mxu0  ;;  %2700 = vmatpush1.bf16.msra.mxu0 %v8026_v29  ;;  %7506 = vmatpush3.bf16.msra.mxu1 %v8040_v32  ;;  %v7426_v7 = vpack.c.bf16 %v964_v0, %v964_v0  ;;  %v8048_v34 = vld [vmem:[%s10802_s3 + $0x6c4] ss:$12 sps:$4 sm:$0xff]  }
 0x124   : > { %v965_v54 = vmax.f32 %v770_v44, 0.0  ;;  %v774_v55 = vadd.f32 %v773_v45, %v8955_v42  ;;  %v775_v56 = vpop.f32.mrb[19].mxu0  ;;  %2701 = vmatprep.subr.bf16.mxu0 %v8033_v31  ;;  %7507 = vmatprep.subr.bf16.mxu1 %v8044_v47  ;;  %1129 = vst [vmem:[#allocation2 + $0x98] sm:$0xf] %v7424_v2  ;;  %v894_v9 = vpop.f32.mrb[16].mxu1 }
 0x125   : > { %v966_v60 = vmax.f32 %v772_v51, 0.0  ;;  %v776_v61 = vadd.f32 %v775_v56, %v8958_v43  ;;  %1131 = vst [vmem:[#allocation2 + $0xb0] sm:$0xf] %v7426_v7  ;;  %v896_v14 = vpop.f32.mrb[17].mxu1  ;;  %v895_v19 = vadd.f32 %v894_v9, %v8967_v58  ;;  %v8051_v7 = vld [vmem:[%s10802_s3 + $0x6d8] ss:$12 sps:$4 sm:$0xff]  }
 0x126   : > { %v968_v1 = vmax.f32 %v774_v55, 0.0  ;;  %v8573_v13 = vpack.c.bf16 %v965_v54, %v962_v24  ;;  %v897_v20 = vpop.f32.mrb[18].mxu1  ;;  %v8054_v24 = vld [vmem:[%s10802_s3 + $0x770] ss:$12 sps:$4 sm:$0xff]   ;;  %v8058_v9 = vld [vmem:[%s10802_s3 + $0x6f4] ss:$12 sps:$4 sm:$0xff]  }
 0x127   : > { %v7427_v4 = vpack.c.bf16 %v966_v60, %v965_v54  ;;  %v969_v5 = vmax.f32 %v776_v61, 0.0  ;;  %2702 = vmatpush1.bf16.msra.mxu0 %v8031_v57  ;;  %v8572_v12 = vpack.c.bf16 %v966_v60, %v963_v28  ;;  %7508 = vmatpush3.bf16.msra.mxu1 %v8045_v63  ;;  %v898_v25 = vadd.f32 %v897_v20, %v8967_v58  ;;  %v899_v26 = vpop.f32.mrb[19].mxu1 }
 0x128   : > { %2703 = vmatprep.subr.bf16.mxu0 %v8038_v62  ;;  %7509 = vmatprep.subr.bf16.mxu1 %v8049_v3  ;;  %v967_v30 = vmax.f32 %v895_v19, 0.0 }
 0x129   : > { %1132 = vst [vmem:[#allocation2 + $0xc0] sm:$0xff] %v7427_v4  ;;  %v7429_v10 = vpack.c.bf16 %v969_v5, %v968_v1  ;;  %v779_v11 = vpop.f32.mrb[20].mxu0  ;;  %2913 = vmatprep.mubr.bf16.mxu1 %v8572_v12  ;;  %2670 = vmatprep.mubr.bf16.mxu0 %v8572_v12  ;;  %v970_v35 = vmax.f32 %v898_v25, 0.0  ;;  %v9150_v25 = vld [vmem:[#allocation2 + $0x20] ss:$24 sps:$4 sm:$0xff]  }
 0x12a   : > { %v780_v16 = vadd.f32 %v779_v11, %v8955_v42  ;;  %v781_v17 = vpop.f32.mrb[21].mxu0  ;;  %2914 = vmatmul.mubr.bf16.gmra.mrb[52].mxu1 %v8573_v13  ;;  %v7428_v37 = vpack.c.bf16 %v967_v30, %v967_v30  ;;  %2671 = vmatmul.mubr.bf16.gmra.mrb[52].mxu0 %v8573_v13  ;;  %v8062_v30 = vld [vmem:[%s10802_s3 + $0x708] ss:$12 sps:$4 sm:$0xff]  }
 0x12b   : > { %1134 = vst [vmem:[#allocation2 + $0xd8] sm:$0xff] %v7429_v10  ;;  %v782_v21 = vadd.f32 %v781_v17, %v8958_v43  ;;  %v783_v15 = vpop.f32.mrb[22].mxu0  ;;  %v6746_v23 = vcombine.high %v7429_v10, %v8563_v22  ;;  %2704 = vmatpush1.bf16.msra.mxu0 %v8036_v6  ;;  %7510 = vmatpush3.bf16.msra.mxu1 %v8050_v18 }
 0x12c   : > { %v971_v27 = vmax.f32 %v780_v16, 0.0  ;;  %v784_v28 = vadd.f32 %v783_v15, %v8955_v42  ;;  %v785_v29 = vpop.f32.mrb[23].mxu0  ;;  %2705 = vmatprep.subr.bf16.mxu0 %v8043_v8  ;;  %7511 = vmatprep.subr.bf16.mxu1 %v8054_v24  ;;  %v7430_v47 = vpack.c.bf16 %v970_v35, %v970_v35  ;;  %v6745_v51 = vcombine.low %v7429_v10, %v8563_v22  ;;  %v902_v45 = vpop.f32.mrb[20].mxu1  ;;  %v8056_v16 = vld [vmem:[%s10802_s3 + $0x6f0] ss:$12 sps:$4 sm:$0xff]  }
 0x12d   : > { %v972_v31 = vmax.f32 %v782_v21, 0.0  ;;  %v786_v32 = vadd.f32 %v785_v29, %v8958_v43  ;;  %2921 = vmatprep.mubr.bf16.mxu1 %v6746_v23  ;;  %1133 = vst [vmem:[#allocation2 + $0xc8] sm:$0xf] %v7428_v37  ;;  %2680 = vmatprep.mubr.bf16.mxu0 %v6746_v23  ;;  %v903_v54 = vadd.f32 %v902_v45, %v8967_v58  ;;  %v904_v55 = vpop.f32.mrb[21].mxu1  ;;  %v8064_v21 = vld [vmem:[%s10802_s3 + $0x70c] ss:$12 sps:$4 sm:$0xff]  }
 0x12e   : > { %v974_v36 = vmax.f32 %v784_v28, 0.0  ;;  %1135 = vst [vmem:[#allocation2 + $0xe0] sm:$0xf] %v7430_v47  ;;  %v905_v60 = vpop.f32.mrb[22].mxu1  ;;  %v8072_v15 = vld [vmem:[%s10802_s3 + $0x788] ss:$12 sps:$4 sm:$0xff]  }
 0x12f   : > { %v7431_v44 = vpack.c.bf16 %v972_v31, %v971_v27  ;;  %v975_v46 = vmax.f32 %v786_v32, 0.0  ;;  %2706 = vmatpush1.bf16.msra.mxu0 %v8041_v33  ;;  %7512 = vmatpush3.bf16.msra.mxu1 %v8055_v39  ;;  %v973_v63 = vmax.f32 %v903_v54, 0.0  ;;  %v906_v0 = vadd.f32 %v905_v60, %v8967_v58  ;;  %v907_v1 = vpop.f32.mrb[23].mxu1  ;;  %v8076_v31 = vld [vmem:[%s10802_s3 + $0x860] ss:$12 sps:$4 sm:$0xff]  }
 0x130   : > { %2707 = vmatprep.subr.bf16.mxu0 %v8048_v34  ;;  %7543 = vmatprep.subr.bf16.mxu1 %v8071_v48  ;;  %v8083_v54 = vld [vmem:[%s10802_s3 + $0x878] ss:$12 sps:$4 sm:$0xff]   ;;  %v8075_v55 = vld [vmem:[%s10802_s3 + $0x73c] ss:$12 sps:$4 sm:$0xff]  }
 0x131   : > { %1223 = vst [vmem:[#allocation2 + $0x24] sm:$0xff] %v7431_v44  ;;  %v7433_v52 = vpack.c.bf16 %v975_v46, %v974_v36  ;;  %v789_v53 = vpop.f32.mrb[24].mxu0  ;;  %v7432_v8 = vpack.c.bf16 %v973_v63, %v973_v63  ;;  %v976_v10 = vmax.f32 %v906_v0, 0.0  ;;  %v8067_v36 = vld [vmem:[%s10802_s3 + $0x724] ss:$12 sps:$4 sm:$0xff]  }
 0x132   : > { %v790_v56 = vadd.f32 %v789_v53, %v8955_v42  ;;  %v791_v57 = vpop.f32.mrb[25].mxu0  ;;  %2922 = vmatmul.mubr.bf16.gmra.mrb[56].mxu1 %v6745_v51  ;;  %2681 = vmatmul.mubr.bf16.gmra.mrb[56].mxu0 %v6745_v51  ;;  %v8065_v53 = vld [vmem:[%s10802_s3 + $0x720] ss:$12 sps:$4 sm:$0xff]  }
 0x133   : > { %1225 = vst [vmem:[#allocation2 + $0x3c] sm:$0xff] %v7433_v52  ;;  %v792_v61 = vadd.f32 %v791_v57, %v8958_v43  ;;  %v793_v62 = vpop.f32.mrb[26].mxu0  ;;  %2708 = vmatpush1.bf16.msra.mxu0 %v8046_v50  ;;  %1224 = vst [vmem:[#allocation2 + $0x2c] sm:$0xf] %v7432_v8  ;;  %v7434_v14 = vpack.c.bf16 %v976_v10, %v976_v10  ;;  %v8077_v50 = vld [vmem:[%s10802_s3 + $0x7a0] ss:$12 sps:$4 sm:$0xff]  }
 0x134   : > { %v977_v2 = vmax.f32 %v790_v56, 0.0  ;;  %v794_v3 = vadd.f32 %v793_v62, %v8955_v42  ;;  %v795_v4 = vpop.f32.mrb[27].mxu0  ;;  %2709 = vmatprep.subr.bf16.mxu0 %v8053_v59  ;;  %v910_v17 = vpop.f32.mrb[24].mxu1 }
 0x135   : > { %v978_v5 = vmax.f32 %v792_v61, 0.0  ;;  %v796_v6 = vadd.f32 %v795_v4, %v8958_v43  ;;  %1226 = vst [vmem:[#allocation2 + $0x44] sm:$0xf] %v7434_v14  ;;  %v911_v20 = vadd.f32 %v910_v17, %v8967_v58  ;;  %v912_v22 = vpop.f32.mrb[25].mxu1  ;;  %v8084_v61 = vld [vmem:[%s10802_s3 + $0x7b8] ss:$12 sps:$4 sm:$0xff]  }
 0x136   : > { %v980_v11 = vmax.f32 %v794_v3, 0.0  ;;  %v913_v32 = vpop.f32.mrb[26].mxu1  ;;  %v9185_v3 = vld [vmem:[#allocation2 + $0x50] ss:$24 sps:$4 sm:$0xff]   ;;  %v8073_v17 = vld [vmem:[%s10802_s3 + $0x738] ss:$12 sps:$4 sm:$0xff]  }
 0x137   : > { %v7435_v12 = vpack.c.bf16 %v978_v5, %v977_v2  ;;  %v981_v13 = vmax.f32 %v796_v6, 0.0  ;;  %2710 = vmatpush1.bf16.msra.mxu0 %v8051_v7  ;;  %v979_v29 = vmax.f32 %v911_v20, 0.0  ;;  %v914_v37 = vadd.f32 %v913_v32, %v8967_v58  ;;  %v915_v39 = vpop.f32.mrb[27].mxu1  ;;  %v8088_v6 = vld [vmem:[%s10802_s3 + $0x890] ss:$12 sps:$4 sm:$0xff]  }
 0x138   : > { %2711 = vmatprep.subr.bf16.mxu0 %v8058_v9  ;;  %v8080_v20 = vld [vmem:[%s10802_s3 + $0x754] ss:$12 sps:$4 sm:$0xff]  }
 0x139   : > { %1227 = vst [vmem:[#allocation2 + $0x54] sm:$0xff] %v7435_v12  ;;  %v7437_v18 = vpack.c.bf16 %v981_v13, %v980_v11  ;;  %v799_v19 = vpop.f32.mrb[28].mxu0  ;;  %v7436_v47 = vpack.c.bf16 %v979_v29, %v979_v29  ;;  %v982_v51 = vmax.f32 %v914_v37, 0.0  ;;  %v8087_v37 = vld [vmem:[%s10802_s3 + $0x76c] ss:$12 sps:$4 sm:$0xff]  }
 0x13a   : > { %v800_v23 = vadd.f32 %v799_v19, %v8955_v42  ;;  %v801_v24 = vpop.f32.mrb[29].mxu0  ;;  %v8061_v26 = vld [vmem:[#allocation2 + $0x24] ss:$24 sps:$4 sm:$0xff]  }
 0x13b   : > { %1229 = vst [vmem:[#allocation2 + $0x6c] sm:$0xff] %v7437_v18  ;;  %v802_v27 = vadd.f32 %v801_v24, %v8958_v43  ;;  %v803_v28 = vpop.f32.mrb[30].mxu0  ;;  %2962 = vmatprep.mubr.bf16.mxu1 %v8061_v26  ;;  %2723 = vmatprep.mubr.bf16.mxu0 %v8061_v26  ;;  %1228 = vst [vmem:[#allocation2 + $0x5c] sm:$0xf] %v7436_v47  ;;  %v7438_v56 = vpack.c.bf16 %v982_v51, %v982_v51  ;;  %v8095_v24 = vld [vmem:[%s10802_s3 + $0x8a8] ss:$12 sps:$4 sm:$0xff]  }
 0x13c   : > { %v983_v33 = vmax.f32 %v800_v23, 0.0  ;;  %v804_v34 = vadd.f32 %v803_v28, %v8955_v42  ;;  %v805_v35 = vpop.f32.mrb[31].mxu0  ;;  %2712 = vmatpush1.bf16.msra.mxu0 %v8056_v16  ;;  %2963 = vmatmul.mubr.bf16.vlgmr.msra.gmra.mrb[60].mxu1 %v9150_v25  ;;  %v918_v57 = vpop.f32.mrb[28].mxu1 }
 0x13d   : > { %v984_v44 = vmax.f32 %v802_v27, 0.0  ;;  %v806_v46 = vadd.f32 %v805_v35, %v8958_v43  ;;  %2713 = vmatprep.subr.bf16.mxu0 %v8064_v21  ;;  %7544 = vmatpush3.bf16.msra.mxu1 %v8072_v15  ;;  %v919_v62 = vadd.f32 %v918_v57, %v8967_v58  ;;  %v920_v63 = vpop.f32.mrb[29].mxu1  ;;  %1230 = vst [vmem:[#allocation2 + $0x74] sm:$0xf] %v7438_v56  ;;  %v8089_v21 = vld [vmem:[%s10802_s3 + $0x7d0] ss:$12 sps:$4 sm:$0xff]  }
 0x13e   : > { %v986_v48 = vmax.f32 %v804_v34, 0.0  ;;  %7545 = vmatprep.subr.bf16.mxu1 %v8076_v31  ;;  %v921_v8 = vpop.f32.mrb[30].mxu1  ;;  %v8078_v31 = vld [vmem:[%s10802_s3 + $0x750] ss:$12 sps:$4 sm:$0xff]  }
 0x13f   : > { %v7439_v45 = vpack.c.bf16 %v984_v44, %v983_v33  ;;  %v987_v52 = vmax.f32 %v806_v46, 0.0  ;;  %v985_v7 = vmax.f32 %v919_v62, 0.0  ;;  %v922_v12 = vadd.f32 %v921_v8, %v8967_v58  ;;  %v923_v13 = vpop.f32.mrb[31].mxu1 }
 0x140   : > { %2714 = vmatpush1.bf16.msra.mxu0 %v8062_v30 }
 0x141   : > { %1231 = vst [vmem:[#allocation2 + $0x84] sm:$0xff] %v7439_v45  ;;  %v7441_v59 = vpack.c.bf16 %v987_v52, %v986_v48  ;;  %v809_v60 = vpop.f32.mrb[32].mxu0  ;;  %2715 = vmatprep.subr.bf16.mxu0 %v8067_v36  ;;  %7546 = vmatpush3.bf16.msra.mxu1 %v8077_v50  ;;  %v7440_v18 = vpack.c.bf16 %v985_v7, %v985_v7  ;;  %v988_v15 = vmax.f32 %v922_v12, 0.0  ;;  %v8096_v50 = vld [vmem:[%s10802_s3 + $0x7e8] ss:$12 sps:$4 sm:$0xff]  }
 0x142   : > { %v810_v0 = vadd.f32 %v809_v60, %v8955_v42  ;;  %v811_v1 = vpop.f32.mrb[33].mxu0  ;;  %v9183_v2 = vld [vmem:[#allocation2 + $0x54] ss:$24 sps:$4 sm:$0xff]   ;;  %7547 = vmatprep.subr.bf16.mxu1 %v8083_v54 }
 0x143   : > { %1233 = vst [vmem:[#allocation2 + $0x9c] sm:$0xff] %v7441_v59  ;;  %v812_v4 = vadd.f32 %v811_v1, %v8958_v43  ;;  %v813_v5 = vpop.f32.mrb[34].mxu0  ;;  %2970 = vmatprep.mubr.bf16.mxu1 %v9183_v2  ;;  %1232 = vst [vmem:[#allocation2 + $0x8c] sm:$0xf] %v7440_v18  ;;  %v7442_v27 = vpack.c.bf16 %v988_v15, %v988_v15  ;;  %v8085_v60 = vld [vmem:[%s10802_s3 + $0x768] ss:$12 sps:$4 sm:$0xff]  }
 0x144   : > { %v989_v9 = vmax.f32 %v810_v0, 0.0  ;;  %v814_v10 = vadd.f32 %v813_v5, %v8955_v42  ;;  %v815_v11 = vpop.f32.mrb[35].mxu0  ;;  %2716 = vmatpush1.bf16.msra.mxu0 %v8065_v53  ;;  %2971 = vmatmul.mubr.bf16.gmra.mrb[64].mxu1 %v9185_v3  ;;  %v926_v28 = vpop.f32.mrb[32].mxu1  ;;  %v9242_v0 = vld [vmem:[#allocation2 + $0x70] sm:$0xff]  ;;  %v8101_v5 = vld [vmem:[%s10802_s3 + $0x800] ss:$12 sps:$4 sm:$0xff]  }
 0x145   : > { %v990_v14 = vmax.f32 %v812_v4, 0.0  ;;  %v816_v16 = vadd.f32 %v815_v11, %v8958_v43  ;;  %2717 = vmatprep.subr.bf16.mxu0 %v8075_v55  ;;  %7548 = vmatpush3.bf16.msra.mxu1 %v8084_v61  ;;  %v927_v32 = vadd.f32 %v926_v28, %v8967_v58  ;;  %v928_v33 = vpop.f32.mrb[33].mxu1  ;;  %1234 = vst [vmem:[#allocation2 + $0xa4] sm:$0xf] %v7442_v27  ;;  %v8100_v55 = vld [vmem:[%s10802_s3 + $0x8c0] ss:$12 sps:$4 sm:$0xff]  }
 0x146   : > { %v992_v19 = vmax.f32 %v814_v10, 0.0  ;;  %7549 = vmatprep.subr.bf16.mxu1 %v8088_v6  ;;  %v929_v39 = vpop.f32.mrb[34].mxu1  ;;  %v8108_v15 = vld [vmem:[%s10802_s3 + $0x818] ss:$12 sps:$4 sm:$0xff]   ;;  %v8115_v28 = vld [vmem:[%s10802_s3 + $0x8f0] ss:$12 sps:$4 sm:$0xff]  }
 0x147   : > { %v7443_v22 = vpack.c.bf16 %v990_v14, %v989_v9  ;;  %v993_v23 = vmax.f32 %v816_v16, 0.0  ;;  %v991_v51 = vmax.f32 %v927_v32, 0.0  ;;  %v931_v45 = vpop.f32.mrb[35].mxu1  ;;  %v930_v56 = vadd.f32 %v929_v39, %v8967_v58  ;;  %v8107_v9 = vld [vmem:[%s10802_s3 + $0x8d8] ss:$12 sps:$4 sm:$0xff]  }
 0x148   : > { %v9208_v26 = vld [vmem:[#allocation2 + $0x80] sm:$0xff]  ;;  %2718 = vmatpush1.bf16.msra.mxu0 %v8073_v17  ;;  %v8116_v32 = vld [vmem:[%s10802_s3 + $0x830] ss:$12 sps:$4 sm:$0xff]   ;;  %v8112_v45 = vld [vmem:[%s10802_s3 + $0x7c8] ss:$12 sps:$4 sm:$0xff]  }
 0x149   : > { %1235 = vst [vmem:[#allocation2 + $0xb4] sm:$0xff] %v7443_v22  ;;  %v7445_v29 = vpack.c.bf16 %v993_v23, %v992_v19  ;;  %v819_v30 = vpop.f32.mrb[36].mxu0  ;;  %2719 = vmatprep.subr.bf16.mxu0 %v8080_v20  ;;  %7550 = vmatpush3.bf16.msra.mxu1 %v8089_v21  ;;  %v7444_v61 = vpack.c.bf16 %v991_v51, %v991_v51  ;;  %v994_v63 = vmax.f32 %v930_v56, 0.0  ;;  %v8090_v16 = vld [vmem:[%s10802_s3 + $0x780] ss:$12 sps:$4 sm:$0xff]   ;;  %v9349_v56 = vld [vmem:[#allocation2 + $0x58] sm:$0xff] }
 0x14a   : > { %v820_v34 = vadd.f32 %v819_v30, %v8955_v42  ;;  %v821_v35 = vpop.f32.mrb[37].mxu0  ;;  %v1483_v36 = vld [vmem:[#allocation2 + $0x98] sm:$0xff]  ;;  %7551 = vmatprep.subr.bf16.mxu1 %v8095_v24  ;;  %v9322_v51 = vld [vmem:[#allocation2 + $0x2c] ss:$24 sps:$4 sm:$0xff]  }
 0x14b   : > { %1237 = vst [vmem:[#allocation2 + $0xcc] sm:$0xff] %v7445_v29  ;;  %v822_v44 = vadd.f32 %v821_v35, %v8958_v43  ;;  %v823_v46 = vpop.f32.mrb[38].mxu0  ;;  %v9220_v47 = vcombine.high %v9208_v26, %v1483_v36  ;;  %v9223_v48 = vcombine.low %v9208_v26, %v1483_v36  ;;  %1236 = vst [vmem:[#allocation2 + $0xbc] sm:$0xf] %v7444_v61  ;;  %v8099_v21 = vld [vmem:[%s10802_s3 + $0x79c] ss:$12 sps:$4 sm:$0xff]  }
 0x14c   : > { %v995_v52 = vmax.f32 %v820_v34, 0.0  ;;  %v824_v53 = vadd.f32 %v823_v46, %v8955_v42  ;;  %v825_v54 = vpop.f32.mrb[39].mxu0  ;;  %2720 = vmatpush1.bf16.msra.mxu0 %v8078_v31  ;;  %v8092_v42 = vld [vmem:[%s10802_s3 + $0x784] ss:$12 sps:$4 sm:$0xff]   ;;  %v7446_v10 = vpack.c.bf16 %v994_v63, %v994_v63  ;;  %v934_v11 = vpop.f32.mrb[36].mxu1 }
 0x14d   : > { %v996_v57 = vmax.f32 %v822_v44, 0.0  ;;  %v826_v59 = vadd.f32 %v825_v54, %v8958_v43  ;;  %2978 = vmatprep.mubr.bf16.mxu1 %v9220_v47  ;;  %2721 = vmatprep.subr.bf16.mxu0 %v8087_v37  ;;  %v9244_v43 = vld [vmem:[#allocation2 + $0x88] sm:$0xff]  ;;  %v935_v13 = vadd.f32 %v934_v11, %v8967_v58  ;;  %v936_v14 = vpop.f32.mrb[37].mxu1  ;;  %v8097_v27 = vld [vmem:[%s10802_s3 + $0x798] ss:$12 sps:$4 sm:$0xff]  }
 0x14e   : > { %v998_v62 = vmax.f32 %v824_v53, 0.0  ;;  %2979 = vmatmul.mubr.bf16.gmra.mrb[68].mxu1 %v9223_v48  ;;  %v9251_v6 = vcombine.high %v9242_v0, %v9244_v43  ;;  %v9255_v7 = vcombine.low %v9242_v0, %v9244_v43  ;;  %1238 = vst [vmem:[#allocation2 + $0xd4] sm:$0xf] %v7446_v10  ;;  %v937_v18 = vpop.f32.mrb[38].mxu1  ;;  %v8104_v31 = vld [vmem:[%s10802_s3 + $0x7b4] ss:$12 sps:$4 sm:$0xff]  }
 0x14f   : > { %v7447_v1 = vpack.c.bf16 %v996_v57, %v995_v52  ;;  %v999_v4 = vmax.f32 %v826_v59, 0.0  ;;  %7552 = vmatpush3.bf16.msra.mxu1 %v8096_v50  ;;  %v997_v22 = vmax.f32 %v935_v13, 0.0  ;;  %v938_v23 = vadd.f32 %v937_v18, %v8967_v58  ;;  %v939_v24 = vpop.f32.mrb[39].mxu1  ;;  %v9289_v58 = vld [vmem:[#allocation2 + $0xa0] sm:$0xff]  ;;  %v8128_v36 = vld [vmem:[%s10802_s3 + $0xc8] ss:$12 sps:$4 sm:$0xff]  }
 0x150   : > { %v9257_v8 = vld [vmem:[#allocation2 + $0xb0] sm:$0xff]  ;;  %7553 = vmatprep.subr.bf16.mxu1 %v8100_v55  ;;  %2722 = vmatpush1.bf16.msra.mxu0 %v8085_v60  ;;  %v8114_v44 = vld [vmem:[%s10802_s3 + $0x7cc] ss:$12 sps:$4 sm:$0xff]   ;;  %v8122_v57 = vld [vmem:[%s10802_s3 + $0x7fc] ss:$12 sps:$4 sm:$0xff]   ;;  %v9359_v60 = vcombine.high %v9349_v56, %v9242_v0  ;;  %v9394_v10 = vcombine.high %v9244_v43, %v9289_v58 }
 0x151   : > { %1239 = vst [vmem:[#allocation2 + $0xe4] sm:$0xff] %v7447_v1  ;;  %v7449_v12 = vpack.c.bf16 %v999_v4, %v998_v62  ;;  %2774 = vmatprep.subr.bf16.mxu0 %v8092_v42  ;;  %v7448_v29 = vpack.c.bf16 %v997_v22, %v997_v22  ;;  %v1000_v30 = vmax.f32 %v938_v23, 0.0  ;;  %v8102_v37 = vld [vmem:[%s10802_s3 + $0x7b0] ss:$12 sps:$4 sm:$0xff]   ;;  %v8129_v59 = vld [vmem:[%s10802_s3 + $0x8] ss:$12 sps:$4 sm:$0xff]  }
 0x152   : > { %v1489_v17 = vld [vmem:[#allocation2 + $0xc8] sm:$0xff]  ;;  %v8120_v42 = vld [vmem:[%s10802_s3 + $0x7f8] ss:$12 sps:$4 sm:$0xff]   ;;  %v8125_v63 = vld [vmem:[%s10802_s3 + $0x814] ss:$12 sps:$4 sm:$0xff]  }
 0x153   : > { %1241 = vst [vmem:[#allocation2 + $0xfc] sm:$0xff] %v7449_v12  ;;  %v9267_v19 = vcombine.high %v9257_v8, %v1489_v17  ;;  %v9270_v20 = vcombine.low %v9257_v8, %v1489_v17  ;;  %7554 = vmatpush3.bf16.msra.mxu1 %v8101_v5  ;;  %2724 = vmatmul.mubr.bf16.vlgmr.msra.gmra.mrb[40].mxu0 %v9150_v25  ;;  %v9291_v25 = vld [vmem:[#allocation2 + $0xb8] sm:$0xff]  ;;  %1240 = vst [vmem:[#allocation2 + $0xec] sm:$0xf] %v7448_v29  ;;  %v8133_v61 = vld [vmem:[%s10802_s3 + $0xe0] ss:$12 sps:$4 sm:$0xff]  }
 0x154   : > { %7555 = vmatprep.subr.bf16.mxu1 %v8107_v9  ;;  %2733 = vmatprep.mubr.bf16.mxu0 %v9183_v2  ;;  %v7450_v2 = vpack.c.bf16 %v1000_v30, %v1000_v30  ;;  %v9301_v33 = vcombine.high %v9289_v58, %v9291_v25  ;;  %v9305_v34 = vcombine.low %v9289_v58, %v9291_v25  ;;  %v9364_v62 = vld [vmem:[#allocation2 + $0x28] ss:$24 sps:$4 sm:$0xff]   ;;  %v8123_v1 = vld [vmem:[%s10802_s3 + $0x810] ss:$12 sps:$4 sm:$0xff]   ;;  %v8140_v4 = vld [vmem:[%s10802_s3 + $0xf8] ss:$12 sps:$4 sm:$0xff]  }
 0x155   : > { %2986 = vmatprep.mubr.bf16.mxu1 %v9267_v19  ;;  %2775 = vmatpush1.bf16.msra.mxu0 %v8090_v16  ;;  %v9328_v52 = vld [vmem:[#allocation2 + $0xd0] sm:$0xff]  ;;  %v8132_v5 = vld [vmem:[%s10802_s3 + $0x82c] ss:$12 sps:$4 sm:$0xff]   ;;  %v9390_v9 = vcombine.low %v9349_v56, %v9242_v0  ;;  %v8144_v18 = vld [vmem:[%s10802_s3 + $0x85c] ss:$12 sps:$4 sm:$0xff]  }
 0x156   : > { %2987 = vmatmul.mubr.bf16.gmra.mrb[72].mxu1 %v9270_v20  ;;  %2776 = vmatprep.subr.bf16.mxu0 %v8099_v21  ;;  %1242 = vst [vmem:[#allocation2 + $0x104] sm:$0xf] %v7450_v2  ;;  %v8141_v11 = vld [vmem:[%s10802_s3 + $0x38] ss:$12 sps:$4 sm:$0xff]   ;;  %v8130_v12 = vld [vmem:[%s10802_s3 + $0x828] ss:$12 sps:$4 sm:$0xff]   ;;  %v9458_v29 = vcombine.low %v9291_v25, %v9328_v52 }
 0x157   : > { %7556 = vmatpush3.bf16.msra.mxu1 %v8108_v15  ;;  %v8145_v0 = vld [vmem:[%s10802_s3 + $0x110] ss:$12 sps:$4 sm:$0xff]   ;;  %v8135_v16 = vld [vmem:[%s10802_s3 + $0x840] ss:$12 sps:$4 sm:$0xff]   ;;  %v8152_v17 = vld [vmem:[%s10802_s3 + $0x128] ss:$12 sps:$4 sm:$0xff]  }
 0x158   : > { %v9307_v35 = vld [vmem:[#allocation2 + $0xe0] sm:$0xff]  ;;  %7557 = vmatprep.subr.bf16.mxu1 %v8115_v28  ;;  %v8146_v14 = vld [vmem:[%s10802_s3 + $0x50] ss:$12 sps:$4 sm:$0xff]   ;;  %v8153_v21 = vld [vmem:[%s10802_s3 + $0x68] ss:$12 sps:$4 sm:$0xff]  }
 0x159   : > { %2777 = vmatpush1.bf16.msra.mxu0 %v8097_v27  ;;  %v8137_v13 = vld [vmem:[%s10802_s3 + $0x844] ss:$12 sps:$4 sm:$0xff]   ;;  %v8149_v22 = vld [vmem:[%s10802_s3 + $0x874] ss:$12 sps:$4 sm:$0xff]   ;;  %v8156_v30 = vld [vmem:[%s10802_s3 + $0x88c] ss:$12 sps:$4 sm:$0xff]  }
 0x15a   : > { %v1495_v39 = vld [vmem:[#allocation2 + $0xf8] sm:$0xff]  ;;  %2778 = vmatprep.subr.bf16.mxu0 %v8104_v31  ;;  %v9332_v53 = vld [vmem:[#allocation2 + $0xe8] sm:$0xff]  ;;  %v8161_v2 = vld [vmem:[%s10802_s3 + $0x8a4] ss:$12 sps:$4 sm:$0xff]  }
 0x15b   : > { %v6748_v46 = vcombine.high %v9307_v35, %v1495_v39  ;;  %v9320_v50 = vcombine.low %v9307_v35, %v1495_v39  ;;  %7558 = vmatpush3.bf16.msra.mxu1 %v8116_v32  ;;  %2734 = vmatmul.mubr.bf16.gmra.mrb[44].mxu0 %v9185_v3  ;;  %v8119_v3 = vld [vmem:[%s10802_s3 + $0x7e4] ss:$12 sps:$4 sm:$0xff]   ;;  %v9340_v54 = vcombine.high %v9328_v52, %v9332_v53  ;;  %v8158_v23 = vld [vmem:[%s10802_s3 + $0x80] ss:$12 sps:$4 sm:$0xff]  }
 0x15c   : > { %7589 = vmatprep.subr.bf16.mxu1 %v8128_v36  ;;  %2743 = vmatprep.mubr.bf16.mxu0 %v9220_v47  ;;  %v9344_v55 = vcombine.low %v9328_v52, %v9332_v53  ;;  %v8117_v47 = vld [vmem:[%s10802_s3 + $0x7e0] ss:$12 sps:$4 sm:$0xff]   ;;  %v8142_v15 = vld [vmem:[%s10802_s3 + $0x858] ss:$12 sps:$4 sm:$0xff]   ;;  %v8147_v28 = vld [vmem:[%s10802_s3 + $0x870] ss:$12 sps:$4 sm:$0xff]  }
 0x15d   : > { %2994 = vmatprep.mubr.bf16.mxu1 %v6748_v46  ;;  %2779 = vmatpush1.bf16.msra.mxu0 %v8102_v37  ;;  %v8164_v24 = vld [vmem:[%s10802_s3 + $0x158] ss:$12 sps:$4 sm:$0xff]   ;;  %v8172_v32 = vld [vmem:[%s10802_s3 + $0x170] ss:$12 sps:$4 sm:$0xff]   ;;  %v8186_v37 = vld [vmem:[%s10802_s3 + $0x248] ss:$12 sps:$4 sm:$0xff]  }
 0x15e   : > { %2995 = vmatmul.mubr.bf16.gmra.mrb[76].mxu1 %v9320_v50  ;;  %2780 = vmatprep.subr.bf16.mxu0 %v8114_v44  ;;  %v1496_v27 = vld [vmem:[#allocation2 + $0x100] sm:$0xff]  ;;  %v8173_v36 = vld [vmem:[%s10802_s3 + $0xb0] ss:$12 sps:$4 sm:$0xff]  }
 0x15f   : > { %3035 = vmatprep.mubr.bf16.mxu1 %v9322_v51  ;;  %v8165_v31 = vld [vmem:[%s10802_s3 + $0x98] ss:$12 sps:$4 sm:$0xff]   ;;  %v8159_v39 = vld [vmem:[%s10802_s3 + $0x8a0] ss:$12 sps:$4 sm:$0xff]   ;;  %v9490_v44 = vcombine.low %v9332_v53, %v1496_v27 }
 0x161   : > { %2781 = vmatpush1.bf16.msra.mxu0 %v8112_v45  ;;  %v8176_v45 = vld [vmem:[%s10802_s3 + $0x8d4] ss:$12 sps:$4 sm:$0xff]  }
 0x162   : > { %2782 = vmatprep.subr.bf16.mxu0 %v8119_v3  ;;  %v9511_v3 = vld [vmem:[#allocation2] ss:$24 sps:$4 sm:$0xff]  }
 0x163   : > { %2744 = vmatmul.mubr.bf16.gmra.mrb[48].mxu0 %v9223_v48  ;;  %v8134_v48 = vld [vmem:[%s10802_s3 + $0x20] ss:$12 sps:$4 sm:$0xff]  }
 0x164   : > { %2753 = vmatprep.mubr.bf16.mxu0 %v9267_v19  ;;  %v9425_v19 = vcombine.low %v9244_v43, %v9289_v58  ;;  %v8157_v43 = vld [vmem:[%s10802_s3 + $0x140] ss:$12 sps:$4 sm:$0xff]   ;;  %v9464_v58 = vcombine.high %v9332_v53, %v1496_v27  ;;  %v8218_v27 = vld [vmem:[%s10802_s3 + $0x7c] ss:$12 sps:$4 sm:$0xff]  }
 0x165   : > { %2783 = vmatpush1.bf16.msra.mxu0 %v8117_v47  ;;  %v8181_v53 = vld [vmem:[%s10802_s3 + $0x8ec] ss:$12 sps:$4 sm:$0xff]   ;;  %v8189_v47 = vld [vmem:[%s10802_s3 + $0x188] ss:$12 sps:$4 sm:$0xff]  }
 0x166   : > { %3036 = vmatmul.mubr.bf16.vlgmr.msra.gmra.mrb[80].mxu1 %v9364_v62  ;;  %2784 = vmatprep.subr.bf16.mxu0 %v8122_v57  ;;  %v9516_v57 = vld [vmem:[#allocation2 + $0x34] ss:$24 sps:$4 sm:$0xff]  }
 0x167   : > { %3043 = vmatprep.mubr.bf16.mxu1 %v9359_v60  ;;  %7590 = vmatpush3.bf16.msra.mxu1 %v8129_v59  ;;  %v8193_v59 = vld [vmem:[%s10802_s3 + $0x260] ss:$12 sps:$4 sm:$0xff]  }
 0x168   : > { %7591 = vmatprep.subr.bf16.mxu1 %v8133_v61  ;;  %v8179_v61 = vld [vmem:[%s10802_s3 + $0x8e8] ss:$12 sps:$4 sm:$0xff]  }
 0x169   : > { %2785 = vmatpush1.bf16.msra.mxu0 %v8120_v42  ;;  %v8184_v42 = vld [vmem:[%s10802_s3 + $0x4] ss:$12 sps:$4 sm:$0xff]  }
 0x16a   : > { %2786 = vmatprep.subr.bf16.mxu0 %v8125_v63  ;;  %v8194_v63 = vld [vmem:[%s10802_s3 + $0x1a0] ss:$12 sps:$4 sm:$0xff]  }
 0x16b   : > { %2754 = vmatmul.mubr.bf16.gmra.mrb[52].mxu0 %v9270_v20  ;;  %7592 = vmatpush3.bf16.msra.mxu1 %v8134_v48  ;;  %v9429_v20 = vcombine.high %v9291_v25, %v9328_v52  ;;  %v8154_v25 = vld [vmem:[%s10802_s3 + $0x888] ss:$12 sps:$4 sm:$0xff]   ;;  %v8174_v52 = vld [vmem:[%s10802_s3 + $0x8d0] ss:$12 sps:$4 sm:$0xff]   ;;  %v8199_v48 = vld [vmem:[%s10802_s3 + $0x278] ss:$12 sps:$4 sm:$0xff]  }
 0x16c   : > { %2763 = vmatprep.mubr.bf16.mxu0 %v6748_v46  ;;  %7593 = vmatprep.subr.bf16.mxu1 %v8140_v4  ;;  %v8171_v46 = vld [vmem:[%s10802_s3 + $0x8bc] ss:$12 sps:$4 sm:$0xff]  }
 0x16d   : > { %2787 = vmatpush1.bf16.msra.mxu0 %v8123_v1  ;;  %v8182_v1 = vld [vmem:[%s10802_s3] ss:$12 sps:$4 sm:$0xff]   ;;  %v8192_v4 = vld [vmem:[%s10802_s3 + $0x1c] ss:$12 sps:$4 sm:$0xff]  }
 0x16e   : > { %3044 = vmatmul.mubr.bf16.gmra.mrb[84].mxu1 %v9390_v9  ;;  %2788 = vmatprep.subr.bf16.mxu0 %v8132_v5  ;;  %v8202_v5 = vld [vmem:[%s10802_s3 + $0x1b8] ss:$12 sps:$4 sm:$0xff]  }
 0x16f   : > { %3051 = vmatprep.mubr.bf16.mxu1 %v9394_v10  ;;  %7594 = vmatpush3.bf16.msra.mxu1 %v8141_v11  ;;  %v9545_v11 = vld [vmem:[#allocation2 + $0x30] ss:$24 sps:$4 sm:$0xff]  }
 0x170   : > { %7595 = vmatprep.subr.bf16.mxu1 %v8145_v0  ;;  %v9551_v0 = vld [vmem:[#allocation2 + $0x64] ss:$24 sps:$4 sm:$0xff]  }
 0x171   : > { %2789 = vmatpush1.bf16.msra.mxu0 %v8130_v12  ;;  %v8206_v12 = vld [vmem:[%s10802_s3 + $0x290] ss:$12 sps:$4 sm:$0xff]  }
 0x172   : > { %2790 = vmatprep.subr.bf16.mxu0 %v8137_v13  ;;  %v8190_v13 = vld [vmem:[%s10802_s3 + $0x18] ss:$12 sps:$4 sm:$0xff]  }
 0x173   : > { %2764 = vmatmul.mubr.bf16.gmra.mrb[56].mxu0 %v9320_v50  ;;  %7596 = vmatpush3.bf16.msra.mxu1 %v8146_v14  ;;  %v9495_v50 = vld [vmem:[#allocation2 + $0x4] ss:$24 sps:$4 sm:$0xff]   ;;  %v8212_v14 = vld [vmem:[%s10802_s3 + $0x2a8] ss:$12 sps:$4 sm:$0xff]  }
 0x174   : > { %2806 = vmatprep.mubr.bf16.mxu0 %v9322_v51  ;;  %7597 = vmatprep.subr.bf16.mxu1 %v8152_v17  ;;  %v8169_v51 = vld [vmem:[%s10802_s3 + $0x8b8] ss:$12 sps:$4 sm:$0xff]  }
 0x175   : > { %2791 = vmatpush1.bf16.msra.mxu0 %v8135_v16  ;;  %v8195_v16 = vld [vmem:[%s10802_s3 + $0x30] ss:$12 sps:$4 sm:$0xff]   ;;  %v8205_v17 = vld [vmem:[%s10802_s3 + $0x4c] ss:$12 sps:$4 sm:$0xff]  }
 0x176   : > { %3052 = vmatmul.mubr.bf16.gmra.mrb[88].mxu1 %v9425_v19  ;;  %2792 = vmatprep.subr.bf16.mxu0 %v8144_v18  ;;  %v8215_v18 = vld [vmem:[%s10802_s3 + $0x1e8] ss:$12 sps:$4 sm:$0xff]  }
 0x177   : > { %3059 = vmatprep.mubr.bf16.mxu1 %v9429_v20  ;;  %7598 = vmatpush3.bf16.msra.mxu1 %v8153_v21  ;;  %v9577_v21 = vld [vmem:[#allocation2 + $0x60] ss:$24 sps:$4 sm:$0xff]  }
 0x178   : > { %7599 = vmatprep.subr.bf16.mxu1 %v8157_v43  ;;  %v9583_v43 = vld [vmem:[#allocation2 + $0x94] ss:$24 sps:$4 sm:$0xff]  }
 0x179   : > { %2793 = vmatpush1.bf16.msra.mxu0 %v8142_v15  ;;  %v8219_v15 = vld [vmem:[%s10802_s3 + $0x2c0] ss:$12 sps:$4 sm:$0xff]  }
 0x17a   : > { %2794 = vmatprep.subr.bf16.mxu0 %v8149_v22  ;;  %v8203_v22 = vld [vmem:[%s10802_s3 + $0x48] ss:$12 sps:$4 sm:$0xff]  }
 0x17b   : > { %7600 = vmatpush3.bf16.msra.mxu1 %v8158_v23  ;;  %v8225_v23 = vld [vmem:[%s10802_s3 + $0x2d8] ss:$12 sps:$4 sm:$0xff]  }
 0x17c   : > { %7601 = vmatprep.subr.bf16.mxu1 %v8164_v24  ;;  %v8208_v24 = vld [vmem:[%s10802_s3 + $0x60] ss:$12 sps:$4 sm:$0xff]  }
 0x17d   : > { %2795 = vmatpush1.bf16.msra.mxu0 %v8147_v28  ;;  %v8226_v28 = vld [vmem:[%s10802_s3 + $0x218] ss:$12 sps:$4 sm:$0xff]  }
 0x17e   : > { %3060 = vmatmul.mubr.bf16.gmra.mrb[92].mxu1 %v9458_v29  ;;  %2796 = vmatprep.subr.bf16.mxu0 %v8156_v30  ;;  %v9609_v30 = vld [vmem:[#allocation2 + $0x90] ss:$24 sps:$4 sm:$0xff]  }
 0x17f   : > { %3067 = vmatprep.mubr.bf16.mxu1 %v9464_v58  ;;  %7602 = vmatpush3.bf16.msra.mxu1 %v8165_v31  ;;  %v8233_v31 = vld [vmem:[%s10802_s3 + $0x2f0] ss:$12 sps:$4 sm:$0xff]  }
 0x180   : > { %7603 = vmatprep.subr.bf16.mxu1 %v8172_v32  ;;  %v9615_v32 = vld [vmem:[#allocation2 + $0xc4] ss:$24 sps:$4 sm:$0xff]  }
 0x181   : > { %2797 = vmatpush1.bf16.msra.mxu0 %v8154_v25  ;;  %v8216_v25 = vld [vmem:[%s10802_s3 + $0x78] ss:$12 sps:$4 sm:$0xff]  }
 0x182   : > { %2798 = vmatprep.subr.bf16.mxu0 %v8161_v2  ;;  %v8247_v2 = vld [vmem:[%s10802_s3 + $0x3c8] ss:$12 sps:$4 sm:$0xff]  }
 0x183   : > { %7604 = vmatpush3.bf16.msra.mxu1 %v8173_v36  ;;  %v8221_v36 = vld [vmem:[%s10802_s3 + $0x90] ss:$12 sps:$4 sm:$0xff]  }
 0x184   : > { %7635 = vmatprep.subr.bf16.mxu1 %v8186_v37  ;;  %v8232_v37 = vld [vmem:[%s10802_s3 + $0xac] ss:$12 sps:$4 sm:$0xff]  }
 0x185   : > { %2799 = vmatpush1.bf16.msra.mxu0 %v8159_v39  ;;  %v9638_v39 = vld [vmem:[#allocation2 + $0xc0] ss:$24 sps:$4 sm:$0xff]  }
 0x186   : > { %3068 = vmatmul.mubr.bf16.gmra.mrb[96].mxu1 %v9490_v44  ;;  %2800 = vmatprep.subr.bf16.mxu0 %v8171_v46  ;;  %v9641_v46 = vld [vmem:[#allocation2 + $0xc] ss:$24 sps:$4 sm:$0xff]  }
 0x187   : > { %4275 = vmatprep.mubr.bf16.mxu1 %v9495_v50 }
 0x189   : > { %2801 = vmatpush1.bf16.msra.mxu0 %v8169_v51  ;;  %v8230_v51 = vld [vmem:[%s10802_s3 + $0xa8] ss:$12 sps:$4 sm:$0xff]  }
 0x18a   : > { %2802 = vmatprep.subr.bf16.mxu0 %v8176_v45  ;;  %v8237_v45 = vld [vmem:[%s10802_s3 + $0xc4] ss:$12 sps:$4 sm:$0xff]  }
 0x18d   : > { %2803 = vmatpush1.bf16.msra.mxu0 %v8174_v52  ;;  %v8249_v52 = vld [vmem:[%s10802_s3 + $0x308] ss:$12 sps:$4 sm:$0xff]  }
 0x18e   : > { %4276 = vmatmul.mubr.bf16.vlgmr.msra.gmra.mrb[100].mxu1 %v9511_v3  ;;  %2804 = vmatprep.subr.bf16.mxu0 %v8181_v53  ;;  %v9660_v53 = vld [vmem:[#allocation2 + $0x8] ss:$24 sps:$4 sm:$0xff]  }
 0x18f   : > { %4283 = vmatprep.mubr.bf16.mxu1 %v9516_v57  ;;  %7636 = vmatpush3.bf16.msra.mxu1 %v8189_v47  ;;  %v8253_v47 = vld [vmem:[%s10802_s3 + $0x3e0] ss:$12 sps:$4 sm:$0xff]  }
 0x190   : > { %7637 = vmatprep.subr.bf16.mxu1 %v8193_v59  ;;  %v9667_v59 = vld [vmem:[#allocation2 + $0x3c] ss:$24 sps:$4 sm:$0xff]  }
 0x191   : > { %2805 = vmatpush1.bf16.msra.mxu0 %v8179_v61  ;;  %v8240_v61 = vld [vmem:[%s10802_s3 + $0xd8] ss:$12 sps:$4 sm:$0xff]  }
 0x192   : > { %3994 = vmatprep.subr.bf16.mxu0 %v8184_v42  ;;  %v8259_v42 = vld [vmem:[%s10802_s3 + $0x3f8] ss:$12 sps:$4 sm:$0xff]  }
 0x193   : > { %7638 = vmatpush3.bf16.msra.mxu1 %v8194_v63  ;;  %v8243_v63 = vld [vmem:[%s10802_s3 + $0xf0] ss:$12 sps:$4 sm:$0xff]  }
 0x194   : > { %2807 = vmatmul.mubr.bf16.vlgmr.msra.gmra.mrb[40].mxu0 %v9364_v62  ;;  %7639 = vmatprep.subr.bf16.mxu1 %v8199_v48  ;;  %v8197_v62 = vld [vmem:[%s10802_s3 + $0x34] ss:$12 sps:$4 sm:$0xff]   ;;  %v1258_v48 = vld [vmem:[#allocation2 + $0x68] sm:$0xff] }
 0x195   : > { %2816 = vmatprep.mubr.bf16.mxu0 %v9359_v60  ;;  %3995 = vmatpush1.bf16.msra.mxu0 %v8182_v1  ;;  %v8207_v60 = vld [vmem:[%s10802_s3 + $0x1d0] ss:$12 sps:$4 sm:$0xff]   ;;  %v8252_v1 = vld [vmem:[%s10802_s3 + $0x10c] ss:$12 sps:$4 sm:$0xff]  }
 0x196   : > { %4284 = vmatmul.mubr.bf16.gmra.mrb[104].mxu1 %v9545_v11  ;;  %3996 = vmatprep.subr.bf16.mxu0 %v8192_v4  ;;  %v8261_v4 = vld [vmem:[%s10802_s3 + $0x338] ss:$12 sps:$4 sm:$0xff]  }
 0x197   : > { %4291 = vmatprep.mubr.bf16.mxu1 %v9551_v0  ;;  %7640 = vmatpush3.bf16.msra.mxu1 %v8202_v5  ;;  %v9692_v5 = vld [vmem:[#allocation2 + $0x38] ss:$24 sps:$4 sm:$0xff]  }
 0x198   : > { %7641 = vmatprep.subr.bf16.mxu1 %v8206_v12  ;;  %v8265_v12 = vld [vmem:[%s10802_s3 + $0x410] ss:$12 sps:$4 sm:$0xff]  }
 0x199   : > { %3997 = vmatpush1.bf16.msra.mxu0 %v8190_v13  ;;  %v9698_v13 = vcombine.high %v1258_v48, %v9208_v26 }
 0x19a   : > { %3998 = vmatprep.subr.bf16.mxu0 %v8197_v62  ;;  %v8250_v62 = vld [vmem:[%s10802_s3 + $0x108] ss:$12 sps:$4 sm:$0xff]  }
 0x19b   : > { %7642 = vmatpush3.bf16.msra.mxu1 %v8207_v60  ;;  %v8257_v60 = vld [vmem:[%s10802_s3 + $0x124] ss:$12 sps:$4 sm:$0xff]  }
 0x19c   : > { %2817 = vmatmul.mubr.bf16.gmra.mrb[44].mxu0 %v9390_v9  ;;  %7643 = vmatprep.subr.bf16.mxu1 %v8212_v14  ;;  %v8210_v9 = vld [vmem:[%s10802_s3 + $0x64] ss:$12 sps:$4 sm:$0xff]  }
 0x19d   : > { %2826 = vmatprep.mubr.bf16.mxu0 %v9394_v10  ;;  %3999 = vmatpush1.bf16.msra.mxu0 %v8195_v16  ;;  %v8220_v10 = vld [vmem:[%s10802_s3 + $0x200] ss:$12 sps:$4 sm:$0xff]   ;;  %v8266_v14 = vld [vmem:[%s10802_s3 + $0x350] ss:$12 sps:$4 sm:$0xff]   ;;  %v8271_v16 = vld [vmem:[%s10802_s3 + $0x428] ss:$12 sps:$4 sm:$0xff]  }
 0x19e   : > { %4292 = vmatmul.mubr.bf16.gmra.mrb[108].mxu1 %v9577_v21  ;;  %4000 = vmatprep.subr.bf16.mxu0 %v8205_v17  ;;  %v8255_v17 = vld [vmem:[%s10802_s3 + $0x120] ss:$12 sps:$4 sm:$0xff]  }
 0x19f   : > { %4299 = vmatprep.mubr.bf16.mxu1 %v9583_v43  ;;  %7644 = vmatpush3.bf16.msra.mxu1 %v8215_v18  ;;  %v1264_v18 = vld [vmem:[#allocation2 + $0x98] sm:$0xff] }
 0x1a0   : > { %7645 = vmatprep.subr.bf16.mxu1 %v8219_v15  ;;  %v8264_v15 = vld [vmem:[%s10802_s3 + $0x13c] ss:$12 sps:$4 sm:$0xff]  }
 0x1a1   : > { %4001 = vmatpush1.bf16.msra.mxu0 %v8203_v22  ;;  %v8273_v22 = vld [vmem:[%s10802_s3 + $0x368] ss:$12 sps:$4 sm:$0xff]  }
 0x1a2   : > { %4002 = vmatprep.subr.bf16.mxu0 %v8210_v9  ;;  %v9724_v9 = vcombine.low %v1258_v48, %v9208_v26  ;;  %v8269_v26 = vld [vmem:[%s10802_s3 + $0x154] ss:$12 sps:$4 sm:$0xff]   ;;  %v8302_v48 = vld [vmem:[%s10802_s3 + $0x1e4] ss:$12 sps:$4 sm:$0xff]  }
 0x1a3   : > { %7646 = vmatpush3.bf16.msra.mxu1 %v8220_v10  ;;  %v8277_v10 = vld [vmem:[%s10802_s3 + $0x440] ss:$12 sps:$4 sm:$0xff]  }
 0x1a4   : > { %2827 = vmatmul.mubr.bf16.gmra.mrb[48].mxu0 %v9425_v19  ;;  %7647 = vmatprep.subr.bf16.mxu1 %v8225_v23  ;;  %v8223_v19 = vld [vmem:[%s10802_s3 + $0x94] ss:$12 sps:$4 sm:$0xff]   ;;  %v9730_v23 = vcombine.high %v1264_v18, %v9257_v8 }
 0x1a5   : > { %2836 = vmatprep.mubr.bf16.mxu0 %v9429_v20  ;;  %4003 = vmatpush1.bf16.msra.mxu0 %v8208_v24  ;;  %v8234_v20 = vld [vmem:[%s10802_s3 + $0x230] ss:$12 sps:$4 sm:$0xff]   ;;  %v8262_v24 = vld [vmem:[%s10802_s3 + $0x138] ss:$12 sps:$4 sm:$0xff]  }
 0x1a6   : > { %4300 = vmatmul.mubr.bf16.gmra.mrb[112].mxu1 %v9609_v30  ;;  %4004 = vmatprep.subr.bf16.mxu0 %v8218_v27  ;;  %v8278_v27 = vld [vmem:[%s10802_s3 + $0x380] ss:$12 sps:$4 sm:$0xff]  }
 0x1a7   : > { %4307 = vmatprep.mubr.bf16.mxu1 %v9615_v32  ;;  %7648 = vmatpush3.bf16.msra.mxu1 %v8226_v28  ;;  %v8283_v28 = vld [vmem:[%s10802_s3 + $0x458] ss:$12 sps:$4 sm:$0xff]  }
 0x1a8   : > { %7649 = vmatprep.subr.bf16.mxu1 %v8233_v31  ;;  %v8267_v31 = vld [vmem:[%s10802_s3 + $0x150] ss:$12 sps:$4 sm:$0xff]  }
 0x1a9   : > { %4005 = vmatpush1.bf16.msra.mxu0 %v8216_v25  ;;  %v1270_v25 = vld [vmem:[#allocation2 + $0xc8] sm:$0xff] }
 0x1aa   : > { %4006 = vmatprep.subr.bf16.mxu0 %v8223_v19  ;;  %v8276_v19 = vld [vmem:[%s10802_s3 + $0x16c] ss:$12 sps:$4 sm:$0xff]  }
 0x1ab   : > { %7650 = vmatpush3.bf16.msra.mxu1 %v8234_v20  ;;  %v8284_v20 = vld [vmem:[%s10802_s3 + $0x398] ss:$12 sps:$4 sm:$0xff]  }
 0x1ac   : > { %2837 = vmatmul.mubr.bf16.gmra.mrb[52].mxu0 %v9458_v29  ;;  %7681 = vmatprep.subr.bf16.mxu1 %v8247_v2  ;;  %v8235_v29 = vld [vmem:[%s10802_s3 + $0xc0] ss:$12 sps:$4 sm:$0xff]   ;;  %v9756_v2 = vcombine.low %v1264_v18, %v9257_v8  ;;  %v8281_v8 = vld [vmem:[%s10802_s3 + $0x184] ss:$12 sps:$4 sm:$0xff]   ;;  %v8313_v18 = vld [vmem:[%s10802_s3 + $0x228] ss:$12 sps:$4 sm:$0xff]  }
 0x1ad   : > { %2846 = vmatprep.mubr.bf16.mxu0 %v9464_v58  ;;  %4007 = vmatpush1.bf16.msra.mxu0 %v8221_v36  ;;  %v8242_v58 = vld [vmem:[%s10802_s3 + $0xdc] ss:$12 sps:$4 sm:$0xff]  }
 0x1ae   : > { %4308 = vmatmul.mubr.bf16.gmra.mrb[116].mxu1 %v9638_v39  ;;  %4008 = vmatprep.subr.bf16.mxu0 %v8232_v37  ;;  %v8291_v36 = vld [vmem:[%s10802_s3 + $0x470] ss:$12 sps:$4 sm:$0xff]   ;;  %v9762_v37 = vcombine.high %v1270_v25, %v9307_v35 }
 0x1af   : > { %4348 = vmatprep.mubr.bf16.mxu1 %v9641_v46 }
 0x1b1   : > { %4009 = vmatpush1.bf16.msra.mxu0 %v8230_v51  ;;  %v8274_v51 = vld [vmem:[%s10802_s3 + $0x168] ss:$12 sps:$4 sm:$0xff]  }
 0x1b2   : > { %4010 = vmatprep.subr.bf16.mxu0 %v8237_v45  ;;  %v8292_v45 = vld [vmem:[%s10802_s3 + $0x3b0] ss:$12 sps:$4 sm:$0xff]  }
 0x1b4   : > { %2847 = vmatmul.mubr.bf16.gmra.mrb[56].mxu0 %v9490_v44  ;;  %v8245_v44 = vld [vmem:[%s10802_s3 + $0xf4] ss:$12 sps:$4 sm:$0xff]  }
 0x1b5   : > { %4011 = vmatpush1.bf16.msra.mxu0 %v8235_v29  ;;  %4026 = vmatprep.mubr.bf16.mxu0 %v9495_v50  ;;  %v8254_v50 = vld [vmem:[%s10802_s3 + $0x320] ss:$12 sps:$4 sm:$0xff]  }
 0x1b6   : > { %4349 = vmatmul.mubr.bf16.vlgmr.msra.gmra.mrb[120].mxu1 %v9660_v53  ;;  %4012 = vmatprep.subr.bf16.mxu0 %v8242_v58  ;;  %v8279_v29 = vld [vmem:[%s10802_s3 + $0x180] ss:$12 sps:$4 sm:$0xff]   ;;  %v8290_v58 = vld [vmem:[%s10802_s3 + $0x19c] ss:$12 sps:$4 sm:$0xff]  }
 0x1b7   : > { %4356 = vmatprep.mubr.bf16.mxu1 %v9667_v59  ;;  %7682 = vmatpush3.bf16.msra.mxu1 %v8249_v52  ;;  %v9783_v52 = vcombine.low %v1270_v25, %v9307_v35  ;;  %v8293_v35 = vld [vmem:[%s10802_s3 + $0x1b0] ss:$12 sps:$4 sm:$0xff]   ;;  %v8326_v25 = vld [vmem:[%s10802_s3 + $0x274] ss:$12 sps:$4 sm:$0xff]  }
 0x1b8   : > { %7683 = vmatprep.subr.bf16.mxu1 %v8253_v47  ;;  %v9786_v47 = vld [vmem:[#allocation2 + $0x14] ss:$24 sps:$4 sm:$0xff]  }
 0x1b9   : > { %4013 = vmatpush1.bf16.msra.mxu0 %v8240_v61  ;;  %v8288_v61 = vld [vmem:[%s10802_s3 + $0x198] ss:$12 sps:$4 sm:$0xff]  }
 0x1ba   : > { %4014 = vmatprep.subr.bf16.mxu0 %v8245_v44  ;;  %v8295_v44 = vld [vmem:[%s10802_s3 + $0x1b4] ss:$12 sps:$4 sm:$0xff]  }
 0x1bb   : > { %7684 = vmatpush3.bf16.msra.mxu1 %v8254_v50  ;;  %v9802_v50 = vld [vmem:[#allocation2 + $0x10] ss:$24 sps:$4 sm:$0xff]  }
 0x1bc   : > { %7685 = vmatprep.subr.bf16.mxu1 %v8259_v42 }
 0x1bd   : > { %4015 = vmatpush1.bf16.msra.mxu0 %v8243_v63  ;;  %v8297_v63 = vld [vmem:[%s10802_s3 + $0x1c8] ss:$12 sps:$4 sm:$0xff]  }
 0x1be   : > { %4357 = vmatmul.mubr.bf16.gmra.mrb[124].mxu1 %v9692_v5  ;;  %4016 = vmatprep.subr.bf16.mxu0 %v8252_v1 }
 0x1bf   : > { %4364 = vmatprep.mubr.bf16.mxu1 %v9698_v13  ;;  %7686 = vmatpush3.bf16.msra.mxu1 %v8261_v4  ;;  %v8305_v4 = vld [vmem:[%s10802_s3 + $0x1f8] ss:$12 sps:$4 sm:$0xff]  }
 0x1c0   : > { %7687 = vmatprep.subr.bf16.mxu1 %v8265_v12 }
 0x1c1   : > { %4017 = vmatpush1.bf16.msra.mxu0 %v8250_v62  ;;  %v8310_v62 = vld [vmem:[%s10802_s3 + $0x214] ss:$12 sps:$4 sm:$0xff]  }
 0x1c2   : > { %4018 = vmatprep.subr.bf16.mxu0 %v8257_v60 }
 0x1c3   : > { %7688 = vmatpush3.bf16.msra.mxu1 %v8266_v14  ;;  %v8308_v14 = vld [vmem:[%s10802_s3 + $0x210] ss:$12 sps:$4 sm:$0xff]  }
 0x1c4   : > { %7689 = vmatprep.subr.bf16.mxu1 %v8271_v16 }
 0x1c5   : > { %4019 = vmatpush1.bf16.msra.mxu0 %v8255_v17  ;;  %v8315_v17 = vld [vmem:[%s10802_s3 + $0x22c] ss:$12 sps:$4 sm:$0xff]  }
 0x1c6   : > { %4365 = vmatmul.mubr.bf16.gmra.mrb[128].mxu1 %v9724_v9  ;;  %4020 = vmatprep.subr.bf16.mxu0 %v8264_v15 }
 0x1c7   : > { %4372 = vmatprep.mubr.bf16.mxu1 %v9730_v23  ;;  %7690 = vmatpush3.bf16.msra.mxu1 %v8273_v22  ;;  %v8318_v22 = vld [vmem:[%s10802_s3 + $0x244] ss:$12 sps:$4 sm:$0xff]  }
 0x1c8   : > { %7691 = vmatprep.subr.bf16.mxu1 %v8277_v10 }
 0x1c9   : > { %4021 = vmatpush1.bf16.msra.mxu0 %v8262_v24 }
 0x1ca   : > { %4022 = vmatprep.subr.bf16.mxu0 %v8269_v26  ;;  %v8316_v26 = vld [vmem:[%s10802_s3 + $0x240] ss:$12 sps:$4 sm:$0xff]  }
 0x1cb   : > { %7692 = vmatpush3.bf16.msra.mxu1 %v8278_v27 }
 0x1cc   : > { %7693 = vmatprep.subr.bf16.mxu1 %v8283_v28  ;;  %v8323_v28 = vld [vmem:[%s10802_s3 + $0x25c] ss:$12 sps:$4 sm:$0xff]  }
 0x1cd   : > { %4023 = vmatpush1.bf16.msra.mxu0 %v8267_v31  ;;  %v8321_v31 = vld [vmem:[%s10802_s3 + $0x258] ss:$12 sps:$4 sm:$0xff]  }
 0x1ce   : > { %4373 = vmatmul.mubr.bf16.gmra.mrb[132].mxu1 %v9756_v2  ;;  %4024 = vmatprep.subr.bf16.mxu0 %v8276_v19 }
 0x1cf   : > { %4380 = vmatprep.mubr.bf16.mxu1 %v9762_v37  ;;  %7694 = vmatpush3.bf16.msra.mxu1 %v8284_v20 }
 0x1d0   : > { %7695 = vmatprep.subr.bf16.mxu1 %v8291_v36 }
 0x1d1   : > { %4025 = vmatpush1.bf16.msra.mxu0 %v8274_v51 }
 0x1d2   : > { %4077 = vmatprep.subr.bf16.mxu0 %v8281_v8  ;;  %v8330_v8 = vld [vmem:[%s10802_s3 + $0x28c] ss:$12 sps:$4 sm:$0xff]  }
 0x1d3   : > { %7696 = vmatpush3.bf16.msra.mxu1 %v8292_v45 }
 0x1d4   : > { %4027 = vmatmul.mubr.bf16.vlgmr.msra.gmra.mrb[40].mxu0 %v9511_v3  ;;  %v1253_v3 = vld [vmem:[#allocation2 + $0x40] sm:$0xff] }
 0x1d5   : > { %4036 = vmatprep.mubr.bf16.mxu0 %v9516_v57  ;;  %4078 = vmatpush1.bf16.msra.mxu0 %v8279_v29  ;;  %v8299_v57 = vld [vmem:[%s10802_s3 + $0x1cc] ss:$12 sps:$4 sm:$0xff]   ;;  %v9807_v42 = vcombine.high %v1253_v3, %v9349_v56  ;;  %v9825_v1 = vcombine.low %v1253_v3, %v9349_v56  ;;  %v8328_v29 = vld [vmem:[%s10802_s3 + $0x288] ss:$12 sps:$4 sm:$0xff]  }
 0x1d6   : > { %4381 = vmatmul.mubr.bf16.gmra.mrb[136].mxu1 %v9783_v52  ;;  %4079 = vmatprep.subr.bf16.mxu0 %v8290_v58  ;;  %v8333_v58 = vld [vmem:[%s10802_s3 + $0x2a4] ss:$12 sps:$4 sm:$0xff]  }
 0x1d7   : > { %4421 = vmatprep.mubr.bf16.mxu1 %v9786_v47 }
 0x1d9   : > { %4080 = vmatpush1.bf16.msra.mxu0 %v8288_v61 }
 0x1da   : > { %4081 = vmatprep.subr.bf16.mxu0 %v8295_v44 }
 0x1dc   : > { %4037 = vmatmul.mubr.bf16.gmra.mrb[44].mxu0 %v9545_v11  ;;  %v8300_v11 = vld [vmem:[%s10802_s3 + $0x1e0] ss:$12 sps:$4 sm:$0xff]  }
 0x1dd   : > { %4046 = vmatprep.mubr.bf16.mxu0 %v9551_v0  ;;  %4082 = vmatpush1.bf16.msra.mxu0 %v8293_v35  ;;  %v8307_v0 = vld [vmem:[%s10802_s3 + $0x1fc] ss:$12 sps:$4 sm:$0xff]  }
 0x1de   : > { %4422 = vmatmul.mubr.bf16.vlgmr.msra.gmra.mrb[140].mxu1 %v9802_v50  ;;  %4083 = vmatprep.subr.bf16.mxu0 %v8299_v57  ;;  %v8331_v57 = vld [vmem:[%s10802_s3 + $0x2a0] ss:$12 sps:$4 sm:$0xff]  }
 0x1df   : > { %4429 = vmatprep.mubr.bf16.mxu1 %v9807_v42 }
 0x1e1   : > { %4084 = vmatpush1.bf16.msra.mxu0 %v8297_v63 }
 0x1e2   : > { %4085 = vmatprep.subr.bf16.mxu0 %v8302_v48  ;;  %v8336_v48 = vld [vmem:[%s10802_s3 + $0x2bc] ss:$12 sps:$4 sm:$0xff]  }
 0x1e4   : > { %4047 = vmatmul.mubr.bf16.gmra.mrb[48].mxu0 %v9577_v21 }
 0x1e5   : > { %4056 = vmatprep.mubr.bf16.mxu0 %v9583_v43  ;;  %4086 = vmatpush1.bf16.msra.mxu0 %v8300_v11  ;;  %v7467_v12 = vpop.f32.mrb[40].mxu1 }
 0x1e6   : > { %4430 = vmatmul.mubr.bf16.gmra.mrb[144].mxu1 %v9825_v1  ;;  %4087 = vmatprep.subr.bf16.mxu0 %v8307_v0  ;;  %v7468_v21 = vpop.f32.mrb[41].mxu1  ;;  %v8334_v0 = vld [vmem:[%s10802_s3 + $0x2b8] ss:$12 sps:$4 sm:$0xff]  }
 0x1e7   : > { %4437 = vmatprep.mubr.bf16.mxu1 %v9251_v6  ;;  %v9836_v56 = vadd.f32 %v7468_v21, %v7467_v12  ;;  %v7470_v60 = vpop.f32.mrb[42].mxu1  ;;  %v8339_v12 = vld [vmem:[%s10802_s3 + $0x2d4] ss:$12 sps:$4 sm:$0xff]  }
 0x1e8   : > { %v7471_v43 = vpop.f32.mrb[43].mxu1 }
 0x1e9   : > { %4088 = vmatpush1.bf16.msra.mxu0 %v8305_v4  ;;  %v9841_v16 = vadd.f32 %v7471_v43, %v7470_v60  ;;  %v8337_v43 = vld [vmem:[%s10802_s3 + $0x2d0] ss:$12 sps:$4 sm:$0xff]  }
 0x1ea   : > { %4089 = vmatprep.subr.bf16.mxu0 %v8310_v62 }
 0x1ec   : > { %4057 = vmatmul.mubr.bf16.gmra.mrb[52].mxu0 %v9609_v30 }
 0x1ed   : > { %4066 = vmatprep.mubr.bf16.mxu0 %v9615_v32  ;;  %4090 = vmatpush1.bf16.msra.mxu0 %v8308_v14  ;;  %v7473_v15 = vpop.f32.mrb[44].mxu1 }
 0x1ee   : > { %4438 = vmatmul.mubr.bf16.gmra.mrb[148].mxu1 %v9255_v7  ;;  %4091 = vmatprep.subr.bf16.mxu0 %v8315_v17  ;;  %v7474_v10 = vpop.f32.mrb[45].mxu1 }
 0x1ef   : > { %4445 = vmatprep.mubr.bf16.mxu1 %v9301_v33  ;;  %v9856_v24 = vadd.f32 %v7474_v10, %v7473_v15  ;;  %v7476_v30 = vpop.f32.mrb[46].mxu1  ;;  %v8340_v15 = vld [vmem:[%s10802_s3 + $0x2e8] ss:$12 sps:$4 sm:$0xff]  }
 0x1f0   : > { %v7477_v32 = vpop.f32.mrb[47].mxu1 }
 0x1f1   : > { %4092 = vmatpush1.bf16.msra.mxu0 %v8313_v18  ;;  %v9861_v27 = vadd.f32 %v7477_v32, %v7476_v30  ;;  %v8342_v18 = vld [vmem:[%s10802_s3 + $0x2ec] ss:$12 sps:$4 sm:$0xff]  }
 0x1f2   : > { %4093 = vmatprep.subr.bf16.mxu0 %v8318_v22  ;;  %v8345_v22 = vld [vmem:[%s10802_s3 + $0x304] ss:$12 sps:$4 sm:$0xff]  }
 0x1f4   : > { %4067 = vmatmul.mubr.bf16.gmra.mrb[56].mxu0 %v9638_v39 }
 0x1f5   : > { %4094 = vmatpush1.bf16.msra.mxu0 %v8316_v26  ;;  %4109 = vmatprep.mubr.bf16.mxu0 %v9641_v46  ;;  %v7479_v19 = vpop.f32.mrb[48].mxu1  ;;  %v8324_v46 = vld [vmem:[%s10802_s3 + $0x270] ss:$12 sps:$4 sm:$0xff]  }
 0x1f6   : > { %4446 = vmatmul.mubr.bf16.gmra.mrb[152].mxu1 %v9305_v34  ;;  %4095 = vmatprep.subr.bf16.mxu0 %v8323_v28  ;;  %v7480_v20 = vpop.f32.mrb[49].mxu1  ;;  %v8343_v28 = vld [vmem:[%s10802_s3 + $0x300] ss:$12 sps:$4 sm:$0xff]  }
 0x1f7   : > { %4453 = vmatprep.mubr.bf16.mxu1 %v9340_v54  ;;  %v9876_v36 = vadd.f32 %v7480_v20, %v7479_v19  ;;  %v7482_v39 = vpop.f32.mrb[50].mxu1 }
 0x1f8   : > { %v7483_v51 = vpop.f32.mrb[51].mxu1 }
 0x1f9   : > { %4096 = vmatpush1.bf16.msra.mxu0 %v8321_v31  ;;  %v9884_v45 = vadd.f32 %v7483_v51, %v7482_v39  ;;  %v8351_v51 = vld [vmem:[%s10802_s3 + $0x334] ss:$12 sps:$4 sm:$0xff]  }
 0x1fa   : > { %4097 = vmatprep.subr.bf16.mxu0 %v8326_v25  ;;  %v8348_v25 = vld [vmem:[%s10802_s3 + $0x31c] ss:$12 sps:$4 sm:$0xff]  }
 0x1fd   : > { %4098 = vmatpush1.bf16.msra.mxu0 %v8324_v46  ;;  %v7485_v61 = vpop.f32.mrb[52].mxu1  ;;  %v8346_v46 = vld [vmem:[%s10802_s3 + $0x318] ss:$12 sps:$4 sm:$0xff]  }
 0x1fe   : > { %4454 = vmatmul.mubr.bf16.gmra.mrb[156].mxu1 %v9344_v55  ;;  %4099 = vmatprep.subr.bf16.mxu0 %v8330_v8  ;;  %v7486_v44 = vpop.f32.mrb[53].mxu1 }
 0x1ff   : > { %v9893_v35 = vadd.f32 %v7486_v44, %v7485_v61  ;;  %v7488_v3 = vpop.f32.mrb[54].mxu1 }
 0x200   : > { %v7489_v63 = vpop.f32.mrb[55].mxu1 }
 0x201   : > { %4100 = vmatpush1.bf16.msra.mxu0 %v8328_v29  ;;  %v9901_v11 = vadd.f32 %v7489_v63, %v7488_v3  ;;  %v8357_v63 = vld [vmem:[%s10802_s3 + $0x364] ss:$12 sps:$4 sm:$0xff]  }
 0x202   : > { %4101 = vmatprep.subr.bf16.mxu0 %v8333_v58  ;;  %v8354_v58 = vld [vmem:[%s10802_s3 + $0x34c] ss:$12 sps:$4 sm:$0xff]  }
 0x205   : > { %4102 = vmatpush1.bf16.msra.mxu0 %v8331_v57  ;;  %v7491_v4 = vpop.f32.mrb[56].mxu1  ;;  %v8352_v57 = vld [vmem:[%s10802_s3 + $0x348] ss:$12 sps:$4 sm:$0xff]  }
 0x206   : > { %4103 = vmatprep.subr.bf16.mxu0 %v8336_v48  ;;  %v7492_v62 = vpop.f32.mrb[57].mxu1 }
 0x207   : > { %v9909_v21 = vadd.f32 %v7492_v62, %v7491_v4  ;;  %v7494_v60 = vpop.f32.mrb[58].mxu1 }
 0x208   : > { %v7495_v14 = vpop.f32.mrb[59].mxu1 }
 0x209   : > { %4104 = vmatpush1.bf16.msra.mxu0 %v8334_v0  ;;  %v9914_v17 = vadd.f32 %v7495_v14, %v7494_v60  ;;  %v8358_v60 = vld [vmem:[%s10802_s3 + $0x378] ss:$12 sps:$4 sm:$0xff]   ;;  %v8363_v14 = vld [vmem:[%s10802_s3 + $0x394] ss:$12 sps:$4 sm:$0xff]  }
 0x20a   : > { %4105 = vmatprep.subr.bf16.mxu0 %v8339_v12 }
 0x20d   : > { %4106 = vmatpush1.bf16.msra.mxu0 %v8337_v43 }
 0x20e   : > { %4107 = vmatprep.subr.bf16.mxu0 %v8342_v18 }
 0x20f   : > { %v7513_v10 = vpop.f32.mrb[60].mxu1 }
 0x210   : > { %v7514_v30 = vpop.f32.mrb[61].mxu1 }
 0x211   : > { %v7515_v32 = vadd.f32 %v7514_v30, %v7513_v10  ;;  %4108 = vmatpush1.bf16.msra.mxu0 %v8340_v15  ;;  %v7516_v26 = vpop.f32.mrb[62].mxu1 }
 0x212   : > { %v7517_v31 = vpop.f32.mrb[63].mxu1  ;;  %4160 = vmatprep.subr.bf16.mxu0 %v8345_v22 }
 0x213   : > { %v9932_v19 = vadd.f32 %v7515_v32, %v9836_v56  ;;  %v7518_v20 = vadd.f32 %v7517_v31, %v7516_v26  ;;  %v8364_v32 = vld [vmem:[%s10802_s3 + $0x3a8] ss:$12 sps:$4 sm:$0xff]  }
 0x214   : > { %4110 = vmatmul.mubr.bf16.vlgmr.msra.gmra.mrb[40].mxu0 %v9660_v53 }
 0x215   : > { %v9936_v39 = vadd.f32 %v7518_v20, %v9841_v16  ;;  %4119 = vmatprep.mubr.bf16.mxu0 %v9667_v59  ;;  %4161 = vmatpush1.bf16.msra.mxu0 %v8343_v28  ;;  %v8349_v16 = vld [vmem:[%s10802_s3 + $0x330] ss:$12 sps:$4 sm:$0xff]  }
 0x216   : > { %4162 = vmatprep.subr.bf16.mxu0 %v8348_v25  ;;  %v8369_v28 = vld [vmem:[%s10802_s3 + $0x3c4] ss:$12 sps:$4 sm:$0xff]  }
 0x217   : > { %v7519_v56 = vpop.f32.mrb[64].mxu1 }
 0x218   : > { %v7520_v8 = vpop.f32.mrb[65].mxu1 }
 0x219   : > { %v7521_v29 = vadd.f32 %v7520_v8, %v7519_v56  ;;  %4163 = vmatpush1.bf16.msra.mxu0 %v8346_v46  ;;  %v7522_v53 = vpop.f32.mrb[66].mxu1  ;;  %v8370_v56 = vld [vmem:[%s10802_s3 + $0x3d8] ss:$12 sps:$4 sm:$0xff]  }
 0x21a   : > { %v7523_v59 = vpop.f32.mrb[67].mxu1  ;;  %4164 = vmatprep.subr.bf16.mxu0 %v8351_v51 }
 0x21b   : > { %v9952_v61 = vadd.f32 %v7521_v29, %v9856_v24  ;;  %v7524_v44 = vadd.f32 %v7523_v59, %v7522_v53  ;;  %v8375_v29 = vld [vmem:[%s10802_s3 + $0x3f4] ss:$12 sps:$4 sm:$0xff]  }
 0x21c   : > { %4120 = vmatmul.mubr.bf16.gmra.mrb[44].mxu0 %v9692_v5  ;;  %v8355_v5 = vld [vmem:[%s10802_s3 + $0x360] ss:$12 sps:$4 sm:$0xff]  }
 0x21d   : > { %v9956_v3 = vadd.f32 %v7524_v44, %v9861_v27  ;;  %4129 = vmatprep.mubr.bf16.mxu0 %v9698_v13  ;;  %4165 = vmatpush1.bf16.msra.mxu0 %v8349_v16  ;;  %v8360_v13 = vld [vmem:[%s10802_s3 + $0x37c] ss:$12 sps:$4 sm:$0xff]  }
 0x21e   : > { %4166 = vmatprep.subr.bf16.mxu0 %v8354_v58 }
 0x221   : > { %v7525_v24 = vpop.f32.mrb[68].mxu1  ;;  %4167 = vmatpush1.bf16.msra.mxu0 %v8352_v57  ;;  %v8376_v57 = vld [vmem:[%s10802_s3 + $0x408] ss:$12 sps:$4 sm:$0xff]  }
 0x222   : > { %v7526_v48 = vpop.f32.mrb[69].mxu1  ;;  %4168 = vmatprep.subr.bf16.mxu0 %v8357_v63 }
 0x223   : > { %v7527_v27 = vadd.f32 %v7526_v48, %v7525_v24  ;;  %v7528_v0 = vpop.f32.mrb[70].mxu1  ;;  %v8381_v24 = vld [vmem:[%s10802_s3 + $0x424] ss:$12 sps:$4 sm:$0xff]  }
 0x224   : > { %v7529_v4 = vpop.f32.mrb[71].mxu1  ;;  %4130 = vmatmul.mubr.bf16.gmra.mrb[48].mxu0 %v9724_v9  ;;  %v8361_v9 = vld [vmem:[%s10802_s3 + $0x390] ss:$12 sps:$4 sm:$0xff]  }
 0x225   : > { %v9972_v12 = vadd.f32 %v7527_v27, %v9876_v36  ;;  %v7530_v62 = vadd.f32 %v7529_v4, %v7528_v0  ;;  %4139 = vmatprep.mubr.bf16.mxu0 %v9730_v23  ;;  %4169 = vmatpush1.bf16.msra.mxu0 %v8355_v5 }
 0x226   : > { %4170 = vmatprep.subr.bf16.mxu0 %v8360_v13 }
 0x227   : > { %v9980_v43 = vadd.f32 %v7530_v62, %v9884_v45  ;;  %v8366_v45 = vld [vmem:[%s10802_s3 + $0x3ac] ss:$12 sps:$4 sm:$0xff]  }
 0x229   : > { %v7531_v36 = vpop.f32.mrb[72].mxu1  ;;  %4171 = vmatpush1.bf16.msra.mxu0 %v8358_v60  ;;  %v8382_v60 = vld [vmem:[%s10802_s3 + $0x438] ss:$12 sps:$4 sm:$0xff]  }
 0x22a   : > { %v7532_v18 = vpop.f32.mrb[73].mxu1  ;;  %4172 = vmatprep.subr.bf16.mxu0 %v8363_v14 }
 0x22b   : > { %v7533_v23 = vadd.f32 %v7532_v18, %v7531_v36  ;;  %v7534_v15 = vpop.f32.mrb[74].mxu1  ;;  %v8387_v36 = vld [vmem:[%s10802_s3 + $0x454] ss:$12 sps:$4 sm:$0xff]  }
 0x22c   : > { %v7535_v22 = vpop.f32.mrb[75].mxu1  ;;  %4140 = vmatmul.mubr.bf16.gmra.mrb[52].mxu0 %v9756_v2  ;;  %v8367_v2 = vld [vmem:[%s10802_s3 + $0x3c0] ss:$12 sps:$4 sm:$0xff]  }
 0x22d   : > { %v9992_v10 = vadd.f32 %v7533_v23, %v9893_v35  ;;  %v7536_v30 = vadd.f32 %v7535_v22, %v7534_v15  ;;  %4149 = vmatprep.mubr.bf16.mxu0 %v9762_v37  ;;  %4173 = vmatpush1.bf16.msra.mxu0 %v8361_v9 }
 0x22e   : > { %4174 = vmatprep.subr.bf16.mxu0 %v8366_v45 }
 0x22f   : > { %v10000_v26 = vadd.f32 %v7536_v30, %v9901_v11  ;;  %v8372_v11 = vld [vmem:[%s10802_s3 + $0x3dc] ss:$12 sps:$4 sm:$0xff]  }
 0x231   : > { %v7537_v35 = vpop.f32.mrb[76].mxu1  ;;  %4175 = vmatpush1.bf16.msra.mxu0 %v8364_v32  ;;  %v8388_v32 = vld [vmem:[%s10802_s3 + $0x468] ss:$12 sps:$4 sm:$0xff]  }
 0x232   : > { %v7538_v31 = vpop.f32.mrb[77].mxu1  ;;  %4176 = vmatprep.subr.bf16.mxu0 %v8369_v28 }
 0x233   : > { %v7539_v37 = vadd.f32 %v7538_v31, %v7537_v35  ;;  %v7540_v25 = vpop.f32.mrb[78].mxu1 }
 0x234   : > { %v7541_v20 = vpop.f32.mrb[79].mxu1  ;;  %4150 = vmatmul.mubr.bf16.gmra.mrb[56].mxu0 %v9783_v52  ;;  %v8373_v52 = vld [vmem:[%s10802_s3 + $0x3f0] ss:$12 sps:$4 sm:$0xff]  }
 0x235   : > { %v10012_v46 = vadd.f32 %v7539_v37, %v9909_v21  ;;  %v7542_v51 = vadd.f32 %v7541_v20, %v7540_v25  ;;  %4177 = vmatpush1.bf16.msra.mxu0 %v8367_v2  ;;  %4192 = vmatprep.mubr.bf16.mxu0 %v9786_v47  ;;  %v10076_v25 = vld [vmem:[#allocation2 + $0xf0] sm:$0xff] }
 0x236   : > { %4178 = vmatprep.subr.bf16.mxu0 %v8372_v11 }
 0x237   : > { %v10020_v8 = vadd.f32 %v7542_v51, %v9914_v17  ;;  %v8378_v17 = vld [vmem:[%s10802_s3 + $0x40c] ss:$12 sps:$4 sm:$0xff]  }
 0x239   : > { %v7559_v21 = vpop.f32.mrb[80].mxu1  ;;  %4179 = vmatpush1.bf16.msra.mxu0 %v8370_v56 }
 0x23a   : > { %v7560_v53 = vpop.f32.mrb[81].mxu1  ;;  %4180 = vmatprep.subr.bf16.mxu0 %v8375_v29 }
 0x23b   : > { %v7561_v47 = vadd.f32 %v7560_v53, %v7559_v21  ;;  %v7562_v16 = vpop.f32.mrb[82].mxu1 }
 0x23c   : > { %v7563_v59 = vpop.f32.mrb[83].mxu1 }
 0x23d   : > { %v10032_v58 = vadd.f32 %v7561_v47, %v9932_v19  ;;  %v7564_v44 = vadd.f32 %v7563_v59, %v7562_v16  ;;  %4181 = vmatpush1.bf16.msra.mxu0 %v8373_v52  ;;  %v8379_v19 = vld [vmem:[%s10802_s3 + $0x420] ss:$12 sps:$4 sm:$0xff]   ;;  %v8394_v16 = vld [vmem:[%s10804_s5 + $0x10] ss:$8 sps:$4 sm:$0xff]  }
 0x23e   : > { %4182 = vmatprep.subr.bf16.mxu0 %v8378_v17  ;;  %v8391_v52 = vld [vmem:[%s10804_s5] ss:$8 sps:$4 sm:$0xff]  }
 0x23f   : > { %v10038_v63 = vadd.f32 %v7564_v44, %v9936_v39  ;;  %v8384_v39 = vld [vmem:[%s10802_s3 + $0x43c] ss:$12 sps:$4 sm:$0xff]  }
 0x241   : > { %v7565_v48 = vpop.f32.mrb[84].mxu1  ;;  %4183 = vmatpush1.bf16.msra.mxu0 %v8376_v57  ;;  %v8402_v57 = vld [vmem:[%s10804_s5 + $0x34] ss:$8 sps:$4 sm:$0xff]  }
 0x242   : > { %v7566_v5 = vpop.f32.mrb[85].mxu1  ;;  %4184 = vmatprep.subr.bf16.mxu0 %v8381_v24 }
 0x243   : > { %v7567_v27 = vadd.f32 %v7566_v5, %v7565_v48  ;;  %v7568_v0 = vpop.f32.mrb[86].mxu1 }
 0x244   : > { %v7569_v13 = vpop.f32.mrb[87].mxu1 }
 0x245   : > { %v10050_v4 = vadd.f32 %v7567_v27, %v9952_v61  ;;  %v7570_v62 = vadd.f32 %v7569_v13, %v7568_v0  ;;  %4185 = vmatpush1.bf16.msra.mxu0 %v8379_v19  ;;  %v8385_v61 = vld [vmem:[%s10802_s3 + $0x450] ss:$12 sps:$4 sm:$0xff]   ;;  %v8405_v27 = vld [vmem:[%s10804_s5 + $0x44] ss:$8 sps:$4 sm:$0xff]  }
 0x246   : > { %4186 = vmatprep.subr.bf16.mxu0 %v8384_v39  ;;  %v8400_v19 = vld [vmem:[%s10804_s5 + $0x30] ss:$8 sps:$4 sm:$0xff]   ;;  %v8408_v39 = vld [vmem:[%s10804_s5 + $0x54] ss:$8 sps:$4 sm:$0xff]  }
 0x247   : > { %v10056_v14 = vadd.f32 %v7570_v62, %v9956_v3  ;;  %v8390_v3 = vld [vmem:[%s10802_s3 + $0x46c] ss:$12 sps:$4 sm:$0xff]  }
 0x249   : > { %v7571_v18 = vpop.f32.mrb[88].mxu1  ;;  %4187 = vmatpush1.bf16.msra.mxu0 %v8382_v60 }
 0x24a   : > { %v7572_v9 = vpop.f32.mrb[89].mxu1  ;;  %4188 = vmatprep.subr.bf16.mxu0 %v8387_v36  ;;  %v8406_v36 = vld [vmem:[%s10804_s5 + $0x50] ss:$8 sps:$4 sm:$0xff]  }
 0x24b   : > { %v7573_v23 = vadd.f32 %v7572_v9, %v7571_v18  ;;  %v7574_v15 = vpop.f32.mrb[90].mxu1  ;;  %v8411_v9 = vld [vmem:[%s10804_s5 + $0x64] ss:$8 sps:$4 sm:$0xff]  }
 0x24c   : > { %v7575_v45 = vpop.f32.mrb[91].mxu1 }
 0x24d   : > { %v10068_v22 = vadd.f32 %v7573_v23, %v9972_v12  ;;  %v7576_v30 = vadd.f32 %v7575_v45, %v7574_v15  ;;  %4189 = vmatpush1.bf16.msra.mxu0 %v8385_v61 }
 0x24e   : > { %4190 = vmatprep.subr.bf16.mxu0 %v8390_v3 }
 0x24f   : > { %v10074_v28 = vadd.f32 %v7576_v30, %v9980_v43  ;;  %v8412_v30 = vld [vmem:[%s10804_s5 + $0x70] ss:$8 sps:$4 sm:$0xff]  }
 0x251   : > { %v7577_v35 = vpop.f32.mrb[92].mxu1  ;;  %4191 = vmatpush1.bf16.msra.mxu0 %v8388_v32 }
 0x252   : > { %v7578_v31 = vpop.f32.mrb[93].mxu1  ;;  %5327 = vmatprep.subr.bf16.mxu0 %v10076_v25 }
 0x253   : > { %v7579_v2 = vadd.f32 %v7578_v31, %v7577_v35  ;;  %v7580_v37 = vpop.f32.mrb[94].mxu1  ;;  %v8417_v35 = vld [vmem:[%s10804_s5 + $0x84] ss:$8 sps:$4 sm:$0xff]  }
 0x254   : > { %v7581_v12 = vpop.f32.mrb[95].mxu1  ;;  %4193 = vmatmul.mubr.bf16.vlgmr.msra.gmra.mrb[40].mxu0 %v9802_v50 }
 0x255   : > { %v10080_v11 = vadd.f32 %v7579_v2, %v9992_v10  ;;  %v7582_v20 = vadd.f32 %v7581_v12, %v7580_v37  ;;  %4202 = vmatprep.mubr.bf16.mxu0 %v9807_v42  ;;  %v8393_v10 = vld [vmem:[%s10804_s5 + $0x4] ss:$8 sps:$4 sm:$0xff]  }
 0x256   : > { %4854 = vmatprep.subr.bf16.mxu1 %v8393_v10 }
 0x257   : > { %v10085_v43 = vadd.f32 %v7582_v20, %v10000_v26  ;;  %v8396_v26 = vld [vmem:[%s10804_s5 + $0x14] ss:$8 sps:$4 sm:$0xff]   ;;  %4855 = vmatpush1.bf16.msra.mxu1 %v8391_v52 }
 0x258   : > { %4856 = vmatprep.subr.bf16.mxu1 %v8396_v26  ;;  %v8426_v26 = vld [vmem:[%s10804_s5 + $0xb4] ss:$8 sps:$4 sm:$0xff]  }
 0x259   : > { %v7583_v51 = vpop.f32.mrb[96].mxu1 }
 0x25a   : > { %v7584_v56 = vpop.f32.mrb[97].mxu1 }
 0x25b   : > { %v7585_v29 = vadd.f32 %v7584_v56, %v7583_v51  ;;  %v7586_v21 = vpop.f32.mrb[98].mxu1  ;;  %4857 = vmatpush1.bf16.msra.mxu1 %v8394_v16  ;;  %v8418_v56 = vld [vmem:[%s10804_s5 + $0x90] ss:$8 sps:$4 sm:$0xff]  }
 0x25c   : > { %v7587_v53 = vpop.f32.mrb[99].mxu1  ;;  %4203 = vmatmul.mubr.bf16.gmra.mrb[44].mxu0 %v9825_v1  ;;  %v8399_v1 = vld [vmem:[%s10804_s5 + $0x24] ss:$8 sps:$4 sm:$0xff]  }
 0x25d   : > { %v10094_v50 = vadd.f32 %v7585_v29, %v10012_v46  ;;  %v7588_v42 = vadd.f32 %v7587_v53, %v7586_v21  ;;  %4212 = vmatprep.mubr.bf16.mxu0 %v9251_v6  ;;  %v8397_v6 = vld [vmem:[%s10804_s5 + $0x20] ss:$8 sps:$4 sm:$0xff]   ;;  %4858 = vmatprep.subr.bf16.mxu1 %v8399_v1  ;;  %v8423_v21 = vld [vmem:[%s10804_s5 + $0xa4] ss:$8 sps:$4 sm:$0xff]  }
 0x25f   : > { %v10102_v47 = vadd.f32 %v7588_v42, %v10020_v8  ;;  %4859 = vmatpush1.bf16.msra.mxu1 %v8397_v6 }
 0x260   : > { %4860 = vmatprep.subr.bf16.mxu1 %v8402_v57 }
 0x261   : > { %v7605_v46 = vpop.f32.mrb[100].mxu1 }
 0x262   : > { %v7606_v17 = vpop.f32.mrb[101].mxu1 }
 0x263   : > { %v7607_v59 = vadd.f32 %v7606_v17, %v7605_v46  ;;  %v7608_v44 = vpop.f32.mrb[102].mxu1  ;;  %4861 = vmatpush1.bf16.msra.mxu1 %v8400_v19  ;;  %v8424_v46 = vld [vmem:[%s10804_s5 + $0xb0] ss:$8 sps:$4 sm:$0xff]  }
 0x264   : > { %v7609_v8 = vpop.f32.mrb[103].mxu1  ;;  %4213 = vmatmul.mubr.bf16.gmra.mrb[48].mxu0 %v9255_v7  ;;  %v8403_v7 = vld [vmem:[%s10804_s5 + $0x40] ss:$8 sps:$4 sm:$0xff]   ;;  %4862 = vmatprep.subr.bf16.mxu1 %v8405_v27 }
 0x265   : > { %v10117_v24 = vadd.f32 %v7607_v59, %v10032_v58  ;;  %v7610_v48 = vadd.f32 %v7609_v8, %v7608_v44  ;;  %4222 = vmatprep.mubr.bf16.mxu0 %v9301_v33  ;;  %v8429_v59 = vld [vmem:[%s10804_s5 + $0xc4] ss:$8 sps:$4 sm:$0xff]  }
 0x267   : > { %v10122_v5 = vadd.f32 %v7610_v48, %v10038_v63  ;;  %4863 = vmatpush1.bf16.msra.mxu1 %v8403_v7  ;;  %v8432_v48 = vld [vmem:[%s10804_s5 + $0xd4] ss:$8 sps:$4 sm:$0xff]  }
 0x268   : > { %4864 = vmatprep.subr.bf16.mxu1 %v8408_v39 }
 0x269   : > { %v7611_v58 = vpop.f32.mrb[104].mxu1 }
 0x26a   : > { %v7612_v0 = vpop.f32.mrb[105].mxu1 }
 0x26b   : > { %v7613_v33 = vadd.f32 %v7612_v0, %v7611_v58  ;;  %v7614_v63 = vpop.f32.mrb[106].mxu1  ;;  %4865 = vmatpush1.bf16.msra.mxu1 %v8406_v36  ;;  %v8430_v58 = vld [vmem:[%s10804_s5 + $0xd0] ss:$8 sps:$4 sm:$0xff]  }
 0x26c   : > { %v7615_v13 = vpop.f32.mrb[107].mxu1  ;;  %4223 = vmatmul.mubr.bf16.gmra.mrb[52].mxu0 %v9305_v34  ;;  %4866 = vmatprep.subr.bf16.mxu1 %v8411_v9 }
 0x26d   : > { %v10138_v62 = vadd.f32 %v7613_v33, %v10050_v4  ;;  %v7616_v60 = vadd.f32 %v7615_v13, %v7614_v63  ;;  %4232 = vmatprep.mubr.bf16.mxu0 %v9340_v54  ;;  %v8409_v54 = vld [vmem:[%s10804_s5 + $0x60] ss:$8 sps:$4 sm:$0xff]  }
 0x26f   : > { %v10145_v18 = vadd.f32 %v7616_v60, %v10056_v14  ;;  %v8414_v14 = vld [vmem:[%s10804_s5 + $0x74] ss:$8 sps:$4 sm:$0xff]   ;;  %4867 = vmatpush1.bf16.msra.mxu1 %v8409_v54 }
 0x270   : > { %4868 = vmatprep.subr.bf16.mxu1 %v8414_v14 }
 0x271   : > { %v7617_v34 = vpop.f32.mrb[108].mxu1 }
 0x272   : > { %v7618_v61 = vpop.f32.mrb[109].mxu1 }
 0x273   : > { %v7619_v4 = vadd.f32 %v7618_v61, %v7617_v34  ;;  %v7620_v23 = vpop.f32.mrb[110].mxu1  ;;  %4869 = vmatpush1.bf16.msra.mxu1 %v8412_v30 }
 0x274   : > { %v7621_v15 = vpop.f32.mrb[111].mxu1  ;;  %4233 = vmatmul.mubr.bf16.gmra.mrb[56].mxu0 %v9344_v55  ;;  %v8415_v55 = vld [vmem:[%s10804_s5 + $0x80] ss:$8 sps:$4 sm:$0xff]   ;;  %4870 = vmatprep.subr.bf16.mxu1 %v8417_v35 }
 0x275   : > { %v10158_v3 = vadd.f32 %v7619_v4, %v10068_v22  ;;  %v7622_v45 = vadd.f32 %v7621_v15, %v7620_v23 }
 0x277   : > { %v10164_v32 = vadd.f32 %v7622_v45, %v10074_v28  ;;  %v8420_v28 = vld [vmem:[%s10804_s5 + $0x94] ss:$8 sps:$4 sm:$0xff]   ;;  %4871 = vmatpush1.bf16.msra.mxu1 %v8415_v55  ;;  %v8435_v55 = vld [vmem:[%s10804_s5 + $0xe4] ss:$8 sps:$4 sm:$0xff]  }
 0x278   : > { %4872 = vmatprep.subr.bf16.mxu1 %v8420_v28 }
 0x279   : > { %v7623_v31 = vpop.f32.mrb[112].mxu1 }
 0x27a   : > { %v7624_v2 = vpop.f32.mrb[113].mxu1 }
 0x27b   : > { %v7625_v22 = vadd.f32 %v7624_v2, %v7623_v31  ;;  %v7626_v37 = vpop.f32.mrb[114].mxu1  ;;  %4873 = vmatpush1.bf16.msra.mxu1 %v8418_v56 }
 0x27c   : > { %v7627_v12 = vpop.f32.mrb[115].mxu1  ;;  %4874 = vmatprep.subr.bf16.mxu1 %v8423_v21 }
 0x27d   : > { %v4302_v20 = vadd.f32 %v7625_v22, %v10080_v11  ;;  %v7628_v51 = vadd.f32 %v7627_v12, %v7626_v37  ;;  %v8421_v11 = vld [vmem:[%s10804_s5 + $0xa0] ss:$8 sps:$4 sm:$0xff]  }
 0x27f   : > { %v4305_v29 = vadd.f32 %v7628_v51, %v10085_v43  ;;  %4875 = vmatpush1.bf16.msra.mxu1 %v8421_v11 }
 0x280   : > { %4876 = vmatprep.subr.bf16.mxu1 %v8426_v26 }
 0x281   : > { %v7629_v53 = vpop.f32.mrb[116].mxu1 }
 0x282   : > { %v7630_v52 = vpop.f32.mrb[117].mxu1 }
 0x283   : > { %v7631_v10 = vadd.f32 %v7630_v52, %v7629_v53  ;;  %v7632_v42 = vpop.f32.mrb[118].mxu1  ;;  %4877 = vmatpush1.bf16.msra.mxu1 %v8424_v46  ;;  %v10237_v53 = vld [vmem:[%s10803_s4] sm:$0x7]  ;;  %v8441_v46 = vld [vmem:[%s10804_s5 + $0x104] ss:$8 sps:$4 sm:$0xff]  }
 0x284   : > { %v7633_v43 = vpop.f32.mrb[119].mxu1  ;;  %4878 = vmatprep.subr.bf16.mxu1 %v8429_v59 }
 0x285   : > { %v4310_v16 = vadd.f32 %v7631_v10, %v10094_v50  ;;  %v7634_v1 = vadd.f32 %v7633_v43, %v7632_v42  ;;  %v8427_v50 = vld [vmem:[%s10804_s5 + $0xc0] ss:$8 sps:$4 sm:$0xff]   ;;  %v4475_v42 = vrot.slane %v10237_v53, %v409_v49 }
 0x287   : > { %v4313_v17 = vadd.f32 %v7634_v1, %v10102_v47  ;;  %4879 = vmatpush1.bf16.msra.mxu1 %v8427_v50 }
 0x288   : > { %4880 = vmatprep.subr.bf16.mxu1 %v8432_v48 }
 0x289   : > { %v7651_v44 = vpop.f32.mrb[120].mxu1 }
 0x28a   : > { %v7652_v6 = vpop.f32.mrb[121].mxu1 }
 0x28b   : > { %v7653_v8 = vadd.f32 %v7652_v6, %v7651_v44  ;;  %v7654_v57 = vpop.f32.mrb[122].mxu1  ;;  %4881 = vmatpush1.bf16.msra.mxu1 %v8430_v58 }
 0x28c   : > { %v7655_v47 = vpop.f32.mrb[123].mxu1  ;;  %4882 = vmatprep.subr.bf16.mxu1 %v8435_v55 }
 0x28d   : > { %v4351_v19 = vadd.f32 %v7653_v8, %v10117_v24  ;;  %v7656_v27 = vadd.f32 %v7655_v47, %v7654_v57 }
 0x28f   : > { %v4354_v0 = vadd.f32 %v7656_v27, %v10122_v5 }
 0x291   : > { %v7657_v7 = vpop.f32.mrb[124].mxu1 }
 0x292   : > { %v7658_v33 = vpop.f32.mrb[125].mxu1 }
 0x293   : > { %v7659_v63 = vadd.f32 %v7658_v33, %v7657_v7  ;;  %v7660_v39 = vpop.f32.mrb[126].mxu1 }
 0x294   : > { %v7661_v13 = vpop.f32.mrb[127].mxu1 }
 0x295   : > { %v4359_v60 = vadd.f32 %v7659_v63, %v10138_v62  ;;  %v7662_v36 = vadd.f32 %v7661_v13, %v7660_v39 }
 0x297   : > { %v4362_v24 = vadd.f32 %v7662_v36, %v10145_v18 }
 0x299   : > { %v7663_v9 = vpop.f32.mrb[128].mxu1 }
 0x29a   : > { %v7664_v34 = vpop.f32.mrb[129].mxu1 }
 0x29b   : > { %v7665_v61 = vadd.f32 %v7664_v34, %v7663_v9  ;;  %v7666_v54 = vpop.f32.mrb[130].mxu1 }
 0x29c   : > { %v7667_v4 = vpop.f32.mrb[131].mxu1 }
 0x29d   : > { %v4367_v23 = vadd.f32 %v7665_v61, %v10158_v3  ;;  %v7668_v5 = vadd.f32 %v7667_v4, %v7666_v54  ;;  %v8433_v3 = vld [vmem:[%s10804_s5 + $0xe0] ss:$8 sps:$4 sm:$0xff]  }
 0x29e   : > { %4883 = vmatpush1.bf16.msra.mxu1 %v8433_v3 }
 0x29f   : > { %v10212_v14 = vadd.f32 %v7668_v5, %v10164_v32 }
 0x2a1   : > { %v7669_v15 = vpop.f32.mrb[132].mxu1 }
 0x2a2   : > { %v7670_v45 = vpop.f32.mrb[133].mxu1 }
 0x2a3   : > { %v7671_v30 = vadd.f32 %v7670_v45, %v7669_v15  ;;  %v7672_v35 = vpop.f32.mrb[134].mxu1 }
 0x2a4   : > { %v7673_v31 = vpop.f32.mrb[135].mxu1 }
 0x2a5   : > { %v10214_v62 = vadd.f32 %v7671_v30, %v4302_v20  ;;  %v7674_v2 = vadd.f32 %v7673_v31, %v7672_v35  ;;  %v8438_v20 = vld [vmem:[%s10804_s5 + $0xf4] ss:$8 sps:$4 sm:$0xff]  }
 0x2a6   : > { %4884 = vmatprep.subr.bf16.mxu1 %v8438_v20 }
 0x2a7   : > { %v10216_v18 = vadd.f32 %v7674_v2, %v4305_v29  ;;  %v8436_v29 = vld [vmem:[%s10804_s5 + $0xf0] ss:$8 sps:$4 sm:$0xff]  }
 0x2a8   : > { %4885 = vmatpush1.bf16.msra.mxu1 %v8436_v29 }
 0x2a9   : > { %v7675_v22 = vpop.f32.mrb[136].mxu1  ;;  %4937 = vmatprep.subr.bf16.mxu1 %v8441_v46 }
 0x2aa   : > { %v7676_v32 = vpop.f32.mrb[137].mxu1 }
 0x2ab   : > { %v7677_v37 = vadd.f32 %v7676_v32, %v7675_v22  ;;  %v7678_v28 = vpop.f32.mrb[138].mxu1 }
 0x2ac   : > { %v7679_v12 = vpop.f32.mrb[139].mxu1 }
 0x2ad   : > { %v10227_v51 = vadd.f32 %v7677_v37, %v4310_v16  ;;  %v7680_v56 = vadd.f32 %v7679_v12, %v7678_v28 }
 0x2af   : > { %v10232_v21 = vadd.f32 %v7680_v56, %v4313_v17 }
 0x2b1   : > { %v7697_v52 = vpop.f32.mrb[140].mxu1 }
 0x2b2   : > { %v7698_v11 = vpop.f32.mrb[141].mxu1 }
 0x2b3   : > { %v7699_v10 = vadd.f32 %v7698_v11, %v7697_v52  ;;  %v7700_v26 = vpop.f32.mrb[142].mxu1 }
 0x2b4   : > { %v7701_v43 = vpop.f32.mrb[143].mxu1 }
 0x2b5   : > { %v4424_v16 = vadd.f32 %v7699_v10, %v4351_v19  ;;  %v7702_v1 = vadd.f32 %v7701_v43, %v7700_v26 }
 0x2b7   : > { %v4481_v17 = vadd.f32 %v4475_v42, %v4424_v16  ;;  %v4427_v59 = vadd.f32 %v7702_v1, %v4354_v0 }
 0x2b9   : > { %v4484_v44 = vadd.f32 %v4475_v42, %v4427_v59  ;;  %v7703_v6 = vpop.f32.mrb[144].mxu1  ;;  %v4511_v8 = vmax.f32 %v4481_v17, 0.0  ;;  %v8466_v59 = vld [vmem:[%s10806_s7 + $0xf0] sm:$0xff]  }
 0x2ba   : > { %v7704_v50 = vpop.f32.mrb[145].mxu1  ;;  %5328 = vmatpush1.bf16.msra.mxu0 %v8466_v59  ;;  %v8451_v59 = vld [vmem:[%s10804_s5 + $0x140] ss:$8 sps:$4 sm:$0xff]  }
 0x2bb   : > { %v4514_v57 = vmax.f32 %v4484_v44, 0.0  ;;  %v7705_v48 = vadd.f32 %v7704_v50, %v7703_v6  ;;  %v7706_v38 = vpop.f32.mrb[146].mxu1  ;;  %5329 = vmatprep.subr.bf16.mxu0 %v10076_v25  ;;  %v10278_v44 = vrot.slane %v10237_v53, %v8952_v41 }
 0x2bc   : > { %v7707_v47 = vpop.f32.mrb[147].mxu1 }
 0x2bd   : > { %v10245_v49 = vpack.c.bf16 %v4514_v57, %v4511_v8  ;;  %v4432_v27 = vadd.f32 %v7705_v48, %v4359_v60  ;;  %v7708_v19 = vadd.f32 %v7707_v47, %v7706_v38 }
 0x2bf   : > { %v4487_v58 = vadd.f32 %v4475_v42, %v4432_v27  ;;  %v4435_v7 = vadd.f32 %v7708_v19, %v4362_v24 }
 0x2c1   : > { %v4490_v33 = vadd.f32 %v4475_v42, %v4435_v7  ;;  %v7709_v63 = vpop.f32.mrb[148].mxu1  ;;  %v4517_v13 = vmax.f32 %v4487_v58, 0.0 }
 0x2c2   : > { %v7710_v39 = vpop.f32.mrb[149].mxu1 }
 0x2c3   : > { %v4520_v0 = vmax.f32 %v4490_v33, 0.0  ;;  %v7711_v36 = vadd.f32 %v7710_v39, %v7709_v63  ;;  %v7712_v9 = vpop.f32.mrb[150].mxu1 }
 0x2c4   : > { %v7713_v34 = vpop.f32.mrb[151].mxu1 }
 0x2c5   : > { %v4440_v61 = vadd.f32 %v7711_v36, %v4367_v23  ;;  %v7714_v54 = vadd.f32 %v7713_v34, %v7712_v9  ;;  %v10247_v4 = vpack.c.bf16 %v4520_v0, %v4517_v13  ;;  %v8439_v13 = vld [vmem:[%s10804_s5 + $0x100] ss:$8 sps:$4 sm:$0xff]   ;;  %v8444_v9 = vld [vmem:[%s10804_s5 + $0x114] ss:$8 sps:$4 sm:$0xff]  }
 0x2c7   : > { %v4493_v5 = vadd.f32 %v4475_v42, %v4440_v61  ;;  %v4443_v15 = vadd.f32 %v7714_v54, %v10212_v14 }
 0x2c9   : > { %v4496_v45 = vadd.f32 %v4475_v42, %v4443_v15  ;;  %v7715_v60 = vpop.f32.mrb[152].mxu1  ;;  %v4523_v35 = vmax.f32 %v4493_v5, 0.0 }
 0x2ca   : > { %v7716_v30 = vpop.f32.mrb[153].mxu1 }
 0x2cb   : > { %v4526_v24 = vmax.f32 %v4496_v45, 0.0  ;;  %v7717_v31 = vadd.f32 %v7716_v30, %v7715_v60  ;;  %v7718_v2 = vpop.f32.mrb[154].mxu1  ;;  %v8442_v45 = vld [vmem:[%s10804_s5 + $0x110] ss:$8 sps:$4 sm:$0xff]  }
 0x2cc   : > { %v7719_v55 = vpop.f32.mrb[155].mxu1 }
 0x2cd   : > { %v4448_v22 = vadd.f32 %v7717_v31, %v10214_v62  ;;  %v7720_v3 = vadd.f32 %v7719_v55, %v7718_v2  ;;  %v10251_v32 = vpack.c.bf16 %v4526_v24, %v4523_v35  ;;  %v8447_v35 = vld [vmem:[%s10804_s5 + $0x124] ss:$8 sps:$4 sm:$0xff]  }
 0x2cf   : > { %v4499_v23 = vadd.f32 %v4475_v42, %v4448_v22  ;;  %v4451_v37 = vadd.f32 %v7720_v3, %v10216_v18  ;;  %v8445_v3 = vld [vmem:[%s10804_s5 + $0x120] ss:$8 sps:$4 sm:$0xff]  }
 0x2d1   : > { %v4502_v28 = vadd.f32 %v4475_v42, %v4451_v37  ;;  %v7721_v12 = vpop.f32.mrb[156].mxu1  ;;  %v4529_v14 = vmax.f32 %v4499_v23, 0.0 }
 0x2d2   : > { %v7722_v20 = vpop.f32.mrb[157].mxu1 }
 0x2d3   : > { %v4532_v56 = vmax.f32 %v4502_v28, 0.0  ;;  %v7723_v29 = vadd.f32 %v7722_v20, %v7721_v12  ;;  %v7724_v52 = vpop.f32.mrb[158].mxu1  ;;  %v8450_v28 = vld [vmem:[%s10804_s5 + $0x134] ss:$8 sps:$4 sm:$0xff]  }
 0x2d4   : > { %v7725_v11 = vpop.f32.mrb[159].mxu1 }
 0x2d5   : > { %v4456_v10 = vadd.f32 %v7723_v29, %v10227_v51  ;;  %v7726_v26 = vadd.f32 %v7725_v11, %v7724_v52  ;;  %v10255_v43 = vpack.c.bf16 %v4532_v56, %v4529_v14  ;;  %v8468_v51 = vld [vmem:[%s10806_s7 + $0xf8] sm:$0xff]  }
 0x2d6   : > { %5330 = vmatpush1.bf16.msra.mxu0 %v8468_v51  ;;  %v8448_v52 = vld [vmem:[%s10804_s5 + $0x130] ss:$8 sps:$4 sm:$0xff]  }
 0x2d7   : > { %v4505_v62 = vadd.f32 %v4475_v42, %v4456_v10  ;;  %v4459_v16 = vadd.f32 %v7726_v26, %v10232_v21  ;;  %v8470_v21 = vld [vmem:[%s10806_s7 + $0x100] sm:$0xff]   ;;  %5331 = vmatprep.subr.bf16.mxu0 %v10076_v25 }
 0x2d8   : > { %v8453_v26 = vld [vmem:[%s10804_s5 + $0x144] ss:$8 sps:$4 sm:$0xff]  }
 0x2d9   : > { %v4508_v1 = vadd.f32 %v4475_v42, %v4459_v16  ;;  %v4535_v46 = vmax.f32 %v4505_v62, 0.0  ;;  %v10274_v42 = vrot.slane %v10237_v53, %v8949_v40 }
 0x2da   : > { %5332 = vmatpush1.bf16.msra.mxu0 %v8470_v21 }
 0x2db   : > { %v4538_v17 = vmax.f32 %v4508_v1, 0.0  ;;  %5333 = vmatprep.subr.bf16.mxu0 %v10076_v25 }
 0x2dd   : > { %v10258_v18 = vpack.c.bf16 %v4538_v17, %v4535_v46 }
 0x327   : > { %v4194_v6 = vpop.f32.mrb[40].mxu0 }
 0x328   : > { %v4479_v50 = vadd.f32 %v10274_v42, %v4194_v6  ;;  %v4196_v8 = vpop.f32.mrb[41].mxu0  ;;  %v8456_v6 = vld [vmem:[%s10804_s5 + $0x154] ss:$8 sps:$4 sm:$0xff]  }
 0x329   : > { %v4480_v57 = vadd.f32 %v10278_v44, %v4196_v8  ;;  %v4198_v48 = vpop.f32.mrb[42].mxu0 }
 0x32a   : > { %v4482_v38 = vadd.f32 %v10274_v42, %v4198_v48  ;;  %v4200_v47 = vpop.f32.mrb[43].mxu0  ;;  %v4509_v19 = vmax.f32 %v4479_v50, 0.0 }
 0x32b   : > { %v4483_v27 = vadd.f32 %v10278_v44, %v4200_v47  ;;  %v4510_v7 = vmax.f32 %v4480_v57, 0.0  ;;  %v8454_v47 = vld [vmem:[%s10804_s5 + $0x150] ss:$8 sps:$4 sm:$0xff]  }
 0x32c   : > { %v4512_v58 = vmax.f32 %v4482_v38, 0.0 }
 0x32d   : > { %v4513_v33 = vmax.f32 %v4483_v27, 0.0 }
 0x32e   : > { %v4539_v63 = vpack.c.bf16 %v4512_v58, %v4509_v19  ;;  %v8459_v58 = vld [vmem:[%s10804_s5 + $0x164] ss:$8 sps:$4 sm:$0xff]  }
 0x32f   : > { %v4540_v39 = vpack.c.bf16 %v4513_v33, %v4510_v7  ;;  %v4204_v53 = vpop.f32.mrb[44].mxu0 }
 0x330   : > { %v4485_v0 = vadd.f32 %v10274_v42, %v4204_v53  ;;  %v4206_v36 = vpop.f32.mrb[45].mxu0 }
 0x331   : > { %v4486_v34 = vadd.f32 %v10278_v44, %v4206_v36  ;;  %v4208_v61 = vpop.f32.mrb[46].mxu0  ;;  %4886 = vmatprep.mubr.bf16.mxu1 %v4540_v39 }
 0x332   : > { %v4488_v54 = vadd.f32 %v10274_v42, %v4208_v61  ;;  %v4210_v5 = vpop.f32.mrb[47].mxu0  ;;  %4887 = vmatmul.mubr.bf16.vlgmr.msra.gmra.mrb[160].mxu1 %v4539_v63  ;;  %v4515_v60 = vmax.f32 %v4485_v0, 0.0 }
 0x333   : > { %v4489_v15 = vadd.f32 %v10278_v44, %v4210_v5  ;;  %4938 = vmatpush1.bf16.msra.mxu1 %v8439_v13  ;;  %v4516_v24 = vmax.f32 %v4486_v34, 0.0  ;;  %v8457_v13 = vld [vmem:[%s10804_s5 + $0x160] ss:$8 sps:$4 sm:$0xff]  }
 0x334   : > { %v4518_v30 = vmax.f32 %v4488_v54, 0.0  ;;  %4939 = vmatprep.subr.bf16.mxu1 %v8444_v9  ;;  %v8462_v9 = vld [vmem:[%s10804_s5 + $0x174] ss:$8 sps:$4 sm:$0xff]  }
 0x335   : > { %v4519_v31 = vmax.f32 %v4489_v15, 0.0 }
 0x336   : > { %v4542_v2 = vpack.c.bf16 %v4518_v30, %v4515_v60 }
 0x337   : > { %v4543_v55 = vpack.c.bf16 %v4519_v31, %v4516_v24  ;;  %v4214_v22 = vpop.f32.mrb[48].mxu0  ;;  %4940 = vmatpush1.bf16.msra.mxu1 %v8442_v45  ;;  %v8460_v45 = vld [vmem:[%s10804_s5 + $0x170] ss:$8 sps:$4 sm:$0xff]  }
 0x338   : > { %v4491_v23 = vadd.f32 %v10274_v42, %v4214_v22  ;;  %v4216_v37 = vpop.f32.mrb[49].mxu0  ;;  %4941 = vmatprep.subr.bf16.mxu1 %v8447_v35  ;;  %v8469_v22 = vld [vmem:[%s10806_s7 + $0x70] sm:$0xff]  }
 0x339   : > { %v4492_v12 = vadd.f32 %v10278_v44, %v4216_v37  ;;  %v4218_v20 = vpop.f32.mrb[50].mxu0  ;;  %4896 = vmatprep.mubr.bf16.mxu1 %v4543_v55  ;;  %v8465_v55 = vld [vmem:[%s10806_s7 + $0x60] sm:$0xff]   ;;  %v8477_v37 = vld [vmem:[%s10806_s7 + $0x90] sm:$0xff]  }
 0x33a   : > { %v4494_v14 = vadd.f32 %v10274_v42, %v4218_v20  ;;  %v4220_v56 = vpop.f32.mrb[51].mxu0  ;;  %4897 = vmatmul.mubr.bf16.gmra.mrb[164].mxu1 %v4542_v2  ;;  %v4521_v11 = vmax.f32 %v4491_v23, 0.0  ;;  %v8476_v23 = vld [vmem:[%s10806_s7 + $0x118] sm:$0xff]   ;;  %v8480_v20 = vld [vmem:[%s10806_s7 + $0x128] sm:$0xff]  }
 0x33b   : > { %v4495_v29 = vadd.f32 %v10278_v44, %v4220_v56  ;;  %4942 = vmatpush1.bf16.msra.mxu1 %v8445_v3  ;;  %v4522_v62 = vmax.f32 %v4492_v12, 0.0  ;;  %v8472_v3 = vld [vmem:[%s10806_s7 + $0x108] sm:$0xff]   ;;  %v8479_v12 = vld [vmem:[%s10806_s7 + $0x98] sm:$0xff]  }
 0x33c   : > { %v4524_v10 = vmax.f32 %v4494_v14, 0.0  ;;  %4943 = vmatprep.subr.bf16.mxu1 %v8450_v28  ;;  %5334 = vmatpush1.bf16.msra.mxu0 %v8472_v3  ;;  %v8478_v28 = vld [vmem:[%s10806_s7 + $0x120] sm:$0xff]   ;;  %v8481_v14 = vld [vmem:[%s10806_s7 + $0x130] sm:$0xff]   ;;  %v8483_v56 = vld [vmem:[%s10806_s7 + $0x138] sm:$0xff]  }
 0x33d   : > { %v4525_v16 = vmax.f32 %v4495_v29, 0.0  ;;  %5335 = vmatprep.subr.bf16.mxu0 %v10076_v25  ;;  %v4602_v29 = vld [vmem:[%s10805_s6] sm:$0x3] }
 0x33e   : > { %v4545_v1 = vpack.c.bf16 %v4524_v10, %v4521_v11  ;;  %v10431_v11 = vrot.slane %v4602_v29, %v8952_v41 }
 0x33f   : > { %v4546_v46 = vpack.c.bf16 %v4525_v16, %v4522_v62  ;;  %v4224_v17 = vpop.f32.mrb[52].mxu0  ;;  %4944 = vmatpush1.bf16.msra.mxu1 %v8448_v52  ;;  %v10428_v52 = vrot.slane %v4602_v29, %v8949_v40 }
 0x340   : > { %v4497_v51 = vadd.f32 %v10274_v42, %v4224_v17  ;;  %v4226_v21 = vpop.f32.mrb[53].mxu0  ;;  %4945 = vmatprep.subr.bf16.mxu1 %v8453_v26 }
 0x341   : > { %v4498_v50 = vadd.f32 %v10278_v44, %v4226_v21  ;;  %v4228_v8 = vpop.f32.mrb[54].mxu0  ;;  %4906 = vmatprep.mubr.bf16.mxu1 %v4546_v46 }
 0x342   : > { %v4500_v57 = vadd.f32 %v10274_v42, %v4228_v8  ;;  %v4230_v48 = vpop.f32.mrb[55].mxu0  ;;  %4907 = vmatmul.mubr.bf16.gmra.mrb[168].mxu1 %v4545_v1  ;;  %v4527_v27 = vmax.f32 %v4497_v51, 0.0 }
 0x343   : > { %v4501_v38 = vadd.f32 %v10278_v44, %v4230_v48  ;;  %4946 = vmatpush1.bf16.msra.mxu1 %v8451_v59  ;;  %v4528_v7 = vmax.f32 %v4498_v50, 0.0 }
 0x344   : > { %v4530_v19 = vmax.f32 %v4500_v57, 0.0  ;;  %4947 = vmatprep.subr.bf16.mxu1 %v8456_v6 }
 0x345   : > { %v4531_v33 = vmax.f32 %v4501_v38, 0.0 }
 0x346   : > { %v4548_v63 = vpack.c.bf16 %v4530_v19, %v4527_v27 }
 0x347   : > { %v4549_v39 = vpack.c.bf16 %v4531_v33, %v4528_v7  ;;  %v4234_v53 = vpop.f32.mrb[56].mxu0  ;;  %4948 = vmatpush1.bf16.msra.mxu1 %v8454_v47 }
 0x348   : > { %v4503_v0 = vadd.f32 %v10274_v42, %v4234_v53  ;;  %v4236_v36 = vpop.f32.mrb[57].mxu0  ;;  %4949 = vmatprep.subr.bf16.mxu1 %v8459_v58 }
 0x349   : > { %v4504_v34 = vadd.f32 %v10278_v44, %v4236_v36  ;;  %v4238_v61 = vpop.f32.mrb[58].mxu0  ;;  %4916 = vmatprep.mubr.bf16.mxu1 %v4549_v39 }
 0x34a   : > { %v4506_v54 = vadd.f32 %v10274_v42, %v4238_v61  ;;  %v4240_v5 = vpop.f32.mrb[59].mxu0  ;;  %4917 = vmatmul.mubr.bf16.gmra.mrb[172].mxu1 %v4548_v63  ;;  %v4533_v60 = vmax.f32 %v4503_v0, 0.0  ;;  %v8463_v42 = vld [vmem:[%s10806_s7 + $0x50] sm:$0xff]  }
 0x34b   : > { %v4507_v15 = vadd.f32 %v10278_v44, %v4240_v5  ;;  %4950 = vmatpush1.bf16.msra.mxu1 %v8457_v13  ;;  %v4534_v35 = vmax.f32 %v4504_v34, 0.0  ;;  %v8464_v44 = vld [vmem:[%s10806_s7 + $0x58] sm:$0xff]  }
 0x34c   : > { %v4536_v30 = vmax.f32 %v4506_v54, 0.0  ;;  %4951 = vmatprep.subr.bf16.mxu1 %v8462_v9 }
 0x34d   : > { %v4537_v24 = vmax.f32 %v4507_v15, 0.0 }
 0x34e   : > { %v4551_v31 = vpack.c.bf16 %v4536_v30, %v4533_v60 }
 0x34f   : > { %v4552_v2 = vpack.c.bf16 %v4537_v24, %v4534_v35  ;;  %4952 = vmatpush1.bf16.msra.mxu1 %v8460_v45  ;;  %v8482_v45 = vld [vmem:[%s10806_s7 + $0x190] sm:$0xff]  }
 0x350   : > { %5173 = vmatprep.subr.bf16.mxu1 %v10076_v25 }
 0x351   : > { %4926 = vmatprep.mubr.bf16.mxu1 %v4552_v2 }
 0x352   : > { %4927 = vmatmul.mubr.bf16.gmra.mrb[176].mxu1 %v4551_v31 }
 0x353   : > { %4969 = vmatprep.mubr.bf16.mxu1 %v10076_v25 }
 0x35a   : > { %4970 = vmatmul.mubr.bf16.vlgmr.msra.gmra.mrb[160].mxu1 %v10245_v49  ;;  %v8467_v49 = vld [vmem:[%s10806_s7 + $0x68] sm:$0xff]  }
 0x35b   : > { %4979 = vmatprep.mubr.bf16.mxu1 %v10076_v25  ;;  %5174 = vmatpush1.bf16.msra.mxu1 %v8463_v42 }
 0x35c   : > { %5175 = vmatprep.subr.bf16.mxu1 %v10076_v25 }
 0x35f   : > { %5176 = vmatpush1.bf16.msra.mxu1 %v8464_v44 }
 0x360   : > { %5177 = vmatprep.subr.bf16.mxu1 %v10076_v25 }
 0x362   : > { %4980 = vmatmul.mubr.bf16.gmra.mrb[164].mxu1 %v10247_v4  ;;  %v8471_v4 = vld [vmem:[%s10806_s7 + $0x78] sm:$0xff]  }
 0x363   : > { %4989 = vmatprep.mubr.bf16.mxu1 %v10076_v25  ;;  %5178 = vmatpush1.bf16.msra.mxu1 %v8465_v55  ;;  %v8484_v55 = vld [vmem:[%s10806_s7 + $0x198] sm:$0xff]  }
 0x364   : > { %5179 = vmatprep.subr.bf16.mxu1 %v10076_v25 }
 0x367   : > { %5180 = vmatpush1.bf16.msra.mxu1 %v8467_v49 }
 0x368   : > { %5181 = vmatprep.subr.bf16.mxu1 %v10076_v25 }
 0x36a   : > { %4990 = vmatmul.mubr.bf16.gmra.mrb[168].mxu1 %v10251_v32  ;;  %v8473_v32 = vld [vmem:[%s10806_s7 + $0x80] sm:$0xff]  }
 0x36b   : > { %4999 = vmatprep.mubr.bf16.mxu1 %v10076_v25  ;;  %5182 = vmatpush1.bf16.msra.mxu1 %v8469_v22 }
 0x36c   : > { %5183 = vmatprep.subr.bf16.mxu1 %v10076_v25 }
 0x36f   : > { %5184 = vmatpush1.bf16.msra.mxu1 %v8471_v4 }
 0x370   : > { %5185 = vmatprep.subr.bf16.mxu1 %v10076_v25 }
 0x372   : > { %5000 = vmatmul.mubr.bf16.gmra.mrb[172].mxu1 %v10255_v43  ;;  %v8474_v43 = vld [vmem:[%s10806_s7 + $0x110] sm:$0xff]  }
 0x373   : > { %5009 = vmatprep.mubr.bf16.mxu1 %v10076_v25  ;;  %5186 = vmatpush1.bf16.msra.mxu1 %v8473_v32 }
 0x374   : > { %5336 = vmatpush1.bf16.msra.mxu0 %v8474_v43  ;;  %5187 = vmatprep.subr.bf16.mxu1 %v10076_v25 }
 0x375   : > { %5337 = vmatprep.subr.bf16.mxu0 %v10076_v25 }
 0x378   : > { %5338 = vmatpush1.bf16.msra.mxu0 %v8476_v23 }
 0x379   : > { %5339 = vmatprep.subr.bf16.mxu0 %v10076_v25 }
 0x37a   : > { %5010 = vmatmul.mubr.bf16.gmra.mrb[176].mxu1 %v10258_v18  ;;  %v8475_v18 = vld [vmem:[%s10806_s7 + $0x88] sm:$0xff]  }
 0x37b   : > { %5188 = vmatpush1.bf16.msra.mxu1 %v8475_v18 }
 0x37c   : > { %5189 = vmatprep.subr.bf16.mxu1 %v10076_v25  ;;  %5340 = vmatpush1.bf16.msra.mxu0 %v8478_v28 }
 0x37d   : > { %5341 = vmatprep.subr.bf16.mxu0 %v10076_v25 }
 0x37f   : > { %5190 = vmatpush1.bf16.msra.mxu1 %v8477_v37 }
 0x380   : > { %5191 = vmatprep.subr.bf16.mxu1 %v10076_v25  ;;  %5342 = vmatpush1.bf16.msra.mxu0 %v8480_v20  ;;  %v8486_v20 = vld [vmem:[%s10806_s7 + $0x230] sm:$0xff]  }
 0x381   : > { %5343 = vmatprep.subr.bf16.mxu0 %v10076_v25 }
 0x383   : > { %5192 = vmatpush1.bf16.msra.mxu1 %v8479_v12  ;;  %v8485_v12 = vld [vmem:[%s10806_s7 + $0x1a0] sm:$0xff]  }
 0x384   : > { %5481 = vmatprep.subr.bf16.mxu1 %v10076_v25  ;;  %5344 = vmatpush1.bf16.msra.mxu0 %v8481_v14 }
 0x385   : > { %5345 = vmatprep.subr.bf16.mxu0 %v10076_v25 }
 0x388   : > { %5346 = vmatpush1.bf16.msra.mxu0 %v8483_v56 }
 0x389   : > { %5635 = vmatprep.subr.bf16.mxu0 %v10076_v25 }
 0x42d   : > { %v4971_v10 = vpop.f32.mrb[160].mxu1 }
 0x42e   : > { %v7727_v26 = vadd.f32 %v4971_v10, %v10428_v52  ;;  %v4973_v62 = vpop.f32.mrb[161].mxu1 }
 0x42f   : > { %v7728_v16 = vadd.f32 %v4973_v62, %v10431_v11  ;;  %v4975_v1 = vpop.f32.mrb[162].mxu1 }
 0x430   : > { %v7729_v46 = vadd.f32 %v4975_v1, %v10428_v52  ;;  %v4977_v17 = vpop.f32.mrb[163].mxu1  ;;  %v5020_v51 = vmax.f32 %v7727_v26, 0.0 }
 0x431   : > { %v7730_v59 = vadd.f32 %v4977_v17, %v10431_v11  ;;  %v5021_v6 = vmax.f32 %v7728_v16, 0.0  ;;  %v8488_v17 = vld [vmem:[%s10806_s7 + $0x238] sm:$0xff]  }
 0x432   : > { %v5022_v21 = vmax.f32 %v7729_v46, 0.0  ;;  %v8487_v46 = vld [vmem:[%s10806_s7 + $0x1a8] sm:$0xff]  }
 0x433   : > { %v5023_v40 = vmax.f32 %v7730_v59, 0.0 }
 0x434   : > { %v5040_v50 = vpack.c.bf16 %v5022_v21, %v5020_v51 }
 0x435   : > { %v5041_v8 = vpack.c.bf16 %v5023_v40, %v5021_v6  ;;  %v4981_v41 = vpop.f32.mrb[164].mxu1 }
 0x436   : > { %5050 = vst [vmem:[#allocation3] sm:$0xff] %v5040_v50  ;;  %v7731_v57 = vadd.f32 %v4981_v41, %v10428_v52  ;;  %v4983_v48 = vpop.f32.mrb[165].mxu1 }
 0x437   : > { %5051 = vst.msk [vmem:[#allocation3 + $0x8] sm:$0xff] %vm664_vm0, %v5041_v8  ;;  %v7732_v38 = vadd.f32 %v4983_v48, %v10431_v11  ;;  %v4985_v47 = vpop.f32.mrb[166].mxu1  ;;  %v8489_v48 = vld [vmem:[%s10806_s7 + $0x1b0] sm:$0xff]  }
 0x438   : > { %v7733_v27 = vadd.f32 %v4985_v47, %v10428_v52  ;;  %v4987_v19 = vpop.f32.mrb[167].mxu1  ;;  %v5024_v7 = vmax.f32 %v7731_v57, 0.0 }
 0x439   : > { %v7734_v58 = vadd.f32 %v4987_v19, %v10431_v11  ;;  %v5025_v63 = vmax.f32 %v7732_v38, 0.0 }
 0x43a   : > { %v5026_v33 = vmax.f32 %v7733_v27, 0.0  ;;  %v10486_v27 = vld [vmem:[#allocation2 + $0xf0] sm:$0xff] }
 0x43b   : > { %v5027_v39 = vmax.f32 %v7734_v58, 0.0 }
 0x43c   : > { %v5042_v53 = vpack.c.bf16 %v5026_v33, %v5024_v7 }
 0x43d   : > { %v5043_v13 = vpack.c.bf16 %v5027_v39, %v5025_v63  ;;  %v4991_v0 = vpop.f32.mrb[168].mxu1  ;;  %v5082_v36 = vld [vmem:[#allocation3] sm:$0xf0] }
 0x43e   : > { %5052 = vst [vmem:[#allocation3 + $0x10] sm:$0xff] %v5042_v53  ;;  %v7735_v9 = vadd.f32 %v4991_v0, %v10428_v52  ;;  %v4993_v34 = vpop.f32.mrb[169].mxu1  ;;  %v5083_v61 = vld [vmem:[#allocation3 + $0x8] sm:$0xf0]  ;;  %v5107_v35 = vrot.slane %v5082_v36, 4  ;;  %v8492_v39 = vld [vmem:[%s10806_s7 + $0x248] sm:$0xff]  }
 0x43f   : > { %5053 = vst.msk [vmem:[#allocation3 + $0x18] sm:$0xff] %vm664_vm0, %v5043_v13  ;;  %v7736_v54 = vadd.f32 %v4993_v34, %v10431_v11  ;;  %v4995_v5 = vpop.f32.mrb[170].mxu1  ;;  %v5108_v15 = vrot.slane %v5083_v61, 4  ;;  %v8493_v36 = vld [vmem:[%s10806_s7 + $0x1c0] sm:$0xff]   ;;  %v8495_v34 = vld [vmem:[%s10806_s7 + $0x1c8] sm:$0xff]   ;;  %v8496_v61 = vld [vmem:[%s10806_s7 + $0x258] sm:$0xff]  }
 0x440   : > { %v7737_v60 = vadd.f32 %v4995_v5, %v10428_v52  ;;  %v4997_v30 = vpop.f32.mrb[171].mxu1  ;;  %v5028_v31 = vmax.f32 %v7735_v9, 0.0  ;;  %v8494_v9 = vld [vmem:[%s10806_s7 + $0x250] sm:$0xff]   ;;  %v8498_v5 = vld [vmem:[%s10806_s7 + $0x260] sm:$0xff]  }
 0x441   : > { %v7738_v24 = vadd.f32 %v4997_v30, %v10431_v11  ;;  %7147 = vmatprep.mubr.msk.bf16.mxu1 %vm664_vm0, %v5108_v15  ;;  %v5029_v42 = vmax.f32 %v7736_v54, 0.0  ;;  %v8497_v54 = vld [vmem:[%s10806_s7 + $0x1d0] sm:$0xff]   ;;  %v8499_v15 = vld [vmem:[%s10806_s7 + $0x1d8] sm:$0xff]  }
 0x442   : > { %v5030_v2 = vmax.f32 %v7737_v60, 0.0  ;;  %5206 = vmatmul.mubr.bf16.vlgmr.msra.gmra.mrb[180].mxu1 %v5107_v35  ;;  %v8501_v30 = vld [vmem:[%s10806_s7 + $0x270] sm:$0xff]  }
 0x443   : > { %v5031_v44 = vmax.f32 %v7738_v24, 0.0  ;;  %5482 = vmatpush1.bf16.msra.mxu1 %v8482_v45  ;;  %v8500_v45 = vld [vmem:[%s10806_s7 + $0x268] sm:$0xff]   ;;  %v8502_v35 = vld [vmem:[%s10806_s7 + $0x2d0] sm:$0xff]  }
 0x444   : > { %v5044_v49 = vpack.c.bf16 %v5030_v2, %v5028_v31  ;;  %5483 = vmatprep.subr.bf16.mxu1 %v10076_v25 }
 0x445   : > { %v5045_v22 = vpack.c.bf16 %v5031_v44, %v5029_v42  ;;  %v5001_v4 = vpop.f32.mrb[172].mxu1  ;;  %v5236_v3 = vld [vmem:[#allocation3 + $0x10] sm:$0xf0] }
 0x446   : > { %5054 = vst [vmem:[#allocation3 + $0x20] sm:$0xff] %v5044_v49  ;;  %v7739_v32 = vadd.f32 %v5001_v4, %v10428_v52  ;;  %v5003_v43 = vpop.f32.mrb[173].mxu1  ;;  %v5237_v18 = vld [vmem:[#allocation3 + $0x18] sm:$0xf0]  ;;  %v5261_v29 = vrot.slane %v5236_v3, 4  ;;  %v8503_v42 = vld [vmem:[%s10806_s7 + $0x278] sm:$0xff]  }
 0x447   : > { %5055 = vst.msk [vmem:[#allocation3 + $0x28] sm:$0xff] %vm664_vm0, %v5045_v22  ;;  %v7740_v23 = vadd.f32 %v5003_v43, %v10431_v11  ;;  %5484 = vmatpush1.bf16.msra.mxu1 %v8484_v55  ;;  %v5005_v37 = vpop.f32.mrb[174].mxu1  ;;  %v5262_v28 = vrot.slane %v5237_v18, 4  ;;  %v8504_v44 = vld [vmem:[%s10806_s7 + $0x2d8] sm:$0xff]   ;;  %v8505_v49 = vld [vmem:[%s10806_s7 + $0x2e0] sm:$0xff]   ;;  %v8508_v43 = vld [vmem:[%s10806_s7 + $0x8] sm:$0xff]  }
 0x448   : > { %v7741_v14 = vadd.f32 %v5005_v37, %v10428_v52  ;;  %v5007_v56 = vpop.f32.mrb[175].mxu1  ;;  %5485 = vmatprep.subr.bf16.mxu1 %v10076_v25  ;;  %v5032_v26 = vmax.f32 %v7739_v32, 0.0  ;;  %v8506_v22 = vld [vmem:[%s10806_s7] sm:$0xff]   ;;  %v5061_v3 = vld [vmem:[#allocation3 + $0x8] sm:$0xf]  ;;  %v8507_v32 = vld [vmem:[%s10806_s7 + $0x2e8] sm:$0xff]  }
 0x449   : > { %v7742_v10 = vadd.f32 %v5007_v56, %v10431_v11  ;;  %7198 = vmatprep.mubr.msk.bf16.mxu0 %vm664_vm0, %v5262_v28  ;;  %v5033_v16 = vmax.f32 %v7740_v23, 0.0  ;;  %v8509_v18 = vld [vmem:[%s10806_s7 + $0x2f0] sm:$0xff]   ;;  %v8511_v37 = vld [vmem:[%s10806_s7 + $0x2f8] sm:$0xff]   ;;  %v8516_v56 = vld [vmem:[%s10806_s7 + $0x28] sm:$0xff]  }
 0x44a   : > { %v5034_v62 = vmax.f32 %v7741_v14, 0.0  ;;  %5360 = vmatmul.mubr.bf16.vlgmr.msra.gmra.mrb[60].mxu0 %v5261_v29  ;;  %v8510_v23 = vld [vmem:[%s10806_s7 + $0x10] sm:$0xff]   ;;  %v8512_v28 = vld [vmem:[%s10806_s7 + $0x18] sm:$0xff]   ;;  %v8515_v14 = vld [vmem:[%s10806_s7 + $0x308] sm:$0xff]  }
 0x44b   : > { %v5035_v1 = vmax.f32 %v7742_v10, 0.0  ;;  %5486 = vmatpush1.bf16.msra.mxu1 %v8485_v12  ;;  %5636 = vmatpush1.bf16.msra.mxu0 %v8486_v20  ;;  %v8513_v12 = vld [vmem:[%s10806_s7 + $0x300] sm:$0xff]   ;;  %v8517_v29 = vld [vmem:[%s10806_s7 + $0x310] sm:$0xff]  }
 0x44c   : > { %v5046_v59 = vpack.c.bf16 %v5034_v62, %v5032_v26  ;;  %5487 = vmatprep.subr.bf16.mxu1 %v10076_v25  ;;  %5637 = vmatprep.subr.bf16.mxu0 %v10076_v25  ;;  %v8490_v25 = vld [vmem:[%s10806_s7 + $0x240] sm:$0xff]   ;;  %v8518_v10 = vld [vmem:[%s10806_s7 + $0x30] sm:$0xff]   ;;  %v8519_v26 = vld [vmem:[%s10806_s7 + $0x318] sm:$0xff]  }
 0x44d   : > { %v5047_v51 = vpack.c.bf16 %v5035_v1, %v5033_v16  ;;  %v5011_v21 = vpop.f32.mrb[176].mxu1  ;;  %v5390_v60 = vld [vmem:[#allocation3 + $0x20] sm:$0xf0]  ;;  %v8514_v20 = vld [vmem:[%s10806_s7 + $0x20] sm:$0xff]   ;;  %v8520_v62 = vld [vmem:[%s10806_s7 + $0x38] sm:$0xff]  }
 0x44e   : > { %5056 = vst [vmem:[#allocation3 + $0x30] sm:$0xff] %v5046_v59  ;;  %v7743_v6 = vadd.f32 %v5011_v21, %v10428_v52  ;;  %v5013_v40 = vpop.f32.mrb[177].mxu1  ;;  %v5391_v50 = vld [vmem:[#allocation3 + $0x28] sm:$0xf0]  ;;  %v5415_v31 = vrot.slane %v5390_v60, 4  ;;  %v8521_v1 = vld [vmem:[%s10806_s7 + $0x40] sm:$0xff]  }
 0x44f   : > { %5057 = vst.msk [vmem:[#allocation3 + $0x38] sm:$0xff] %vm664_vm0, %v5047_v51  ;;  %v7744_v8 = vadd.f32 %v5013_v40, %v10431_v11  ;;  %5488 = vmatpush1.bf16.msra.mxu1 %v8487_v46  ;;  %5638 = vmatpush1.bf16.msra.mxu0 %v8488_v17  ;;  %v5015_v41 = vpop.f32.mrb[178].mxu1  ;;  %v5416_v57 = vrot.slane %v5391_v50, 4  ;;  %v8522_v46 = vld [vmem:[%s10806_s7 + $0xa0] sm:$0xff]   ;;  %v8523_v51 = vld [vmem:[%s10806_s7 + $0x48] sm:$0xff]  }
 0x450   : > { %v7745_v38 = vadd.f32 %v5015_v41, %v10428_v52  ;;  %v5017_v47 = vpop.f32.mrb[179].mxu1  ;;  %5489 = vmatprep.subr.bf16.mxu1 %v10486_v27  ;;  %5639 = vmatprep.subr.bf16.mxu0 %v10486_v27  ;;  %v5036_v58 = vmax.f32 %v7743_v6, 0.0  ;;  %v8491_v52 = vld [vmem:[%s10806_s7 + $0x1b8] sm:$0xff]   ;;  %v5214_v59 = vld [vmem:[#allocation3 + $0x18] sm:$0xf]  ;;  %v8524_v21 = vld [vmem:[%s10806_s7 + $0xa8] sm:$0xff]  }
 0x451   : > { %v7746_v19 = vadd.f32 %v5017_v47, %v10431_v11  ;;  %7249 = vmatprep.mubr.msk.bf16.mxu1 %vm664_vm0, %v5416_v57  ;;  %v5037_v33 = vmax.f32 %v7744_v8, 0.0  ;;  %v8525_v6 = vld [vmem:[%s10806_s7 + $0xb0] sm:$0xff]   ;;  %v8526_v40 = vld [vmem:[%s10806_s7 + $0x140] sm:$0xff]   ;;  %v5060_v50 = vld [vmem:[#allocation3] sm:$0xf] }
 0x452   : > { %v5038_v7 = vmax.f32 %v7745_v38, 0.0  ;;  %v5368_v8 = vld [vmem:[#allocation3 + $0x28] sm:$0xf]  ;;  %v8527_v41 = vld [vmem:[%s10806_s7 + $0xb8] sm:$0xff]   ;;  %v8528_v57 = vld [vmem:[%s10806_s7 + $0x148] sm:$0xff]  }
 0x453   : > { %v5039_v63 = vmax.f32 %v7746_v19, 0.0  ;;  %5490 = vmatpush1.bf16.msra.mxu1 %v8489_v48  ;;  %5640 = vmatpush1.bf16.msra.mxu0 %v8490_v25  ;;  %v8529_v48 = vld [vmem:[%s10806_s7 + $0xc0] sm:$0xff]   ;;  %v8530_v25 = vld [vmem:[%s10806_s7 + $0x150] sm:$0xff]   ;;  %v8531_v38 = vld [vmem:[%s10806_s7 + $0xc8] sm:$0xff]  }
 0x454   : > { %v5048_v53 = vpack.c.bf16 %v5038_v7, %v5036_v58  ;;  %5491 = vmatprep.subr.bf16.mxu1 %v10486_v27  ;;  %5641 = vmatprep.subr.bf16.mxu0 %v10486_v27  ;;  %v8532_v47 = vld [vmem:[%s10806_s7 + $0x158] sm:$0xff]   ;;  %v8533_v19 = vld [vmem:[%s10806_s7 + $0xd0] sm:$0xff]   ;;  %v8534_v58 = vld [vmem:[%s10806_s7 + $0x160] sm:$0xff]  }
 0x455   : > { %v5049_v11 = vpack.c.bf16 %v5039_v63, %v5037_v33  ;;  %v5544_v55 = vld [vmem:[#allocation3 + $0x30] sm:$0xf0]  ;;  %v8536_v33 = vld [vmem:[%s10806_s7 + $0x168] sm:$0xff]   ;;  %v8537_v63 = vld [vmem:[%s10806_s7 + $0xe0] sm:$0xff]  }
 0x456   : > { %5058 = vst [vmem:[#allocation3 + $0x40] sm:$0xff] %v5048_v53  ;;  %v5545_v13 = vld [vmem:[#allocation3 + $0x38] sm:$0xf0]  ;;  %v5569_v4 = vrot.slane %v5544_v55, 4  ;;  %v8535_v7 = vld [vmem:[%s10806_s7 + $0xd8] sm:$0xff]   ;;  %v8548_v60 = vld [vmem:[%s10806_s7 + $0x288] sm:$0xff]  }
 0x457   : > { %5059 = vst.msk [vmem:[#allocation3 + $0x48] sm:$0xff] %vm664_vm0, %v5049_v11  ;;  %5492 = vmatpush1.bf16.msra.mxu1 %v8491_v52  ;;  %5642 = vmatpush1.bf16.msra.mxu0 %v8492_v39  ;;  %v5570_v0 = vrot.slane %v5545_v13, 4  ;;  %v8538_v52 = vld [vmem:[%s10806_s7 + $0x170] sm:$0xff]   ;;  %v8539_v39 = vld [vmem:[%s10806_s7 + $0xe8] sm:$0xff]   ;;  %v8540_v53 = vld [vmem:[%s10806_s7 + $0x178] sm:$0xff]  }
 0x458   : > { %5493 = vmatprep.subr.bf16.mxu1 %v10486_v27  ;;  %5643 = vmatprep.subr.bf16.mxu0 %v10486_v27  ;;  %v8541_v11 = vld [vmem:[%s10806_s7 + $0x180] sm:$0xff]   ;;  %v8556_v55 = vld [vmem:[%s10806_s7 + $0x2a8] sm:$0xff]  }
 0x459   : > { %7300 = vmatprep.mubr.msk.bf16.mxu0 %vm664_vm0, %v5570_v0  ;;  %v8542_v13 = vld [vmem:[%s10806_s7 + $0x1e0] sm:$0xff]   ;;  %v5213_v0 = vld [vmem:[#allocation3 + $0x10] sm:$0xf] }
 0x45b   : > { %5494 = vmatpush1.bf16.msra.mxu1 %v8493_v36  ;;  %5644 = vmatpush1.bf16.msra.mxu0 %v8494_v9  ;;  %v5522_v36 = vld [vmem:[#allocation3 + $0x38] sm:$0xf]  ;;  %v8543_v9 = vld [vmem:[%s10806_s7 + $0x188] sm:$0xff]  }
 0x45c   : > { %5495 = vmatprep.subr.bf16.mxu1 %v10486_v27  ;;  %5645 = vmatprep.subr.bf16.mxu0 %v10486_v27 }
 0x45d   : > { %v5698_v16 = vld [vmem:[#allocation3 + $0x40] sm:$0xf0] }
 0x45e   : > { %v5699_v24 = vld [vmem:[#allocation3 + $0x48] sm:$0xf0]  ;;  %v5723_v17 = vrot.slane %v5698_v16, 4 }
 0x45f   : > { %5496 = vmatpush1.bf16.msra.mxu1 %v8495_v34  ;;  %5646 = vmatpush1.bf16.msra.mxu0 %v8496_v61  ;;  %v5724_v2 = vrot.slane %v5699_v24, 4  ;;  %v8544_v34 = vld [vmem:[%s10806_s7 + $0x1e8] sm:$0xff]   ;;  %v8545_v61 = vld [vmem:[%s10806_s7 + $0x1f0] sm:$0xff]  }
 0x460   : > { %5497 = vmatprep.subr.bf16.mxu1 %v10486_v27  ;;  %5647 = vmatprep.subr.bf16.mxu0 %v10486_v27  ;;  %v8551_v24 = vld [vmem:[%s10806_s7 + $0x208] sm:$0xff]  }
 0x463   : > { %5498 = vmatpush1.bf16.msra.mxu1 %v8497_v54  ;;  %5648 = vmatpush1.bf16.msra.mxu0 %v8498_v5  ;;  %v8546_v54 = vld [vmem:[%s10806_s7 + $0x280] sm:$0xff]   ;;  %v5367_v5 = vld [vmem:[#allocation3 + $0x20] sm:$0xf] }
 0x464   : > { %5499 = vmatprep.subr.bf16.mxu1 %v10486_v27  ;;  %5649 = vmatprep.subr.bf16.mxu0 %v10486_v27 }
 0x467   : > { %5500 = vmatpush1.bf16.msra.mxu1 %v8499_v15  ;;  %5650 = vmatpush1.bf16.msra.mxu0 %v8500_v45  ;;  %v5676_v15 = vld [vmem:[#allocation3 + $0x48] sm:$0xf]  ;;  %v8547_v45 = vld [vmem:[%s10806_s7 + $0x1f8] sm:$0xff]  }
 0x468   : > { %5651 = vmatprep.subr.bf16.mxu0 %v10486_v27  ;;  %5789 = vmatprep.subr.bf16.mxu1 %v10486_v27 }
 0x46a   : > { %5514 = vmatmul.mubr.bf16.vlgmr.msra.gmra.mrb[184].mxu1 %v5415_v31  ;;  %v8552_v31 = vld [vmem:[%s10806_s7 + $0x298] sm:$0xff]  }
 0x46b   : > { %5652 = vmatpush1.bf16.msra.mxu0 %v8501_v30  ;;  %5790 = vmatpush1.bf16.msra.mxu1 %v8502_v35  ;;  %v8549_v30 = vld [vmem:[%s10806_s7 + $0x200] sm:$0xff]   ;;  %v8550_v35 = vld [vmem:[%s10806_s7 + $0x290] sm:$0xff]  }
 0x46c   : > { %7351 = vmatprep.mubr.msk.bf16.mxu1 %vm664_vm0, %v5724_v2  ;;  %5653 = vmatprep.subr.bf16.mxu0 %v10486_v27  ;;  %v8553_v2 = vld [vmem:[%s10806_s7 + $0x210] sm:$0xff]  }
 0x46d   : > { %5791 = vmatprep.subr.bf16.mxu1 %v10486_v27 }
 0x46f   : > { %5654 = vmatpush1.bf16.msra.mxu0 %v8503_v42  ;;  %5792 = vmatpush1.bf16.msra.mxu1 %v8504_v44  ;;  %v8554_v42 = vld [vmem:[%s10806_s7 + $0x2a0] sm:$0xff]   ;;  %v8555_v44 = vld [vmem:[%s10806_s7 + $0x218] sm:$0xff]  }
 0x470   : > { %5793 = vmatprep.subr.bf16.mxu1 %v10486_v27  ;;  %5892 = vmatprep.subr.bf16.mxu0 %v10486_v27 }
 0x472   : > { %5668 = vmatmul.mubr.bf16.vlgmr.msra.gmra.mrb[64].mxu0 %v5569_v4  ;;  %v8559_v4 = vld [vmem:[%s10806_s7 + $0x228] sm:$0xff]  }
 0x473   : > { %5794 = vmatpush1.bf16.msra.mxu1 %v8505_v49  ;;  %5893 = vmatpush1.bf16.msra.mxu0 %v8506_v22  ;;  %v8557_v49 = vld [vmem:[%s10806_s7 + $0x220] sm:$0xff]   ;;  %v8558_v22 = vld [vmem:[%s10806_s7 + $0x2b0] sm:$0xff]  }
 0x474   : > { %7362 = vmatprep.mubr.msk.bf16.mxu0 %vm664_vm0, %v5061_v3  ;;  %5795 = vmatprep.subr.bf16.mxu1 %v10486_v27  ;;  %v8560_v3 = vld [vmem:[%s10806_s7 + $0x2b8] sm:$0xff]  }
 0x475   : > { %5894 = vmatprep.subr.bf16.mxu0 %v10486_v27 }
 0x477   : > { %5796 = vmatpush1.bf16.msra.mxu1 %v8507_v32  ;;  %5895 = vmatpush1.bf16.msra.mxu0 %v8508_v43  ;;  %v8561_v32 = vld [vmem:[%s10806_s7 + $0x2c0] sm:$0xff]   ;;  %v5521_v43 = vld [vmem:[#allocation3 + $0x30] sm:$0xf] }
 0x478   : > { %5797 = vmatprep.subr.bf16.mxu1 %v10486_v27  ;;  %5896 = vmatprep.subr.bf16.mxu0 %v10486_v27 }
 0x47b   : > { %5798 = vmatpush1.bf16.msra.mxu1 %v8509_v18  ;;  %5897 = vmatpush1.bf16.msra.mxu0 %v8510_v23  ;;  %v8562_v18 = vld [vmem:[%s10806_s7 + $0x2c8] sm:$0xff]  }
 0x47c   : > { %5799 = vmatprep.subr.bf16.mxu1 %v10486_v27  ;;  %5898 = vmatprep.subr.bf16.mxu0 %v10486_v27  ;;  %v5675_v23 = vld [vmem:[#allocation3 + $0x40] sm:$0xf] }
 0x47f   : > { %5800 = vmatpush1.bf16.msra.mxu1 %v8511_v37  ;;  %5899 = vmatpush1.bf16.msra.mxu0 %v8512_v28 }
 0x480   : > { %5801 = vmatprep.subr.bf16.mxu1 %v10486_v27  ;;  %5900 = vmatprep.subr.bf16.mxu0 %v10486_v27 }
 0x483   : > { %5802 = vmatpush1.bf16.msra.mxu1 %v8513_v12  ;;  %5901 = vmatpush1.bf16.msra.mxu0 %v8514_v20 }
 0x484   : > { %5803 = vmatprep.subr.bf16.mxu1 %v10486_v27  ;;  %5902 = vmatprep.subr.bf16.mxu0 %v10486_v27 }
 0x487   : > { %5804 = vmatpush1.bf16.msra.mxu1 %v8515_v14  ;;  %5903 = vmatpush1.bf16.msra.mxu0 %v8516_v56 }
 0x488   : > { %5805 = vmatprep.subr.bf16.mxu1 %v10486_v27  ;;  %5904 = vmatprep.subr.bf16.mxu0 %v10486_v27 }
 0x48b   : > { %5806 = vmatpush1.bf16.msra.mxu1 %v8517_v29  ;;  %5905 = vmatpush1.bf16.msra.mxu0 %v8518_v10 }
 0x48c   : > { %5807 = vmatprep.subr.bf16.mxu1 %v10486_v27  ;;  %5906 = vmatprep.subr.bf16.mxu0 %v10486_v27 }
 0x48f   : > { %5808 = vmatpush1.bf16.msra.mxu1 %v8519_v26  ;;  %5907 = vmatpush1.bf16.msra.mxu0 %v8520_v62 }
 0x490   : > { %5908 = vmatprep.subr.bf16.mxu0 %v10486_v27  ;;  %5995 = vmatprep.subr.bf16.mxu1 %v10486_v27 }
 0x492   : > { %5822 = vmatmul.mubr.bf16.vlgmr.msra.gmra.mrb[188].mxu1 %v5723_v17 }
 0x493   : > { %5909 = vmatpush1.bf16.msra.mxu0 %v8521_v1  ;;  %5996 = vmatpush1.bf16.msra.mxu1 %v8522_v46 }
 0x494   : > { %7373 = vmatprep.mubr.msk.bf16.mxu1 %vm664_vm0, %v5214_v59  ;;  %5910 = vmatprep.subr.bf16.mxu0 %v10486_v27 }
 0x495   : > { %5997 = vmatprep.subr.bf16.mxu1 %v10486_v27 }
 0x497   : > { %5911 = vmatpush1.bf16.msra.mxu0 %v8523_v51  ;;  %5998 = vmatpush1.bf16.msra.mxu1 %v8524_v21 }
 0x498   : > { %5999 = vmatprep.subr.bf16.mxu1 %v10486_v27  ;;  %6098 = vmatprep.subr.bf16.mxu0 %v10486_v27 }
 0x49a   : > { %5925 = vmatmul.mubr.bf16.vlgmr.msra.gmra.mrb[68].mxu0 %v5060_v50 }
 0x49b   : > { %6000 = vmatpush1.bf16.msra.mxu1 %v8525_v6  ;;  %6099 = vmatpush1.bf16.msra.mxu0 %v8526_v40 }
 0x49c   : > { %7384 = vmatprep.mubr.msk.bf16.mxu0 %vm664_vm0, %v5368_v8  ;;  %6001 = vmatprep.subr.bf16.mxu1 %v10486_v27 }
 0x49d   : > { %6100 = vmatprep.subr.bf16.mxu0 %v10486_v27 }
 0x49f   : > { %6002 = vmatpush1.bf16.msra.mxu1 %v8527_v41  ;;  %6101 = vmatpush1.bf16.msra.mxu0 %v8528_v57 }
 0x4a0   : > { %6003 = vmatprep.subr.bf16.mxu1 %v10486_v27  ;;  %6102 = vmatprep.subr.bf16.mxu0 %v10486_v27 }
 0x4a3   : > { %6004 = vmatpush1.bf16.msra.mxu1 %v8529_v48  ;;  %6103 = vmatpush1.bf16.msra.mxu0 %v8530_v25 }
 0x4a4   : > { %6005 = vmatprep.subr.bf16.mxu1 %v10486_v27  ;;  %6104 = vmatprep.subr.bf16.mxu0 %v10486_v27 }
 0x4a7   : > { %6006 = vmatpush1.bf16.msra.mxu1 %v8531_v38  ;;  %6105 = vmatpush1.bf16.msra.mxu0 %v8532_v47 }
 0x4a8   : > { %6007 = vmatprep.subr.bf16.mxu1 %v10486_v27  ;;  %6106 = vmatprep.subr.bf16.mxu0 %v10486_v27 }
 0x4ab   : > { %6008 = vmatpush1.bf16.msra.mxu1 %v8533_v19  ;;  %6107 = vmatpush1.bf16.msra.mxu0 %v8534_v58 }
 0x4ac   : > { %6009 = vmatprep.subr.bf16.mxu1 %v10486_v27  ;;  %6108 = vmatprep.subr.bf16.mxu0 %v10486_v27 }
 0x4af   : > { %6010 = vmatpush1.bf16.msra.mxu1 %v8535_v7  ;;  %6109 = vmatpush1.bf16.msra.mxu0 %v8536_v33 }
 0x4b0   : > { %6011 = vmatprep.subr.bf16.mxu1 %v10486_v27  ;;  %6110 = vmatprep.subr.bf16.mxu0 %v10486_v27 }
 0x4b3   : > { %6012 = vmatpush1.bf16.msra.mxu1 %v8537_v63  ;;  %6111 = vmatpush1.bf16.msra.mxu0 %v8538_v52 }
 0x4b4   : > { %6013 = vmatprep.subr.bf16.mxu1 %v10486_v27  ;;  %6112 = vmatprep.subr.bf16.mxu0 %v10486_v27 }
 0x4b7   : > { %6014 = vmatpush1.bf16.msra.mxu1 %v8539_v39  ;;  %6113 = vmatpush1.bf16.msra.mxu0 %v8540_v53 }
 0x4b8   : > { %6114 = vmatprep.subr.bf16.mxu0 %v10486_v27  ;;  %6201 = vmatprep.subr.bf16.mxu1 %v10486_v27 }
 0x4ba   : > { %6028 = vmatmul.mubr.bf16.vlgmr.msra.gmra.mrb[192].mxu1 %v5213_v0 }
 0x4bb   : > { %6115 = vmatpush1.bf16.msra.mxu0 %v8541_v11  ;;  %6202 = vmatpush1.bf16.msra.mxu1 %v8542_v13 }
 0x4bc   : > { %7395 = vmatprep.mubr.msk.bf16.mxu1 %vm664_vm0, %v5522_v36  ;;  %6116 = vmatprep.subr.bf16.mxu0 %v10486_v27 }
 0x4bd   : > { %6203 = vmatprep.subr.bf16.mxu1 %v10486_v27 }
 0x4bf   : > { %6117 = vmatpush1.bf16.msra.mxu0 %v8543_v9  ;;  %6204 = vmatpush1.bf16.msra.mxu1 %v8544_v34 }
 0x4c0   : > { %6205 = vmatprep.subr.bf16.mxu1 %v10486_v27  ;;  %6304 = vmatprep.subr.bf16.mxu0 %v10486_v27 }
 0x4c2   : > { %6131 = vmatmul.mubr.bf16.vlgmr.msra.gmra.mrb[72].mxu0 %v5367_v5 }
 0x4c3   : > { %6206 = vmatpush1.bf16.msra.mxu1 %v8545_v61  ;;  %6305 = vmatpush1.bf16.msra.mxu0 %v8546_v54 }
 0x4c4   : > { %7406 = vmatprep.mubr.msk.bf16.mxu0 %vm664_vm0, %v5676_v15  ;;  %6207 = vmatprep.subr.bf16.mxu1 %v10486_v27 }
 0x4c5   : > { %6306 = vmatprep.subr.bf16.mxu0 %v10486_v27 }
 0x4c7   : > { %6208 = vmatpush1.bf16.msra.mxu1 %v8547_v45  ;;  %6307 = vmatpush1.bf16.msra.mxu0 %v8548_v60  ;;  %v7407_v45 = vld [vmem:[%s10807_s8] ss:$0 sm:$0xff] }
 0x4c8   : > { %6209 = vmatprep.subr.bf16.mxu1 %v10486_v27  ;;  %6308 = vmatprep.subr.bf16.mxu0 %v10486_v27 }
 0x4cb   : > { %6210 = vmatpush1.bf16.msra.mxu1 %v8549_v30  ;;  %6309 = vmatpush1.bf16.msra.mxu0 %v8550_v35 }
 0x4cc   : > { %6211 = vmatprep.subr.bf16.mxu1 %v10486_v27  ;;  %6310 = vmatprep.subr.bf16.mxu0 %v10486_v27 }
 0x4cf   : > { %6212 = vmatpush1.bf16.msra.mxu1 %v8551_v24  ;;  %6311 = vmatpush1.bf16.msra.mxu0 %v8552_v31 }
 0x4d0   : > { %6213 = vmatprep.subr.bf16.mxu1 %v10486_v27  ;;  %6312 = vmatprep.subr.bf16.mxu0 %v10486_v27 }
 0x4d3   : > { %6214 = vmatpush1.bf16.msra.mxu1 %v8553_v2  ;;  %6313 = vmatpush1.bf16.msra.mxu0 %v8554_v42 }
 0x4d4   : > { %6215 = vmatprep.subr.bf16.mxu1 %v10486_v27  ;;  %6314 = vmatprep.subr.bf16.mxu0 %v10486_v27 }
 0x4d7   : > { %6216 = vmatpush1.bf16.msra.mxu1 %v8555_v44  ;;  %6315 = vmatpush1.bf16.msra.mxu0 %v8556_v55 }
 0x4d8   : > { %6217 = vmatprep.subr.bf16.mxu1 %v10486_v27  ;;  %6316 = vmatprep.subr.bf16.mxu0 %v10486_v27 }
 0x4db   : > { %6218 = vmatpush1.bf16.msra.mxu1 %v8557_v49  ;;  %6317 = vmatpush1.bf16.msra.mxu0 %v8558_v22 }
 0x4dc   : > { %6219 = vmatprep.subr.bf16.mxu1 %v10486_v27  ;;  %6318 = vmatprep.subr.bf16.mxu0 %v10486_v27 }
 0x4df   : > { %6220 = vmatpush1.bf16.msra.mxu1 %v8559_v4  ;;  %6319 = vmatpush1.bf16.msra.mxu0 %v8560_v3 }
 0x4e0   : > { %6320 = vmatprep.subr.bf16.mxu0 %v10486_v27 }
 0x4e2   : > { %6234 = vmatmul.mubr.bf16.vlgmr.msra.gmra.mrb[196].mxu1 %v5521_v43 }
 0x4e3   : > { %6321 = vmatpush1.bf16.msra.mxu0 %v8561_v32 }
 0x4e4   : > { %6322 = vmatprep.subr.bf16.mxu0 %v10486_v27 }
 0x4e7   : > { %6323 = vmatpush1.bf16.msra.mxu0 %v8562_v18 }
 0x4ea   : > { %6337 = vmatmul.mubr.bf16.vlgmr.msra.gmra.mrb[76].mxu0 %v5675_v23 }
 0x515   : > { %v5207_v37 = vpop.f32.mrb[180].mxu1 }
 0x516   : > { %v5209_v28 = vpop.f32.mrb[181].mxu1 }
 0x517   : > { %v5210_v12 = vpop.f32.mrb[182].mxu1 }
 0x518   : > { %v5211_v20 = vpop.f32.mrb[183].mxu1 }
 0x51d   : > { %v5361_v14 = vpop.f32.mrb[60].mxu0 }
 0x51e   : > { %v5363_v56 = vpop.f32.mrb[61].mxu0 }
 0x51f   : > { %v5364_v29 = vpop.f32.mrb[62].mxu0 }
 0x520   : > { %v5365_v10 = vpop.f32.mrb[63].mxu0 }
 0x53d   : > { %v5515_v26 = vpop.f32.mrb[184].mxu1 }
 0x53e   : > { %v5517_v62 = vpop.f32.mrb[185].mxu1 }
 0x53f   : > { %v5518_v16 = vpop.f32.mrb[186].mxu1 }
 0x540   : > { %v5519_v1 = vpop.f32.mrb[187].mxu1 }
 0x545   : > { %v5669_v46 = vpop.f32.mrb[64].mxu0 }
 0x546   : > { %v5671_v17 = vpop.f32.mrb[65].mxu0 }
 0x547   : > { %v5672_v59 = vpop.f32.mrb[66].mxu0 }
 0x548   : > { %v5673_v51 = vpop.f32.mrb[67].mxu0 }
 0x565   : > { %v5823_v27 = vpop.f32.mrb[188].mxu1 }
 0x566   : > { %v5825_v21 = vpop.f32.mrb[189].mxu1 }
 0x567   : > { %v5826_v6 = vpop.f32.mrb[190].mxu1 }
 0x568   : > { %v5827_v40 = vpop.f32.mrb[191].mxu1 }
 0x56d   : > { %v5926_v50 = vpop.f32.mrb[68].mxu0 }
 0x56e   : > { %v5927_v8 = vadd.f32 %v5926_v50, %v5207_v37  ;;  %v5928_v41 = vpop.f32.mrb[69].mxu0 }
 0x56f   : > { %v5929_v57 = vpop.f32.mrb[70].mxu0 }
 0x570   : > { %v5930_v48 = vpop.f32.mrb[71].mxu0 }
 0x58d   : > { %v6029_v25 = vpop.f32.mrb[192].mxu1 }
 0x58e   : > { %v6030_v38 = vadd.f32 %v6029_v25, %v5361_v14  ;;  %v6031_v47 = vpop.f32.mrb[193].mxu1 }
 0x58f   : > { %v6032_v19 = vpop.f32.mrb[194].mxu1 }
 0x590   : > { %v6344_v58 = vadd.f32 %v6030_v38, %v5927_v8  ;;  %v6033_v7 = vpop.f32.mrb[195].mxu1 }
 0x595   : > { %v6132_v33 = vpop.f32.mrb[72].mxu0 }
 0x596   : > { %v6133_v63 = vadd.f32 %v6132_v33, %v5515_v26  ;;  %v6134_v52 = vpop.f32.mrb[73].mxu0 }
 0x597   : > { %v6135_v39 = vpop.f32.mrb[74].mxu0 }
 0x598   : > { %v6136_v53 = vpop.f32.mrb[75].mxu0 }
 0x5b5   : > { %v6235_v11 = vpop.f32.mrb[196].mxu1 }
 0x5b6   : > { %v6236_v13 = vadd.f32 %v6235_v11, %v5669_v46  ;;  %v6237_v0 = vpop.f32.mrb[197].mxu1 }
 0x5b7   : > { %v6238_v36 = vpop.f32.mrb[198].mxu1 }
 0x5b8   : > { %v6345_v9 = vadd.f32 %v6236_v13, %v6133_v63  ;;  %v6239_v34 = vpop.f32.mrb[199].mxu1 }
 0x5ba   : > { %v6346_v61 = vadd.f32 %v6345_v9, %v6344_v58 }
 0x5bd   : > { %v6338_v54 = vpop.f32.mrb[76].mxu0 }
 0x5be   : > { %v6339_v5 = vadd.f32 %v6338_v54, %v5823_v27  ;;  %v6340_v15 = vpop.f32.mrb[77].mxu0 }
 0x5bf   : > { %v6341_v60 = vpop.f32.mrb[78].mxu0 }
 0x5c0   : > { %v6347_v30 = vadd.f32 %v6346_v61, %v6339_v5  ;;  %v6342_v35 = vpop.f32.mrb[79].mxu0 }
 0x5c2   : > { %v6355_v24 = vadd.f32 %v7407_v45, %v6347_v30 }
 0x5c4   : > { %6357 = vst.msk [vmem:[%s335_s14] sm:$0xff] %vm6356_vm1, %v6355_v24 }
 0x5c5 PF: > { %s19_s30 = sadd.s32 1, %s8580_s30  }
 0x5c6   : > { %p16_p5 = scmp.ge.s32.totalorder %s19_s30, 4  }
 0x5c8   :  { %18 = sbr.rel (!%p16_p5) target bundleno = 1 (0x1), region = 96 }

</bundles_post_ra>
